<compile_context>
chip_gen: v5e
topology: v5e:2x2
jax: 0.10.0
libtpu: 0.0.40
codegen_flags: <defaults>
</compile_context>

<pallas_src>
import functools

import jax
import jax.numpy as jnp
from jax.experimental import pallas as pl
from jax.experimental.pallas import tpu as pltpu


# ----------------------------------------------------------------------------
# Setup-time probe: can pltpu.roll (XLU sublane rotate) be used for the dilated
# tap on this target / shape, with jnp.roll semantics?  If not, fall back to
# the known-good jnp.roll (slice+concat) — correctness is never at risk.
# ----------------------------------------------------------------------------
def _probe_pltpu_roll(rows, cols, shift):
    def kern(x_ref, o_ref):
        o_ref[...] = pltpu.roll(x_ref[...], shift, 0)

    x = jnp.arange(rows * cols, dtype=jnp.float32).reshape(rows, cols)
    try:
        got = pl.pallas_call(
            kern,
            out_shape=jax.ShapeDtypeStruct((rows, cols), jnp.float32),
            in_specs=[pl.BlockSpec(memory_space=pltpu.MemorySpace.VMEM)],
            out_specs=pl.BlockSpec(memory_space=pltpu.MemorySpace.VMEM),
        )(x)
        return bool(jnp.array_equal(got, jnp.roll(x, shift, 0)))
    except Exception:  # lowering unsupported on this target/shape -> fall back
        return False


# ----------------------------------------------------------------------------
# Fused Pallas kernel: the whole residual stack in one invocation
# ----------------------------------------------------------------------------
def _stack_kernel(
    x_ref,        # (B*T, C)        bf16 input residual, batch folded into sublanes
    cgf_ref,      # (nb*B, 2C)      f32  un-broadcast [cond_gate | cond_filter] rows
    wgf_ref,      # (nb, 2C, 2C)    bf16 fused causal gate|filter weights
    wrs_ref,      # (nb, C, C+S)    bf16 fused conv_res|conv_skip weights
    brs_ref,      # (nb, 1, C+S)    f32  fused res|skip biases
    skip_ref,     # (B*T, nb*S)     f32  output: every block's skip columns
    *, dilations, batch, time, res_ch, skip_ch, use_hw_roll,
):
    f32, bf16 = jnp.float32, jnp.bfloat16
    C = res_ch

    # Residual activation stays on-chip (f32) for the whole stack.  Valid
    # (causal) data is kept right-aligned inside each batch element's T rows:
    # after block k, the first sum(dilations[:k+1]) rows per element are
    # don't-care.  The output only ever reads the last skip_size rows, which
    # the wrapper guarantees via skip_size <= T - sum(dilations).
    res = x_ref[...].astype(f32)                                 # (B*T, C)

    skip_cols = []
    for blk, d in enumerate(dilations):                          # static unroll
        # Un-broadcast condition bias ([cg | cf], one row per batch element),
        # expanded over time via a sublane broadcast.  Hoisted once per block.
        cgf = jnp.concatenate(
            [jnp.broadcast_to(cgf_ref[pl.ds(blk * batch + b, 1), :],
                              (time, 2 * C))
             for b in range(batch)], axis=0)                     # (B*T, 2C)

        x1 = res                                                 # tap at t
        # Tap at t-d.  Wrapped / cross-batch rows only ever land inside the
        # causally-invalid prefix, so they never reach a valid output.
        if use_hw_roll:
            x0 = pltpu.roll(res, d, 0)                           # XLU sublane rotate
        else:
            x0 = jnp.roll(res, d, 0)                             # slice+concat fallback

        # ONE fused MXU matmul for gate|filter: K = N = 2C.
        xcat = jnp.concatenate([x0, x1], axis=1).astype(bf16)    # (B*T, 2C)
        gf = jnp.dot(xcat, wgf_ref[blk], preferred_element_type=f32) + cgf
        out = jnp.tanh(gf[:, C:]) * jax.nn.sigmoid(gf[:, :C])    # gated activation

        # ONE fused MXU matmul for res|skip: columns [0:C) res, [C:) skip.
        rs = (jnp.dot(out.astype(bf16), wrs_ref[blk],
                      preferred_element_type=f32) + brs_ref[blk])
        res = rs[:, :C] + x1              # residual update (right-aligned add)
        skip_cols.append(rs[:, C:])       # skip over ALL rows; wrapper keeps tail

    # Single lane-dense store of every block's skip columns.
    skip_ref[...] = jnp.concatenate(skip_cols, axis=1)           # (B*T, nb*S)


def _stack_pallas(x_flat, cgf, wgf, wrs, brs, dilations, batch, time, use_hw_roll):
    nb = len(dilations)
    res_ch = x_flat.shape[-1]
    skip_ch = wrs.shape[-1] - res_ch

    kernel = functools.partial(
        _stack_kernel, dilations=tuple(dilations), batch=batch, time=time,
        res_ch=res_ch, skip_ch=skip_ch, use_hw_roll=use_hw_roll)

    out_rows, out_cols = batch * time, nb * skip_ch
    args = (x_flat, cgf, wgf, wrs, brs)
    resident = sum(int(a.size) * a.dtype.itemsize for a in args)
    resident += out_rows * out_cols * 4
    # Scoped-VMEM limit sized from the actual resident footprint plus headroom
    # for relayout temps, capped well below every generation's physical VMEM.
    vmem_limit = int(min(64 << 20, 6 * resident + (8 << 20)))

    vmem = lambda: pl.BlockSpec(memory_space=pltpu.MemorySpace.VMEM)
    # TODO(synk): for v7x (2 TensorCores) or large T, add a leading "parallel"
    #             grid axis (batch / right-aligned time tiles with a
    #             sum(dilations) halo); for large C or T, move the block loop
    #             onto an "arbitrary" grid axis with the residual in VMEM
    #             scratch so per-block weights/biases stream instead of being
    #             fully resident.  Not worth the ~0.35us/step at this demo size.
    return pl.pallas_call(
        kernel,
        out_shape=jax.ShapeDtypeStruct((out_rows, out_cols), jnp.float32),
        in_specs=[vmem() for _ in args],
        out_specs=vmem(),
        compiler_params=pltpu.CompilerParams(vmem_limit_bytes=vmem_limit),
    )(*args)


# ----------------------------------------------------------------------------
# Parameter setup (deterministic, synthetic) & one-time packing
# ----------------------------------------------------------------------------
def init_block_params(key, res_ch, skip_ch, cond_ch):
    ks = jax.random.split(key, 10)
    n = lambda k, s: (0.1 * jax.random.normal(k, s, jnp.float32))
    return {
        # nn.Conv1d weight layouts (out, in, kernel); biases (out,)
        "wg":    n(ks[0], (res_ch, res_ch, 2)),        # causal_gate   (bias=False)
        "wf":    n(ks[1], (res_ch, res_ch, 2)),        # causal_filter (bias=False)
        "wcg":   n(ks[2], (res_ch, cond_ch, 1)),
        "bcg":   n(ks[3], (res_ch,)),
        "wcf":   n(ks[4], (res_ch, cond_ch, 1)),
        "bcf":   n(ks[5], (res_ch,)),
        "wres":  n(ks[6], (res_ch, res_ch, 1)),
        "bres":  n(ks[7], (res_ch,)),
        "wskip": n(ks[8], (skip_ch, res_ch, 1)),
        "bskip": n(ks[9], (skip_ch,)),
    }


def pack_params(params_list, compute_dtype=jnp.bfloat16):
    """Pack per-block PyTorch-layout params into fused, kernel-ready arrays.

    Done ONCE up front:
      wgf : (nb, 2C, 2C)   [[wg_tap0, wf_tap0], [wg_tap1, wf_tap1]]  (bf16)
      wrs : (nb, C, C+S)   [conv_res | conv_skip]                    (bf16)
      brs : (nb, 1, C+S)   [bres | bskip]                            (f32)
      wc  : (nb, 2C, cond) [condition_gate ; condition_filter]       (f32)
      bc  : (nb, 2C)       [bcg ; bcf]                               (f32)
    """
    def gf(p):
        wg0, wg1 = p["wg"][:, :, 0].T, p["wg"][:, :, 1].T   # (in, out)
        wf0, wf1 = p["wf"][:, :, 0].T, p["wf"][:, :, 1].T
        return jnp.concatenate(
            [jnp.concatenate([wg0, wf0], axis=1),
             jnp.concatenate([wg1, wf1], axis=1)], axis=0)  # (2C, 2C)

    stack = lambda f: jnp.stack([f(p) for p in params_list])
    return {
        "wgf": stack(gf).astype(compute_dtype),
        "wrs": stack(lambda p: jnp.concatenate(
            [p["wres"][:, :, 0].T, p["wskip"][:, :, 0].T], axis=1)
        ).astype(compute_dtype),
        "brs": stack(lambda p: jnp.concatenate(
            [p["bres"], p["bskip"]])[None, :]).astype(jnp.float32),
        "wc": stack(lambda p: jnp.concatenate(
            [p["wcg"][:, :, 0], p["wcf"][:, :, 0]], axis=0)).astype(jnp.float32),
        "bc": stack(lambda p: jnp.concatenate(
            [p["bcg"], p["bcf"]])).astype(jnp.float32),
    }


# ----------------------------------------------------------------------------
# ResidualStack forward (single fused kernel under jit)
# ----------------------------------------------------------------------------
def make_residual_stack_forward(dilations, skip_size, use_hw_roll=False):
    dilations = tuple(int(d) for d in dilations)

    @jax.jit
    def forward(x_ncl, cond_ncl, packed):
        """x_ncl: (B, res_ch, T); cond_ncl: (B, cond_ch, 1).  Returns
        (num_blocks, B, skip_ch, skip_size), matching torch.stack(skips)."""
        B, C, T = x_ncl.shape
        nb = len(dilations)
        skip_ch = packed["wrs"].shape[-1] - C
        # Causality invariant: the tail skip_size rows of every block lie in
        # the right-aligned valid region, which also keeps every rolled /
        # cross-batch row out of the output.
        assert skip_size <= T - sum(dilations), "skip_size too large for T / dilations"

        # NCL -> (B*T, C) bf16: channels on lanes, batch folded into sublanes.
        x_flat = (jnp.transpose(x_ncl, (0, 2, 1))
                  .reshape(B * T, C).astype(jnp.bfloat16))

        # Hoisted 1x1 condition convs -> UN-broadcast [cg|cf] bias rows, one
        # (2C,) row per (block, batch); broadcast over T happens in-kernel.
        cvec = cond_ncl[:, :, 0].astype(jnp.float32)                    # (B, cond)
        cgf = (jnp.einsum("bk,nok->nbo", cvec, packed["wc"])
               + packed["bc"][:, None, :]).reshape(nb * B, 2 * C)

        skip = _stack_pallas(x_flat, cgf, packed["wgf"], packed["wrs"],
                             packed["brs"], dilations, B, T, use_hw_roll)
        # (B*T, nb*skip_ch): keep only the valid tail rows, then reorder to
        # (nb, B, skip_ch, skip_size) to match torch.stack(skips).
        skip = skip.reshape(B, T, nb, skip_ch)[:, T - skip_size:, :, :]
        return skip.transpose(2, 0, 3, 1)

    return forward


# ----------------------------------------------------------------------------
# Pure-JAX reference (NCL layout, mirrors the intended PyTorch math, f32)
# ----------------------------------------------------------------------------
def _ref_block(x, c, p, d, skip_size):
    T = x.shape[2]
    T_out = T - d
    x0, x1 = x[:, :, :T_out], x[:, :, d:]
    mm = lambda w, v: jnp.einsum("oi,bit->bot", w, v)
    gate = mm(p["wg"][:, :, 0], x0) + mm(p["wg"][:, :, 1], x1) \
        + mm(p["wcg"][:, :, 0], c) + p["bcg"][None, :, None]
    filt = mm(p["wf"][:, :, 0], x0) + mm(p["wf"][:, :, 1], x1) \
        + mm(p["wcf"][:, :, 0], c) + p["bcf"][None, :, None]
    out = jnp.tanh(filt) * jax.nn.sigmoid(gate)
    skip = (mm(p["wskip"][:, :, 0], out) + p["bskip"][None, :, None])[:, :, -skip_size:]
    res = mm(p["wres"][:, :, 0], out) + p["bres"][None, :, None] + x1
    return res, skip


def _ref_stack(x, c, skip_size, params_list, dilations):
    out, skips = x, []
    for p, d in zip(params_list, dilations):
        out, skip = _ref_block(out, c, p, d, skip_size)
        skips.append(skip)
    return jnp.stack(skips)


# ----------------------------------------------------------------------------
if __name__ == "__main__":
    key = jax.random.PRNGKey(0)
    B, T = 2, 32
    res_channels, skip_channels, cond_channels = 32, 1, 12
    layer_size, stack_size = 3, 2
    dilations = [2 ** l for _ in range(stack_size) for l in range(layer_size)]
    skip_size = 8  # <= T - sum(dilations) = 18

    k_x, k_c, k_p = jax.random.split(key, 3)
    x = jax.random.normal(k_x, (B, res_channels, T), jnp.float32)        # NCL
    cond = jax.random.normal(k_c, (B, cond_channels, 1), jnp.float32)    # NCL, len-1 time

    pkeys = jax.random.split(k_p, len(dilations))
    params_list = [init_block_params(k, res_channels, skip_channels, cond_channels)
                   for k in pkeys]
    packed = pack_params(params_list)                       # layout work done once

    # Prefer the XLU rotate for the dilated tap iff it lowers & matches jnp.roll.
    use_hw_roll = all(_probe_pltpu_roll(B * T, res_channels, d)
                      for d in sorted(set(dilations)))

    forward = make_residual_stack_forward(dilations, skip_size, use_hw_roll)

    out = jax.block_until_ready(forward(x, cond, packed))
    assert out.shape == (len(dilations), B, skip_channels, skip_size), out.shape

    ref = _ref_stack(x, cond, skip_size, params_list, dilations)
    # bf16 matmul inputs vs. the f32 reference: tolerance loosened accordingly.
    assert jnp.allclose(out, ref, atol=5e-2, rtol=5e-2), \
        float(jnp.max(jnp.abs(out - ref)))

    print("KERNEL_OK")
</pallas_src>

<mosaic_0001>
module attributes {stable_mosaic.version = 11 : i64} {
  func.func @kern(%arg0: memref<64x32xf32, #tpu.memory_space<vmem>>, %arg1: memref<64x32xf32, #tpu.memory_space<vmem>>) attributes {dimension_semantics = [], scalar_prefetch = 0 : i64, scratch_operands = 0 : i64, tpu.core_type = #tpu.core_type<tc>} {
    %c0 = arith.constant 0 : index
    %c0_0 = arith.constant 0 : index
    %0 = vector.load %arg0[%c0, %c0_0] : memref<64x32xf32, #tpu.memory_space<vmem>>, vector<64x32xf32>
    %c1_i32 = arith.constant 1 : i32
    %1 = tpu.dynamic_rotate %0 by %c1_i32 dim 0 : vector<64x32xf32>, i32 -> vector<64x32xf32>
    %c0_1 = arith.constant 0 : index
    %c0_2 = arith.constant 0 : index
    %2 = vector.load %arg1[%c0_1, %c0_2] : memref<64x32xf32, #tpu.memory_space<vmem>>, vector<64x32xf32>
    tpu.vector_store %arg1[%c0_1, %c0_2], %1 {strides = array<i32>} : memref<64x32xf32, #tpu.memory_space<vmem>>, vector<64x32xf32>,
    return
  }
}

module attributes {stable_mosaic.version = 11 : i64} {
  func.func @_stack_kernel(%arg0: memref<64x32xbf16, #tpu.memory_space<vmem>>, %arg1: memref<12x64xf32, #tpu.memory_space<vmem>>, %arg2: memref<6x64x64xbf16, #tpu.memory_space<vmem>>, %arg3: memref<6x32x33xbf16, #tpu.memory_space<vmem>>, %arg4: memref<6x1x33xf32, #tpu.memory_space<vmem>>, %arg5: memref<64x6xf32, #tpu.memory_space<vmem>>) attributes {dimension_semantics = [], scalar_prefetch = 0 : i64, scratch_operands = 0 : i64, tpu.core_type = #tpu.core_type<tc>} {
    %c0 = arith.constant 0 : index
    %c0_0 = arith.constant 0 : index
    %0 = vector.load %arg0[%c0, %c0_0] : memref<64x32xbf16, #tpu.memory_space<vmem>>, vector<64x32xbf16>
    %1 = arith.extf %0 : vector<64x32xbf16> to vector<64x32xf32>
    %c0_1 = arith.constant 0 : index
    %c0_2 = arith.constant 0 : index
    %2 = vector.load %arg1[%c0_1, %c0_2] : memref<12x64xf32, #tpu.memory_space<vmem>>, vector<1x64xf32>
    %3 = vector.shape_cast %2 : vector<1x64xf32> to vector<1x64xf32>
    %4 = vector.broadcast %3 : vector<1x64xf32> to vector<32x64xf32>
    %c1 = arith.constant 1 : index
    %c0_3 = arith.constant 0 : index
    %5 = vector.load %arg1[%c1, %c0_3] : memref<12x64xf32, #tpu.memory_space<vmem>>, vector<1x64xf32>
    %6 = vector.shape_cast %5 : vector<1x64xf32> to vector<1x64xf32>
    %7 = vector.broadcast %6 : vector<1x64xf32> to vector<32x64xf32>
    %8 = tpu.concatenate %4, %7 in 0 : vector<32x64xf32>, vector<32x64xf32> -> vector<64x64xf32>
    %9 = vector.extract_strided_slice %1 {offsets = [63, 0], sizes = [1, 32], strides = [1, 1]} : vector<64x32xf32> to vector<1x32xf32>
    %10 = vector.extract_strided_slice %1 {offsets = [0, 0], sizes = [63, 32], strides = [1, 1]} : vector<64x32xf32> to vector<63x32xf32>
    %11 = tpu.concatenate %9, %10 in 0 : vector<1x32xf32>, vector<63x32xf32> -> vector<64x32xf32>
    %12 = tpu.concatenate %11, %1 in 1 : vector<64x32xf32>, vector<64x32xf32> -> vector<64x64xf32>
    %13 = arith.truncf %12 : vector<64x64xf32> to vector<64x64xbf16>
    %c0_4 = arith.constant 0 : index
    %c0_5 = arith.constant 0 : index
    %c0_6 = arith.constant 0 : index
    %14 = vector.load %arg2[%c0_4, %c0_5, %c0_6] : memref<6x64x64xbf16, #tpu.memory_space<vmem>>, vector<1x64x64xbf16>
    %15 = vector.shape_cast %14 : vector<1x64x64xbf16> to vector<64x64xbf16>
    %cst = arith.constant dense<0.000000e+00> : vector<64x64xf32>
    %16 = tpu.matmul %13, %15, %cst {dimension_numbers = #tpu.dot_dimension_numbers<[1], [0], [0], [1], [0, 0, 1, 1], [], []>} : vector<64x64xbf16>, vector<64x64xbf16>, vector<64x64xf32> -> vector<64x64xf32>
    %17 = arith.addf %16, %8 : vector<64x64xf32>
    %18 = vector.extract_strided_slice %17 {offsets = [0, 32], sizes = [64, 32], strides = [1, 1]} : vector<64x64xf32> to vector<64x32xf32>
    %19 = math.tanh %18 : vector<64x32xf32>
    %20 = vector.extract_strided_slice %17 {offsets = [0, 0], sizes = [64, 32], strides = [1, 1]} : vector<64x64xf32> to vector<64x32xf32>
    %21 = arith.negf %20 : vector<64x32xf32>
    %22 = math.exp %21 : vector<64x32xf32>
    %cst_7 = arith.constant 1.000000e+00 : f32
    %23 = vector.broadcast %cst_7 : f32 to vector<64x32xf32>
    %24 = arith.addf %23, %22 : vector<64x32xf32>
    %25 = arith.divf %23, %24 : vector<64x32xf32>
    %26 = arith.mulf %19, %25 : vector<64x32xf32>
    %27 = arith.truncf %26 : vector<64x32xf32> to vector<64x32xbf16>
    %c0_8 = arith.constant 0 : index
    %c0_9 = arith.constant 0 : index
    %c0_10 = arith.constant 0 : index
    %28 = vector.load %arg3[%c0_8, %c0_9, %c0_10] : memref<6x32x33xbf16, #tpu.memory_space<vmem>>, vector<1x32x33xbf16>
    %29 = vector.shape_cast %28 : vector<1x32x33xbf16> to vector<32x33xbf16>
    %cst_11 = arith.constant dense<0.000000e+00> : vector<64x33xf32>
    %30 = tpu.matmul %27, %29, %cst_11 {dimension_numbers = #tpu.dot_dimension_numbers<[1], [0], [0], [1], [0, 0, 1, 1], [], []>} : vector<64x32xbf16>, vector<32x33xbf16>, vector<64x33xf32> -> vector<64x33xf32>
    %c0_12 = arith.constant 0 : index
    %c0_13 = arith.constant 0 : index
    %c0_14 = arith.constant 0 : index
    %31 = vector.load %arg4[%c0_12, %c0_13, %c0_14] : memref<6x1x33xf32, #tpu.memory_space<vmem>>, vector<1x1x33xf32>
    %32 = vector.shape_cast %31 : vector<1x1x33xf32> to vector<1x33xf32>
    %33 = vector.broadcast %32 : vector<1x33xf32> to vector<64x33xf32>
    %34 = arith.addf %30, %33 : vector<64x33xf32>
    %35 = vector.extract_strided_slice %34 {offsets = [0, 0], sizes = [64, 32], strides = [1, 1]} : vector<64x33xf32> to vector<64x32xf32>
    %36 = arith.addf %35, %1 : vector<64x32xf32>
    %37 = vector.extract_strided_slice %34 {offsets = [0, 32], sizes = [64, 1], strides = [1, 1]} : vector<64x33xf32> to vector<64x1xf32>
    %c2 = arith.constant 2 : index
    %c0_15 = arith.constant 0 : index
    %38 = vector.load %arg1[%c2, %c0_15] : memref<12x64xf32, #tpu.memory_space<vmem>>, vector<1x64xf32>
    %39 = vector.shape_cast %38 : vector<1x64xf32> to vector<1x64xf32>
    %40 = vector.broadcast %39 : vector<1x64xf32> to vector<32x64xf32>
    %c3 = arith.constant 3 : index
    %c0_16 = arith.constant 0 : index
    %41 = vector.load %arg1[%c3, %c0_16] : memref<12x64xf32, #tpu.memory_space<vmem>>, vector<1x64xf32>
    %42 = vector.shape_cast %41 : vector<1x64xf32> to vector<1x64xf32>
    %43 = vector.broadcast %42 : vector<1x64xf32> to vector<32x64xf32>
    %44 = tpu.concatenate %40, %43 in 0 : vector<32x64xf32>, vector<32x64xf32> -> vector<64x64xf32>
    %45 = vector.extract_strided_slice %36 {offsets = [62, 0], sizes = [2, 32], strides = [1, 1]} : vector<64x32xf32> to vector<2x32xf32>
    %46 = vector.extract_strided_slice %36 {offsets = [0, 0], sizes = [62, 32], strides = [1, 1]} : vector<64x32xf32> to vector<62x32xf32>
    %47 = tpu.concatenate %45, %46 in 0 : vector<2x32xf32>, vector<62x32xf32> -> vector<64x32xf32>
    %48 = tpu.concatenate %47, %36 in 1 : vector<64x32xf32>, vector<64x32xf32> -> vector<64x64xf32>
    %49 = arith.truncf %48 : vector<64x64xf32> to vector<64x64xbf16>
    %c1_17 = arith.constant 1 : index
    %c0_18 = arith.constant 0 : index
    %c0_19 = arith.constant 0 : index
    %50 = vector.load %arg2[%c1_17, %c0_18, %c0_19] : memref<6x64x64xbf16, #tpu.memory_space<vmem>>, vector<1x64x64xbf16>
    %51 = vector.shape_cast %50 : vector<1x64x64xbf16> to vector<64x64xbf16>
    %cst_20 = arith.constant dense<0.000000e+00> : vector<64x64xf32>
    %52 = tpu.matmul %49, %51, %cst_20 {dimension_numbers = #tpu.dot_dimension_numbers<[1], [0], [0], [1], [0, 0, 1, 1], [], []>} : vector<64x64xbf16>, vector<64x64xbf16>, vector<64x64xf32> -> vector<64x64xf32>
    %53 = arith.addf %52, %44 : vector<64x64xf32>
    %54 = vector.extract_strided_slice %53 {offsets = [0, 32], sizes = [64, 32], strides = [1, 1]} : vector<64x64xf32> to vector<64x32xf32>
    %55 = math.tanh %54 : vector<64x32xf32>
    %56 = vector.extract_strided_slice %53 {offsets = [0, 0], sizes = [64, 32], strides = [1, 1]} : vector<64x64xf32> to vector<64x32xf32>
    %57 = arith.negf %56 : vector<64x32xf32>
    %58 = math.exp %57 : vector<64x32xf32>
    %cst_21 = arith.constant 1.000000e+00 : f32
    %59 = vector.broadcast %cst_21 : f32 to vector<64x32xf32>
    %60 = arith.addf %59, %58 : vector<64x32xf32>
    %61 = arith.divf %59, %60 : vector<64x32xf32>
    %62 = arith.mulf %55, %61 : vector<64x32xf32>
    %63 = arith.truncf %62 : vector<64x32xf32> to vector<64x32xbf16>
    %c1_22 = arith.constant 1 : index
    %c0_23 = arith.constant 0 : index
    %c0_24 = arith.constant 0 : index
    %64 = vector.load %arg3[%c1_22, %c0_23, %c0_24] : memref<6x32x33xbf16, #tpu.memory_space<vmem>>, vector<1x32x33xbf16>
    %65 = vector.shape_cast %64 : vector<1x32x33xbf16> to vector<32x33xbf16>
    %cst_25 = arith.constant dense<0.000000e+00> : vector<64x33xf32>
    %66 = tpu.matmul %63, %65, %cst_25 {dimension_numbers = #tpu.dot_dimension_numbers<[1], [0], [0], [1], [0, 0, 1, 1], [], []>} : vector<64x32xbf16>, vector<32x33xbf16>, vector<64x33xf32> -> vector<64x33xf32>
    %c1_26 = arith.constant 1 : index
    %c0_27 = arith.constant 0 : index
    %c0_28 = arith.constant 0 : index
    %67 = vector.load %arg4[%c1_26, %c0_27, %c0_28] : memref<6x1x33xf32, #tpu.memory_space<vmem>>, vector<1x1x33xf32>
    %68 = vector.shape_cast %67 : vector<1x1x33xf32> to vector<1x33xf32>
    %69 = vector.broadcast %68 : vector<1x33xf32> to vector<64x33xf32>
    %70 = arith.addf %66, %69 : vector<64x33xf32>
    %71 = vector.extract_strided_slice %70 {offsets = [0, 0], sizes = [64, 32], strides = [1, 1]} : vector<64x33xf32> to vector<64x32xf32>
    %72 = arith.addf %71, %36 : vector<64x32xf32>
    %73 = vector.extract_strided_slice %70 {offsets = [0, 32], sizes = [64, 1], strides = [1, 1]} : vector<64x33xf32> to vector<64x1xf32>
    %c4 = arith.constant 4 : index
    %c0_29 = arith.constant 0 : index
    %74 = vector.load %arg1[%c4, %c0_29] : memref<12x64xf32, #tpu.memory_space<vmem>>, vector<1x64xf32>
    %75 = vector.shape_cast %74 : vector<1x64xf32> to vector<1x64xf32>
    %76 = vector.broadcast %75 : vector<1x64xf32> to vector<32x64xf32>
    %c5 = arith.constant 5 : index
    %c0_30 = arith.constant 0 : index
    %77 = vector.load %arg1[%c5, %c0_30] : memref<12x64xf32, #tpu.memory_space<vmem>>, vector<1x64xf32>
    %78 = vector.shape_cast %77 : vector<1x64xf32> to vector<1x64xf32>
    %79 = vector.broadcast %78 : vector<1x64xf32> to vector<32x64xf32>
    %80 = tpu.concatenate %76, %79 in 0 : vector<32x64xf32>, vector<32x64xf32> -> vector<64x64xf32>
    %81 = vector.extract_strided_slice %72 {offsets = [60, 0], sizes = [4, 32], strides = [1, 1]} : vector<64x32xf32> to vector<4x32xf32>
    %82 = vector.extract_strided_slice %72 {offsets = [0, 0], sizes = [60, 32], strides = [1, 1]} : vector<64x32xf32> to vector<60x32xf32>
    %83 = tpu.concatenate %81, %82 in 0 : vector<4x32xf32>, vector<60x32xf32> -> vector<64x32xf32>
    %84 = tpu.concatenate %83, %72 in 1 : vector<64x32xf32>, vector<64x32xf32> -> vector<64x64xf32>
    %85 = arith.truncf %84 : vector<64x64xf32> to vector<64x64xbf16>
    %c2_31 = arith.constant 2 : index
    %c0_32 = arith.constant 0 : index
    %c0_33 = arith.constant 0 : index
    %86 = vector.load %arg2[%c2_31, %c0_32, %c0_33] : memref<6x64x64xbf16, #tpu.memory_space<vmem>>, vector<1x64x64xbf16>
    %87 = vector.shape_cast %86 : vector<1x64x64xbf16> to vector<64x64xbf16>
    %cst_34 = arith.constant dense<0.000000e+00> : vector<64x64xf32>
    %88 = tpu.matmul %85, %87, %cst_34 {dimension_numbers = #tpu.dot_dimension_numbers<[1], [0], [0], [1], [0, 0, 1, 1], [], []>} : vector<64x64xbf16>, vector<64x64xbf16>, vector<64x64xf32> -> vector<64x64xf32>
    %89 = arith.addf %88, %80 : vector<64x64xf32>
    %90 = vector.extract_strided_slice %89 {offsets = [0, 32], sizes = [64, 32], strides = [1, 1]} : vector<64x64xf32> to vector<64x32xf32>
    %91 = math.tanh %90 : vector<64x32xf32>
    %92 = vector.extract_strided_slice %89 {offsets = [0, 0], sizes = [64, 32], strides = [1, 1]} : vector<64x64xf32> to vector<64x32xf32>
    %93 = arith.negf %92 : vector<64x32xf32>
    %94 = math.exp %93 : vector<64x32xf32>
    %cst_35 = arith.constant 1.000000e+00 : f32
    %95 = vector.broadcast %cst_35 : f32 to vector<64x32xf32>
    %96 = arith.addf %95, %94 : vector<64x32xf32>
    %97 = arith.divf %95, %96 : vector<64x32xf32>
    %98 = arith.mulf %91, %97 : vector<64x32xf32>
    %99 = arith.truncf %98 : vector<64x32xf32> to vector<64x32xbf16>
    %c2_36 = arith.constant 2 : index
    %c0_37 = arith.constant 0 : index
    %c0_38 = arith.constant 0 : index
    %100 = vector.load %arg3[%c2_36, %c0_37, %c0_38] : memref<6x32x33xbf16, #tpu.memory_space<vmem>>, vector<1x32x33xbf16>
    %101 = vector.shape_cast %100 : vector<1x32x33xbf16> to vector<32x33xbf16>
    %cst_39 = arith.constant dense<0.000000e+00> : vector<64x33xf32>
    %102 = tpu.matmul %99, %101, %cst_39 {dimension_numbers = #tpu.dot_dimension_numbers<[1], [0], [0], [1], [0, 0, 1, 1], [], []>} : vector<64x32xbf16>, vector<32x33xbf16>, vector<64x33xf32> -> vector<64x33xf32>
    %c2_40 = arith.constant 2 : index
    %c0_41 = arith.constant 0 : index
    %c0_42 = arith.constant 0 : index
    %103 = vector.load %arg4[%c2_40, %c0_41, %c0_42] : memref<6x1x33xf32, #tpu.memory_space<vmem>>, vector<1x1x33xf32>
    %104 = vector.shape_cast %103 : vector<1x1x33xf32> to vector<1x33xf32>
    %105 = vector.broadcast %104 : vector<1x33xf32> to vector<64x33xf32>
    %106 = arith.addf %102, %105 : vector<64x33xf32>
    %107 = vector.extract_strided_slice %106 {offsets = [0, 0], sizes = [64, 32], strides = [1, 1]} : vector<64x33xf32> to vector<64x32xf32>
    %108 = arith.addf %107, %72 : vector<64x32xf32>
    %109 = vector.extract_strided_slice %106 {offsets = [0, 32], sizes = [64, 1], strides = [1, 1]} : vector<64x33xf32> to vector<64x1xf32>
    %c6 = arith.constant 6 : index
    %c0_43 = arith.constant 0 : index
    %110 = vector.load %arg1[%c6, %c0_43] : memref<12x64xf32, #tpu.memory_space<vmem>>, vector<1x64xf32>
    %111 = vector.shape_cast %110 : vector<1x64xf32> to vector<1x64xf32>
    %112 = vector.broadcast %111 : vector<1x64xf32> to vector<32x64xf32>
    %c7 = arith.constant 7 : index
    %c0_44 = arith.constant 0 : index
    %113 = vector.load %arg1[%c7, %c0_44] : memref<12x64xf32, #tpu.memory_space<vmem>>, vector<1x64xf32>
    %114 = vector.shape_cast %113 : vector<1x64xf32> to vector<1x64xf32>
    %115 = vector.broadcast %114 : vector<1x64xf32> to vector<32x64xf32>
    %116 = tpu.concatenate %112, %115 in 0 : vector<32x64xf32>, vector<32x64xf32> -> vector<64x64xf32>
    %117 = vector.extract_strided_slice %108 {offsets = [63, 0], sizes = [1, 32], strides = [1, 1]} : vector<64x32xf32> to vector<1x32xf32>
    %118 = vector.extract_strided_slice %108 {offsets = [0, 0], sizes = [63, 32], strides = [1, 1]} : vector<64x32xf32> to vector<63x32xf32>
    %119 = tpu.concatenate %117, %118 in 0 : vector<1x32xf32>, vector<63x32xf32> -> vector<64x32xf32>
    %120 = tpu.concatenate %119, %108 in 1 : vector<64x32xf32>, vector<64x32xf32> -> vector<64x64xf32>
    %121 = arith.truncf %120 : vector<64x64xf32> to vector<64x64xbf16>
    %c3_45 = arith.constant 3 : index
    %c0_46 = arith.constant 0 : index
    %c0_47 = arith.constant 0 : index
    %122 = vector.load %arg2[%c3_45, %c0_46, %c0_47] : memref<6x64x64xbf16, #tpu.memory_space<vmem>>, vector<1x64x64xbf16>
    %123 = vector.shape_cast %122 : vector<1x64x64xbf16> to vector<64x64xbf16>
    %cst_48 = arith.constant dense<0.000000e+00> : vector<64x64xf32>
    %124 = tpu.matmul %121, %123, %cst_48 {dimension_numbers = #tpu.dot_dimension_numbers<[1], [0], [0], [1], [0, 0, 1, 1], [], []>} : vector<64x64xbf16>, vector<64x64xbf16>, vector<64x64xf32> -> vector<64x64xf32>
    %125 = arith.addf %124, %116 : vector<64x64xf32>
    %126 = vector.extract_strided_slice %125 {offsets = [0, 32], sizes = [64, 32], strides = [1, 1]} : vector<64x64xf32> to vector<64x32xf32>
    %127 = math.tanh %126 : vector<64x32xf32>
    %128 = vector.extract_strided_slice %125 {offsets = [0, 0], sizes = [64, 32], strides = [1, 1]} : vector<64x64xf32> to vector<64x32xf32>
    %129 = arith.negf %128 : vector<64x32xf32>
    %130 = math.exp %129 : vector<64x32xf32>
    %cst_49 = arith.constant 1.000000e+00 : f32
    %131 = vector.broadcast %cst_49 : f32 to vector<64x32xf32>
    %132 = arith.addf %131, %130 : vector<64x32xf32>
    %133 = arith.divf %131, %132 : vector<64x32xf32>
    %134 = arith.mulf %127, %133 : vector<64x32xf32>
    %135 = arith.truncf %134 : vector<64x32xf32> to vector<64x32xbf16>
    %c3_50 = arith.constant 3 : index
    %c0_51 = arith.constant 0 : index
    %c0_52 = arith.constant 0 : index
    %136 = vector.load %arg3[%c3_50, %c0_51, %c0_52] : memref<6x32x33xbf16, #tpu.memory_space<vmem>>, vector<1x32x33xbf16>
    %137 = vector.shape_cast %136 : vector<1x32x33xbf16> to vector<32x33xbf16>
    %cst_53 = arith.constant dense<0.000000e+00> : vector<64x33xf32>
    %138 = tpu.matmul %135, %137, %cst_53 {dimension_numbers = #tpu.dot_dimension_numbers<[1], [0], [0], [1], [0, 0, 1, 1], [], []>} : vector<64x32xbf16>, vector<32x33xbf16>, vector<64x33xf32> -> vector<64x33xf32>
    %c3_54 = arith.constant 3 : index
    %c0_55 = arith.constant 0 : index
    %c0_56 = arith.constant 0 : index
    %139 = vector.load %arg4[%c3_54, %c0_55, %c0_56] : memref<6x1x33xf32, #tpu.memory_space<vmem>>, vector<1x1x33xf32>
    %140 = vector.shape_cast %139 : vector<1x1x33xf32> to vector<1x33xf32>
    %141 = vector.broadcast %140 : vector<1x33xf32> to vector<64x33xf32>
    %142 = arith.addf %138, %141 : vector<64x33xf32>
    %143 = vector.extract_strided_slice %142 {offsets = [0, 0], sizes = [64, 32], strides = [1, 1]} : vector<64x33xf32> to vector<64x32xf32>
    %144 = arith.addf %143, %108 : vector<64x32xf32>
    %145 = vector.extract_strided_slice %142 {offsets = [0, 32], sizes = [64, 1], strides = [1, 1]} : vector<64x33xf32> to vector<64x1xf32>
    %c8 = arith.constant 8 : index
    %c0_57 = arith.constant 0 : index
    %146 = vector.load %arg1[%c8, %c0_57] : memref<12x64xf32, #tpu.memory_space<vmem>>, vector<1x64xf32>
    %147 = vector.shape_cast %146 : vector<1x64xf32> to vector<1x64xf32>
    %148 = vector.broadcast %147 : vector<1x64xf32> to vector<32x64xf32>
    %c9 = arith.constant 9 : index
    %c0_58 = arith.constant 0 : index
    %149 = vector.load %arg1[%c9, %c0_58] : memref<12x64xf32, #tpu.memory_space<vmem>>, vector<1x64xf32>
    %150 = vector.shape_cast %149 : vector<1x64xf32> to vector<1x64xf32>
    %151 = vector.broadcast %150 : vector<1x64xf32> to vector<32x64xf32>
    %152 = tpu.concatenate %148, %151 in 0 : vector<32x64xf32>, vector<32x64xf32> -> vector<64x64xf32>
    %153 = vector.extract_strided_slice %144 {offsets = [62, 0], sizes = [2, 32], strides = [1, 1]} : vector<64x32xf32> to vector<2x32xf32>
    %154 = vector.extract_strided_slice %144 {offsets = [0, 0], sizes = [62, 32], strides = [1, 1]} : vector<64x32xf32> to vector<62x32xf32>
    %155 = tpu.concatenate %153, %154 in 0 : vector<2x32xf32>, vector<62x32xf32> -> vector<64x32xf32>
    %156 = tpu.concatenate %155, %144 in 1 : vector<64x32xf32>, vector<64x32xf32> -> vector<64x64xf32>
    %157 = arith.truncf %156 : vector<64x64xf32> to vector<64x64xbf16>
    %c4_59 = arith.constant 4 : index
    %c0_60 = arith.constant 0 : index
    %c0_61 = arith.constant 0 : index
    %158 = vector.load %arg2[%c4_59, %c0_60, %c0_61] : memref<6x64x64xbf16, #tpu.memory_space<vmem>>, vector<1x64x64xbf16>
    %159 = vector.shape_cast %158 : vector<1x64x64xbf16> to vector<64x64xbf16>
    %cst_62 = arith.constant dense<0.000000e+00> : vector<64x64xf32>
    %160 = tpu.matmul %157, %159, %cst_62 {dimension_numbers = #tpu.dot_dimension_numbers<[1], [0], [0], [1], [0, 0, 1, 1], [], []>} : vector<64x64xbf16>, vector<64x64xbf16>, vector<64x64xf32> -> vector<64x64xf32>
    %161 = arith.addf %160, %152 : vector<64x64xf32>
    %162 = vector.extract_strided_slice %161 {offsets = [0, 32], sizes = [64, 32], strides = [1, 1]} : vector<64x64xf32> to vector<64x32xf32>
    %163 = math.tanh %162 : vector<64x32xf32>
    %164 = vector.extract_strided_slice %161 {offsets = [0, 0], sizes = [64, 32], strides = [1, 1]} : vector<64x64xf32> to vector<64x32xf32>
    %165 = arith.negf %164 : vector<64x32xf32>
    %166 = math.exp %165 : vector<64x32xf32>
    %cst_63 = arith.constant 1.000000e+00 : f32
    %167 = vector.broadcast %cst_63 : f32 to vector<64x32xf32>
    %168 = arith.addf %167, %166 : vector<64x32xf32>
    %169 = arith.divf %167, %168 : vector<64x32xf32>
    %170 = arith.mulf %163, %169 : vector<64x32xf32>
    %171 = arith.truncf %170 : vector<64x32xf32> to vector<64x32xbf16>
    %c4_64 = arith.constant 4 : index
    %c0_65 = arith.constant 0 : index
    %c0_66 = arith.constant 0 : index
    %172 = vector.load %arg3[%c4_64, %c0_65, %c0_66] : memref<6x32x33xbf16, #tpu.memory_space<vmem>>, vector<1x32x33xbf16>
    %173 = vector.shape_cast %172 : vector<1x32x33xbf16> to vector<32x33xbf16>
    %cst_67 = arith.constant dense<0.000000e+00> : vector<64x33xf32>
    %174 = tpu.matmul %171, %173, %cst_67 {dimension_numbers = #tpu.dot_dimension_numbers<[1], [0], [0], [1], [0, 0, 1, 1], [], []>} : vector<64x32xbf16>, vector<32x33xbf16>, vector<64x33xf32> -> vector<64x33xf32>
    %c4_68 = arith.constant 4 : index
    %c0_69 = arith.constant 0 : index
    %c0_70 = arith.constant 0 : index
    %175 = vector.load %arg4[%c4_68, %c0_69, %c0_70] : memref<6x1x33xf32, #tpu.memory_space<vmem>>, vector<1x1x33xf32>
    %176 = vector.shape_cast %175 : vector<1x1x33xf32> to vector<1x33xf32>
    %177 = vector.broadcast %176 : vector<1x33xf32> to vector<64x33xf32>
    %178 = arith.addf %174, %177 : vector<64x33xf32>
    %179 = vector.extract_strided_slice %178 {offsets = [0, 0], sizes = [64, 32], strides = [1, 1]} : vector<64x33xf32> to vector<64x32xf32>
    %180 = arith.addf %179, %144 : vector<64x32xf32>
    %181 = vector.extract_strided_slice %178 {offsets = [0, 32], sizes = [64, 1], strides = [1, 1]} : vector<64x33xf32> to vector<64x1xf32>
    %c10 = arith.constant 10 : index
    %c0_71 = arith.constant 0 : index
    %182 = vector.load %arg1[%c10, %c0_71] : memref<12x64xf32, #tpu.memory_space<vmem>>, vector<1x64xf32>
    %183 = vector.shape_cast %182 : vector<1x64xf32> to vector<1x64xf32>
    %184 = vector.broadcast %183 : vector<1x64xf32> to vector<32x64xf32>
    %c11 = arith.constant 11 : index
    %c0_72 = arith.constant 0 : index
    %185 = vector.load %arg1[%c11, %c0_72] : memref<12x64xf32, #tpu.memory_space<vmem>>, vector<1x64xf32>
    %186 = vector.shape_cast %185 : vector<1x64xf32> to vector<1x64xf32>
    %187 = vector.broadcast %186 : vector<1x64xf32> to vector<32x64xf32>
    %188 = tpu.concatenate %184, %187 in 0 : vector<32x64xf32>, vector<32x64xf32> -> vector<64x64xf32>
    %189 = vector.extract_strided_slice %180 {offsets = [60, 0], sizes = [4, 32], strides = [1, 1]} : vector<64x32xf32> to vector<4x32xf32>
    %190 = vector.extract_strided_slice %180 {offsets = [0, 0], sizes = [60, 32], strides = [1, 1]} : vector<64x32xf32> to vector<60x32xf32>
    %191 = tpu.concatenate %189, %190 in 0 : vector<4x32xf32>, vector<60x32xf32> -> vector<64x32xf32>
    %192 = tpu.concatenate %191, %180 in 1 : vector<64x32xf32>, vector<64x32xf32> -> vector<64x64xf32>
    %193 = arith.truncf %192 : vector<64x64xf32> to vector<64x64xbf16>
    %c5_73 = arith.constant 5 : index
    %c0_74 = arith.constant 0 : index
    %c0_75 = arith.constant 0 : index
    %194 = vector.load %arg2[%c5_73, %c0_74, %c0_75] : memref<6x64x64xbf16, #tpu.memory_space<vmem>>, vector<1x64x64xbf16>
    %195 = vector.shape_cast %194 : vector<1x64x64xbf16> to vector<64x64xbf16>
    %cst_76 = arith.constant dense<0.000000e+00> : vector<64x64xf32>
    %196 = tpu.matmul %193, %195, %cst_76 {dimension_numbers = #tpu.dot_dimension_numbers<[1], [0], [0], [1], [0, 0, 1, 1], [], []>} : vector<64x64xbf16>, vector<64x64xbf16>, vector<64x64xf32> -> vector<64x64xf32>
    %197 = arith.addf %196, %188 : vector<64x64xf32>
    %198 = vector.extract_strided_slice %197 {offsets = [0, 32], sizes = [64, 32], strides = [1, 1]} : vector<64x64xf32> to vector<64x32xf32>
    %199 = math.tanh %198 : vector<64x32xf32>
    %200 = vector.extract_strided_slice %197 {offsets = [0, 0], sizes = [64, 32], strides = [1, 1]} : vector<64x64xf32> to vector<64x32xf32>
    %201 = arith.negf %200 : vector<64x32xf32>
    %202 = math.exp %201 : vector<64x32xf32>
    %cst_77 = arith.constant 1.000000e+00 : f32
    %203 = vector.broadcast %cst_77 : f32 to vector<64x32xf32>
    %204 = arith.addf %203, %202 : vector<64x32xf32>
    %205 = arith.divf %203, %204 : vector<64x32xf32>
    %206 = arith.mulf %199, %205 : vector<64x32xf32>
    %207 = arith.truncf %206 : vector<64x32xf32> to vector<64x32xbf16>
    %c5_78 = arith.constant 5 : index
    %c0_79 = arith.constant 0 : index
    %c0_80 = arith.constant 0 : index
    %208 = vector.load %arg3[%c5_78, %c0_79, %c0_80] : memref<6x32x33xbf16, #tpu.memory_space<vmem>>, vector<1x32x33xbf16>
    %209 = vector.shape_cast %208 : vector<1x32x33xbf16> to vector<32x33xbf16>
    %cst_81 = arith.constant dense<0.000000e+00> : vector<64x33xf32>
    %210 = tpu.matmul %207, %209, %cst_81 {dimension_numbers = #tpu.dot_dimension_numbers<[1], [0], [0], [1], [0, 0, 1, 1], [], []>} : vector<64x32xbf16>, vector<32x33xbf16>, vector<64x33xf32> -> vector<64x33xf32>
    %c5_82 = arith.constant 5 : index
    %c0_83 = arith.constant 0 : index
    %c0_84 = arith.constant 0 : index
    %211 = vector.load %arg4[%c5_82, %c0_83, %c0_84] : memref<6x1x33xf32, #tpu.memory_space<vmem>>, vector<1x1x33xf32>
    %212 = vector.shape_cast %211 : vector<1x1x33xf32> to vector<1x33xf32>
    %213 = vector.broadcast %212 : vector<1x33xf32> to vector<64x33xf32>
    %214 = arith.addf %210, %213 : vector<64x33xf32>
    %215 = vector.extract_strided_slice %214 {offsets = [0, 32], sizes = [64, 1], strides = [1, 1]} : vector<64x33xf32> to vector<64x1xf32>
    %216 = tpu.concatenate %37, %73, %109, %145, %181, %215 in 1 : vector<64x1xf32>, vector<64x1xf32>, vector<64x1xf32>, vector<64x1xf32>, vector<64x1xf32>, vector<64x1xf32> -> vector<64x6xf32>
    %c0_85 = arith.constant 0 : index
    %c0_86 = arith.constant 0 : index
    %217 = vector.load %arg5[%c0_85, %c0_86] : memref<64x6xf32, #tpu.memory_space<vmem>>, vector<64x6xf32>
    tpu.vector_store %arg5[%c0_85, %c0_86], %216 {strides = array<i32>} : memref<64x6xf32, #tpu.memory_space<vmem>>, vector<64x6xf32>,
    return
  }
}

</mosaic_0001>

<bundles_post_ra>
// kernel: tpu_custom_call.1
= control target key start
LH: loop header
LB: loop body
LE: loop exit
PB: predicated region body
PF: predicated region fallthrough
CT: control target
= control target key end

     0   :  { %v24_v0 = vlaneseq  ;;  %vm35_vm0 = vcmask 261120   ;;  %s122_s0 = inlined_call_operand.vmem [shape: f32[64,32], index: 0, kind: input, shape index: {}]   ;;  %s123_s1 = inlined_call_operand.vmem [shape: f32[64,32], index: 1, kind: output, shape index: {}]  }
   0x1   :  { %v8_v1 = vld [vmem:[%s122_s0] sm:$0xff]  ;;  %v15_v2 = vld [vmem:[%s122_s0 + $0x38] sm:$0xff]  ;;  %v9_v3 = vld [vmem:[%s122_s0 + $0x8] sm:$0xff] }
   0x2   :  { %v16_v4 = vrot.slane %v8_v1, 7  ;;  %v23_v5 = vrot.slane %v15_v2, 7  ;;  %v25_v6 = vshrl.u32 %v24_v0, 7  ;;  %v17_v7 = vrot.slane %v9_v3, 7  ;;  %v10_v8 = vld [vmem:[%s122_s0 + $0x10] sm:$0xff]  ;;  %v11_v9 = vld [vmem:[%s122_s0 + $0x18] sm:$0xff] }
   0x3   :  { %v18_v10 = vrot.slane %v10_v8, 7  ;;  %v19_v11 = vrot.slane %v11_v9, 7  ;;  %v12_v12 = vld [vmem:[%s122_s0 + $0x20] sm:$0xff]  ;;  %v13_v13 = vld [vmem:[%s122_s0 + $0x28] sm:$0xff]  ;;  %v14_v14 = vld [vmem:[%s122_s0 + $0x30] sm:$0xff] }
   0x4   :  { %vm26_vm1 = vcmp.lt.s32.totalorder %v25_v6, 1  ;;  %v20_v15 = vrot.slane %v12_v12, 7  ;;  %v21_v16 = vrot.slane %v13_v13, 7  ;;  %v22_v20 = vrot.slane %v14_v14, 7 }
   0x5   :  { %v34_v17 = vsel %vm26_vm1, %v23_v5, %v16_v4  ;;  %v33_v18 = vsel %vm26_vm1, %v16_v4, %v17_v7  ;;  %v32_v19 = vsel %vm26_vm1, %v17_v7, %v18_v10  ;;  %v31_v21 = vsel %vm26_vm1, %v18_v10, %v19_v11 }
   0x6   :  { %36 = vst.msk [vmem:[%s123_s1] sm:$0xff] %vm35_vm0, %v34_v17  ;;  %v30_v22 = vsel %vm26_vm1, %v19_v11, %v20_v15  ;;  %v29_v23 = vsel %vm26_vm1, %v20_v15, %v21_v16  ;;  %v28_v24 = vsel %vm26_vm1, %v21_v16, %v22_v20  ;;  %v27_v25 = vsel %vm26_vm1, %v22_v20, %v23_v5 }
   0x7   :  { %37 = vst.msk [vmem:[%s123_s1 + $0x8] sm:$0xff] %vm35_vm0, %v33_v18 }
   0x8   :  { %38 = vst.msk [vmem:[%s123_s1 + $0x10] sm:$0xff] %vm35_vm0, %v32_v19 }
   0x9   :  { %39 = vst.msk [vmem:[%s123_s1 + $0x18] sm:$0xff] %vm35_vm0, %v31_v21 }
   0xa   :  { %40 = vst.msk [vmem:[%s123_s1 + $0x20] sm:$0xff] %vm35_vm0, %v30_v22 }
   0xb   :  { %41 = vst.msk [vmem:[%s123_s1 + $0x28] sm:$0xff] %vm35_vm0, %v29_v23 }
   0xc   :  { %42 = vst.msk [vmem:[%s123_s1 + $0x30] sm:$0xff] %vm35_vm0, %v28_v24 }
   0xd   :  { %43 = vst.msk [vmem:[%s123_s1 + $0x38] sm:$0xff] %vm35_vm0, %v27_v25 }

// kernel: forward.1
= control target key start
LH: loop header
LB: loop body
LE: loop exit
PB: predicated region body
PF: predicated region fallthrough
CT: control target
= control target key end

     0   :  { %10 = vsyncpa [#allocation3], 0  ;;  %s3704_s21 = smov [#allocation2]   ;;  %s3705_s23 = smov 64   ;;  %s4836_s0 = inlined_call_operand.vmem [shape: bf16[64,32], index: 0, kind: input, shape index: {}]   ;;  %s4837_s1 = inlined_call_operand.vmem [shape: f32[12,64], index: 1, kind: input, shape index: {}]   ;;  %s4838_s2 = inlined_call_operand.vmem [shape: bf16[6,64,64], index: 2, kind: input, shape index: {}]   ;;  %s4839_s3 = inlined_call_operand.hbm [shape: bf16[6,32,33], index: 3, kind: input, shape index: {}]   ;;  %s4840_s4 = inlined_call_operand.vmem [shape: f32[6,1,33], index: 4, kind: input, shape index: {}]   ;;  %s4841_s5 = inlined_call_operand.vmem [shape: f32[64,6], index: 5, kind: output, shape index: {}]  }
   0x1   :  { %s21_s20 = sshll.u32 %s4839_s3, 4  ;;  %s23_s22 = sshll.u32 %s3704_s21, 4  ;;  %s22_s20 = int_to_ptr.hbm [resolvable:$true] %s21_s20  ;;  %s24_s22 = int_to_ptr.vmem [resolvable:$true] %s23_s22 }
   0x2   :  { %s3706_s24 = smov 4  }
   0x3   :  { %29 = dma.hbm_to_vmem [thread:$0]  %s22_s20, 1536, %s24_s22, [#allocation3], %s3705_s23, %s3705_s23, %s3706_s24  }
   0x4   :  { %3702 = dma.done.wait [#allocation3], 1536  }
   0x5   :  { %3703 = vsyncadd [#allocation3], 4294965760  ;;  %v3224_v0 = vld [vmem:[%s4836_s0] sm:$0xff]   ;;  %v3240_v1 = vld [vmem:[%s4836_s0 + $0x10] sm:$0xff]   ;;  %s3707_s11 = smov 32   ;;  %vm67_vm0 = vcmask 1040384  }
   0x6   :  { %v3753_v2 = vunpack.c.l.bf16 %v3224_v0  ;;  %v3755_v3 = vunpack.c.h.bf16 %v3224_v0  ;;  %v3239_v4 = vld [vmem:[%s4836_s0 + $0x8] sm:$0xff]   ;;  %v3190_v5 = vld [vmem:[%s4838_s2 + $0x18] sm:$0xff]  ;;  %v3763_v6 = vunpack.c.l.bf16 %v3240_v1  ;;  %v3765_v7 = vunpack.c.h.bf16 %v3240_v1  ;;  %v3189_v10 = vld [vmem:[%s4838_s2 + $0x10] sm:$0xff]  ;;  %s3708_s19 = smov 96   ;;  %s3711_s13 = smov 99  }
   0x7   :  { %v3241_v8 = vld [vmem:[%s4836_s0 + $0x18] sm:$0xff]   ;;  %177 = vmatpush.bf16.msra.mxu0 %v3190_v5  ;;  %v3778_v12 = vunpack.c.l.bf16 %v3239_v4  ;;  %v3780_v13 = vunpack.c.h.bf16 %v3239_v4  ;;  %v3188_v14 = vld [vmem:[%s4838_s2 + $0x8] sm:$0xff]  ;;  %v3187_v19 = vld [vmem:[%s4838_s2] sm:$0xff]  ;;  %vm115_vm1 = vcmask 261120   ;;  %vm160_vm2 = vcmask 523264   ;;  %s3712_s14 = smov 100  }
   0x8   :  { %v3252_v9 = vpack.i.bf16 %v3755_v3, %v3753_v2  ;;  %v3262_v11 = vpack.i.bf16 %v3765_v7, %v3763_v6  ;;  %v3786_v15 = vunpack.c.l.bf16 %v3241_v8  ;;  %v3788_v16 = vunpack.c.h.bf16 %v3241_v8  ;;  %v3372_v60 = vld [vmem:[%s4837_s1] ss:$0 sm:$0xff]  ;;  %s3713_s16 = smov 101  }
   0x9   :  { %v3257_v17 = vpack.i.bf16 %v3780_v13, %v3778_v12  ;;  %v69_v20 = vrot.slane %v3755_v3, 7  ;;  %v68_v21 = vrot.slane %v3753_v2, 7  ;;  %v71_v32 = vrot.slane %v3778_v12, 7 }
   0xa   :  { %3253 = vrot.lane.b32.xlu0 %v3252_v9, %s3707_s11  ;;  %3263 = vrot.lane.b32.xlu1 %v3262_v11, %s3707_s11  ;;  %v3267_v18 = vpack.i.bf16 %v3788_v16, %v3786_v15  ;;  %v58_v22 = vrot.slane %v3788_v16, 7  ;;  %v73_v33 = vrot.slane %v3780_v13, 7  ;;  %v77_v41 = vrot.slane %v3765_v7, 7 }
   0xb   :  { %178 = vmatpush.bf16.msra.mxu0 %v3189_v10  ;;  %v70_v24 = vsel %vm67_vm0, %v68_v21, %v69_v20  ;;  %v72_v36 = vsel %vm67_vm0, %v69_v20, %v71_v32  ;;  %v75_v42 = vrot.slane %v3763_v6, 7  ;;  %v79_v52 = vrot.slane %v3786_v15, 7 }
   0xc   :  { %v90_v25 = vsel %vm67_vm0, %v58_v22, %v68_v21  ;;  %v74_v37 = vsel %vm67_vm0, %v71_v32, %v73_v33 }
   0xd   :  { %v76_v46 = vsel %vm67_vm0, %v73_v33, %v75_v42  ;;  %v78_v47 = vsel %vm67_vm0, %v75_v42, %v77_v41  ;;  %v80_v55 = vsel %vm67_vm0, %v77_v41, %v79_v52  ;;  %v81_v56 = vsel %vm67_vm0, %v79_v52, %v58_v22  ;;  %v3845_v33 = vld [vmem:[%s4837_s1 + $0x1] ss:$0 sm:$0xff] }
   0xf   :  { %179 = vmatpush.bf16.msra.mxu0 %v3188_v14 }
  0x12   :  { %3258 = vrot.lane.b32.xlu0 %v3257_v17, %s3707_s11  ;;  %3268 = vrot.lane.b32.xlu1 %v3267_v18, %s3707_s11 }
  0x13   :  { %180 = vmatpush.bf16.msra.mxu0 %v3187_v19 }
  0x7c   :  { %v3254_v23 = vpop.permute.xlu0 %3253  ;;  %v3264_v43 = vpop.permute.xlu1 %3263 }
  0x7d   :  { %v3256_v26 = vunpack.i.h.bf16 %v3254_v23  ;;  %v3255_v27 = vunpack.i.l.bf16 %v3254_v23  ;;  %v3266_v44 = vunpack.i.h.bf16 %v3264_v43  ;;  %v3265_v45 = vunpack.i.l.bf16 %v3264_v43 }
  0x7f   :  { %v116_v28 = vsel %vm115_vm1, %v90_v25, %v3255_v27  ;;  %v117_v29 = vsel %vm115_vm1, %v70_v24, %v3256_v26  ;;  %v120_v48 = vsel %vm115_vm1, %v76_v46, %v3265_v45  ;;  %v121_v49 = vsel %vm115_vm1, %v78_v47, %v3266_v44 }
  0x80   :  { %v124_v30 = vpack.c.bf16 %v117_v29, %v116_v28  ;;  %v126_v50 = vpack.c.bf16 %v121_v49, %v120_v48 }
  0x82   :  { %2918 = vmatmul.msk.bf16.vlgmr.msra.gmra.mxu0 %vm160_vm2, %v124_v30 }
  0x84   :  { %v3259_v31 = vpop.permute.xlu0 %3258  ;;  %v3269_v51 = vpop.permute.xlu1 %3268 }
  0x85   :  { %v3261_v34 = vunpack.i.h.bf16 %v3259_v31  ;;  %v3260_v35 = vunpack.i.l.bf16 %v3259_v31  ;;  %v3271_v53 = vunpack.i.h.bf16 %v3269_v51  ;;  %v3270_v54 = vunpack.i.l.bf16 %v3269_v51 }
  0x87   :  { %v118_v38 = vsel %vm115_vm1, %v72_v36, %v3260_v35  ;;  %v119_v39 = vsel %vm115_vm1, %v74_v37, %v3261_v34  ;;  %v122_v57 = vsel %vm115_vm1, %v80_v55, %v3270_v54  ;;  %v123_v58 = vsel %vm115_vm1, %v81_v56, %v3271_v53 }
  0x88   :  { %v125_v40 = vpack.c.bf16 %v119_v39, %v118_v38  ;;  %v127_v59 = vpack.c.bf16 %v123_v58, %v122_v57 }
  0x92   :  { %2919 = vmatmul.msk.bf16.gmra.mxu0 %vm160_vm2, %v125_v40 }
  0xa2   :  { %2920 = vmatmul.msk.bf16.gmra.mxu0 %vm160_vm2, %v126_v50 }
  0xb2   :  { %2921 = vmatmul.msk.bf16.gmra.mxu0 %vm160_vm2, %v127_v59 }
  0xff   :  { %v182_v61 = vpop.f32.mrf.mxu0 }
 0x100   :  { %v3830_v62 = vadd.f32 %v3372_v60, %v182_v61 }
 0x102   :  { %v2922_v63 = vmul.f32 -1.442695, %v3830_v62 }
 0x104   :  { %3390 = vpow2.f32 %v2922_v63 }
 0x107   :  { %v184_v0 = vpop.f32.mrf.mxu0 }
 0x108   :  { %v3833_v1 = vadd.f32 %v3372_v60, %v184_v0 }
 0x10a   :  { %v3391_v4 = vpop.eup %3390  ;;  %v2923_v5 = vmul.f32 -1.442695, %v3833_v1 }
 0x10b   :  { %v234_v8 = vadd.f32 1.0, %v3391_v4 }
 0x10c   :  { %3392 = vpow2.f32 %v2923_v5 }
 0x10d   :  { %3394 = vrcp.f32 %v234_v8  ;;  %v253_v22 = vand.u32 2147483648, %v234_v8  ;;  %v251_v25 = vand.u32 2147483647, %v234_v8  ;;  %vm247_vm4 = vweird.f32 %v234_v8 }
 0x10f   :  { %v187_v9 = vpop.f32.mrf.mxu0  ;;  %v254_v31 = vor.u32 1.1754944e-38, %v253_v22  ;;  %vm252_vm6 = vcmp.eq.f32.partialorder %v251_v25, 8.507059e+37 }
 0x110   :  { %v3836_v10 = vadd.f32 %v3372_v60, %v187_v9 }
 0x112   :  { %v3393_v11 = vpop.eup %3392  ;;  %v2924_v14 = vmul.f32 -1.442695, %v3836_v10 }
 0x113   :  { %v3395_v17 = vpop.eup %3394  ;;  %v235_v18 = vadd.f32 1.0, %v3393_v11 }
 0x114   :  { %3396 = vpow2.f32 %v2924_v14  ;;  %v243_v19 = vmul.f32 %v3395_v17, %v234_v8  ;;  %vm248_vm3 = vweird.f32 %v3395_v17 }
 0x115   :  { %3398 = vrcp.f32 %v235_v18  ;;  %vm249_vm5 = vmor %vm247_vm4, %vm248_vm3  ;;  %v268_v38 = vand.u32 2147483648, %v235_v18  ;;  %v266_v41 = vand.u32 2147483647, %v235_v18  ;;  %vm262_vm8 = vweird.f32 %v235_v18 }
 0x116   :  { %v244_v20 = vsub.f32 1.0, %v243_v19 }
 0x117   :  { %v189_v21 = vpop.f32.mrf.mxu0  ;;  %v269_v47 = vor.u32 1.1754944e-38, %v268_v38  ;;  %vm267_vm10 = vcmp.eq.f32.partialorder %v266_v41, 8.507059e+37 }
 0x118   :  { %v3839_v23 = vadd.f32 %v3372_v60, %v189_v21  ;;  %v245_v24 = vmul.f32 %v3395_v17, %v244_v20 }
 0x11a   :  { %v3397_v26 = vpop.eup %3396  ;;  %v2925_v27 = vmul.f32 -1.442695, %v3839_v23  ;;  %v246_v28 = vadd.f32 %v3395_v17, %v245_v24 }
 0x11b   :  { %v3399_v29 = vpop.eup %3398  ;;  %v236_v30 = vadd.f32 1.0, %v3397_v26 }
 0x11c   :  { %3400 = vpow2.f32 %v2925_v27  ;;  %v250_v32 = vsel %vm249_vm5, %v3395_v17, %v246_v28  ;;  %v258_v34 = vmul.f32 %v3399_v29, %v235_v18  ;;  %vm263_vm7 = vweird.f32 %v3399_v29 }
 0x11d   :  { %3402 = vrcp.f32 %v236_v30  ;;  %v255_v35 = vsel %vm252_vm6, %v254_v31, %v250_v32  ;;  %vm264_vm9 = vmor %vm262_vm8, %vm263_vm7  ;;  %vm277_vm11 = vweird.f32 %v236_v30  ;;  %v283_v53 = vand.u32 2147483648, %v236_v30 }
 0x11e   :  { %370 = vrot.lane.b32.xlu2 %v255_v35, %s3707_s11  ;;  %v259_v36 = vsub.f32 1.0, %v258_v34  ;;  %v281_v56 = vand.u32 2147483647, %v236_v30 }
 0x11f   :  { %v192_v37 = vpop.f32.mrf.mxu0  ;;  %v284_v63 = vor.u32 1.1754944e-38, %v283_v53 }
 0x120   :  { %v3849_v39 = vadd.f32 %v3845_v33, %v192_v37  ;;  %v260_v40 = vmul.f32 %v3399_v29, %v259_v36  ;;  %vm282_vm14 = vcmp.eq.f32.partialorder %v281_v56, 8.507059e+37 }
 0x122   :  { %v3401_v42 = vpop.eup %3400  ;;  %v2926_v43 = vmul.f32 -1.442695, %v3849_v39  ;;  %v261_v44 = vadd.f32 %v3399_v29, %v260_v40 }
 0x123   :  { %v3403_v45 = vpop.eup %3402  ;;  %v237_v46 = vadd.f32 1.0, %v3401_v42 }
 0x124   :  { %3404 = vpow2.f32 %v2926_v43  ;;  %v265_v48 = vsel %vm264_vm9, %v3399_v29, %v261_v44  ;;  %v273_v49 = vmul.f32 %v3403_v45, %v236_v30  ;;  %vm278_vm12 = vweird.f32 %v3403_v45 }
 0x125   :  { %3406 = vrcp.f32 %v237_v46  ;;  %v270_v50 = vsel %vm267_vm10, %v269_v47, %v265_v48  ;;  %vm279_vm13 = vmor %vm277_vm11, %vm278_vm12  ;;  %v298_v11 = vand.u32 2147483648, %v237_v46  ;;  %v296_v18 = vand.u32 2147483647, %v237_v46 }
 0x126   :  { %372 = vrot.lane.b32.xlu2 %v270_v50, %s3707_s11  ;;  %v274_v51 = vsub.f32 1.0, %v273_v49  ;;  %vm292_vm3 = vweird.f32 %v237_v46 }
 0x127   :  { %v194_v52 = vpop.f32.mrf.mxu0  ;;  %v299_v25 = vor.u32 1.1754944e-38, %v298_v11  ;;  %vm297_vm5 = vcmp.eq.f32.partialorder %v296_v18, 8.507059e+37 }
 0x128   :  { %v3854_v54 = vadd.f32 %v3845_v33, %v194_v52  ;;  %v275_v55 = vmul.f32 %v3403_v45, %v274_v51 }
 0x12a   :  { %v3405_v57 = vpop.eup %3404  ;;  %v2927_v58 = vmul.f32 -1.442695, %v3854_v54  ;;  %v276_v59 = vadd.f32 %v3403_v45, %v275_v55 }
 0x12b   :  { %v3407_v60 = vpop.eup %3406  ;;  %v238_v61 = vadd.f32 1.0, %v3405_v57 }
 0x12c   :  { %3408 = vpow2.f32 %v2927_v58  ;;  %v280_v0 = vsel %vm279_vm13, %v3403_v45, %v276_v59  ;;  %v288_v4 = vmul.f32 %v3407_v60, %v237_v46  ;;  %vm293_vm15 = vweird.f32 %v3407_v60 }
 0x12d   :  { %3410 = vrcp.f32 %v238_v61  ;;  %v285_v5 = vsel %vm282_vm14, %v284_v63, %v280_v0  ;;  %vm294_vm4 = vmor %vm292_vm3, %vm293_vm15  ;;  %v313_v29 = vand.u32 2147483648, %v238_v61  ;;  %vm307_vm6 = vweird.f32 %v238_v61 }
 0x12e   :  { %374 = vrot.lane.b32.xlu0 %v285_v5, %s3707_s11  ;;  %v289_v8 = vsub.f32 1.0, %v288_v4  ;;  %v311_v31 = vand.u32 2147483647, %v238_v61 }
 0x12f   :  { %v197_v9 = vpop.f32.mrf.mxu0  ;;  %v314_v36 = vor.u32 1.1754944e-38, %v313_v29 }
 0x130   :  { %v3859_v14 = vadd.f32 %v3845_v33, %v197_v9  ;;  %v290_v17 = vmul.f32 %v3407_v60, %v289_v8  ;;  %vm312_vm9 = vcmp.eq.f32.partialorder %v311_v31, 8.507059e+37 }
 0x132   :  { %v3409_v19 = vpop.eup %3408  ;;  %v2928_v20 = vmul.f32 -1.442695, %v3859_v14  ;;  %v291_v21 = vadd.f32 %v3407_v60, %v290_v17 }
 0x133   :  { %v3411_v22 = vpop.eup %3410  ;;  %v239_v24 = vadd.f32 1.0, %v3409_v19 }
 0x134   :  { %3412 = vpow2.f32 %v2928_v20  ;;  %v295_v26 = vsel %vm294_vm4, %v3407_v60, %v291_v21  ;;  %v303_v27 = vmul.f32 %v3411_v22, %v238_v61  ;;  %vm308_vm7 = vweird.f32 %v3411_v22 }
 0x135   :  { %3414 = vrcp.f32 %v239_v24  ;;  %v300_v28 = vsel %vm297_vm5, %v299_v25, %v295_v26  ;;  %vm309_vm8 = vmor %vm307_vm6, %vm308_vm7  ;;  %v328_v46 = vand.u32 2147483648, %v239_v24  ;;  %vm322_vm10 = vweird.f32 %v239_v24 }
 0x136   :  { %376 = vrot.lane.b32.xlu1 %v300_v28, %s3707_s11  ;;  %v304_v30 = vsub.f32 1.0, %v303_v27  ;;  %v326_v47 = vand.u32 2147483647, %v239_v24 }
 0x137   :  { %v199_v32 = vpop.f32.mrf.mxu0  ;;  %v329_v49 = vor.u32 1.1754944e-38, %v328_v46 }
 0x138   :  { %v3864_v34 = vadd.f32 %v3845_v33, %v199_v32  ;;  %v305_v35 = vmul.f32 %v3411_v22, %v304_v30  ;;  %vm327_vm13 = vcmp.eq.f32.partialorder %v326_v47, 8.507059e+37 }
 0x13a   :  { %v3413_v37 = vpop.eup %3412  ;;  %v2929_v38 = vmul.f32 -1.442695, %v3864_v34  ;;  %v306_v40 = vadd.f32 %v3411_v22, %v305_v35 }
 0x13b   :  { %v3415_v41 = vpop.eup %3414  ;;  %v240_v42 = vadd.f32 1.0, %v3413_v37 }
 0x13c   :  { %3416 = vpow2.f32 %v2929_v38  ;;  %v310_v43 = vsel %vm309_vm8, %v3411_v22, %v306_v40  ;;  %v318_v44 = vmul.f32 %v3415_v41, %v239_v24  ;;  %vm323_vm11 = vweird.f32 %v3415_v41  ;;  %v3192_v40 = vld [vmem:[#allocation2 + $0x8] sm:$0xff] }
 0x13d   :  { %3418 = vrcp.f32 %v240_v42  ;;  %v315_v45 = vsel %vm312_vm9, %v314_v36, %v310_v43  ;;  %vm324_vm12 = vmor %vm322_vm10, %vm323_vm11  ;;  %v343_v58 = vand.u32 2147483648, %v240_v42  ;;  %vm337_vm14 = vweird.f32 %v240_v42  ;;  %456 = vmatpush.bf16.msra.mxu1 %v3192_v40 }
 0x13e   :  { %378 = vrot.lane.b32.xlu2 %v315_v45, %s3707_s11  ;;  %v319_v33 = vsub.f32 1.0, %v318_v44  ;;  %v341_v60 = vand.u32 2147483647, %v240_v42  ;;  %vm501_vm9 = vcmask 1041408  }
 0x13f   :  { %v344_v63 = vor.u32 1.1754944e-38, %v343_v58 }
 0x140   :  { %v320_v48 = vmul.f32 %v3415_v41, %v319_v33  ;;  %vm342_vm4 = vcmp.eq.f32.partialorder %v341_v60, 8.507059e+37 }
 0x142   :  { %v3417_v50 = vpop.eup %3416  ;;  %v321_v51 = vadd.f32 %v3415_v41, %v320_v48 }
 0x143   :  { %v3419_v52 = vpop.eup %3418  ;;  %v241_v53 = vadd.f32 1.0, %v3417_v50 }
 0x144   :  { %v325_v55 = vsel %vm324_vm12, %v3415_v41, %v321_v51  ;;  %v333_v56 = vmul.f32 %v3419_v52, %v240_v42  ;;  %vm338_vm15 = vweird.f32 %v3419_v52  ;;  %v3191_v41 = vld [vmem:[#allocation2] sm:$0xff] }
 0x145   :  { %3420 = vrcp.f32 %v241_v53  ;;  %v330_v57 = vsel %vm327_vm13, %v329_v49, %v325_v55  ;;  %vm339_vm3 = vmor %vm337_vm14, %vm338_vm15  ;;  %v358_v11 = vand.u32 2147483648, %v241_v53  ;;  %vm352_vm5 = vweird.f32 %v241_v53  ;;  %457 = vmatpush.bf16.msra.mxu1 %v3191_v41  ;;  %v3374_v55 = vld [vmem:[%s4840_s4] ss:$0 sm:$0xff] }
 0x146   :  { %380 = vrot.lane.b32.xlu0 %v330_v57, %s3707_s11  ;;  %v334_v59 = vsub.f32 1.0, %v333_v56  ;;  %v356_v18 = vand.u32 2147483647, %v241_v53  ;;  %3422 = vtanh.f32 %v3830_v62 }
 0x147   :  { %v359_v20 = vor.u32 1.1754944e-38, %v358_v11  ;;  %3424 = vtanh.f32 %v3833_v1 }
 0x148   :  { %v335_v61 = vmul.f32 %v3419_v52, %v334_v59  ;;  %vm357_vm8 = vcmp.eq.f32.partialorder %v356_v18, 8.507059e+37  ;;  %3426 = vtanh.f32 %v3836_v10 }
 0x149   :  { %3428 = vtanh.f32 %v3839_v23 }
 0x14a   :  { %v336_v0 = vadd.f32 %v3419_v52, %v335_v61  ;;  %3430 = vtanh.f32 %v3849_v39 }
 0x14b   :  { %v3421_v4 = vpop.eup %3420  ;;  %3432 = vtanh.f32 %v3854_v54 }
 0x14c   :  { %v340_v5 = vsel %vm339_vm3, %v3419_v52, %v336_v0  ;;  %v348_v8 = vmul.f32 %v3421_v4, %v241_v53  ;;  %vm353_vm6 = vweird.f32 %v3421_v4  ;;  %v3423_v26 = vpop.eup %3422  ;;  %3434 = vtanh.f32 %v3859_v14 }
 0x14d   :  { %v345_v9 = vsel %vm342_vm4, %v344_v63, %v340_v5  ;;  %vm354_vm7 = vmor %vm352_vm5, %vm353_vm6  ;;  %v3425_v27 = vpop.eup %3424  ;;  %3436 = vtanh.f32 %v3864_v34 }
 0x14e   :  { %382 = vrot.lane.b32.xlu2 %v345_v9, %s3707_s11  ;;  %v349_v17 = vsub.f32 1.0, %v348_v8  ;;  %v3427_v35 = vpop.eup %3426  ;;  %v3196_v9 = vld [vmem:[%s4838_s2 + $0x38] sm:$0xff] }
 0x14f   :  { %v3429_v36 = vpop.eup %3428  ;;  %610 = vmatpush.bf16.msra.mxu2 %v3196_v9 }
 0x150   :  { %v350_v19 = vmul.f32 %v3421_v4, %v349_v17  ;;  %v3431_v42 = vpop.eup %3430 }
 0x151   :  { %v3433_v23 = vpop.eup %3432 }
 0x152   :  { %v351_v21 = vadd.f32 %v3421_v4, %v350_v19  ;;  %v3435_v47 = vpop.eup %3434 }
 0x153   :  { %v3437_v48 = vpop.eup %3436 }
 0x154   :  { %v355_v22 = vsel %vm354_vm7, %v3421_v4, %v351_v21 }
 0x155   :  { %v360_v24 = vsel %vm357_vm8, %v359_v20, %v355_v22 }
 0x156   :  { %384 = vrot.lane.b32.xlu0 %v360_v24, %s3707_s11 }
 0x178   :  { %v371_v25 = vpop.permute.xlu2 %370 }
 0x179   :  { %v394_v29 = vmul.f32 %v3423_v26, %v371_v25 }
 0x180   :  { %v373_v28 = vpop.permute.xlu2 %372 }
 0x181   :  { %v395_v30 = vmul.f32 %v3425_v27, %v373_v28 }
 0x183   :  { %v402_v31 = vpack.c.bf16 %v395_v30, %v394_v29  ;;  %v3193_v29 = vld [vmem:[%s4838_s2 + $0x20] sm:$0xff] }
 0x185   :  { %418 = vrot.lane.b32.xlu1 %v402_v31, %s3708_s19 }
 0x198   :  { %v379_v10 = vpop.permute.xlu2 %378 }
 0x199   :  { %v398_v44 = vmul.f32 %v3431_v42, %v379_v10 }
 0x1a0   :  { %v375_v32 = vpop.permute.xlu0 %374 }
 0x1a1   :  { %v396_v62 = vmul.f32 %v3427_v35, %v375_v32 }
 0x1a8   :  { %v377_v37 = vpop.permute.xlu1 %376  ;;  %v383_v33 = vpop.permute.xlu2 %382 }
 0x1a9   :  { %v397_v38 = vmul.f32 %v3429_v36, %v377_v37  ;;  %v400_v49 = vmul.f32 %v3435_v47, %v383_v33 }
 0x1ab   :  { %v403_v1 = vpack.c.bf16 %v397_v38, %v396_v62 }
 0x1ad   :  { %420 = vrot.lane.b32.xlu1 %v403_v1, %s3708_s19 }
 0x1b8   :  { %v381_v43 = vpop.permute.xlu0 %380 }
 0x1b9   :  { %v399_v45 = vmul.f32 %v3433_v23, %v381_v43 }
 0x1bb   :  { %v404_v46 = vpack.c.bf16 %v399_v45, %v398_v44 }
 0x1bd   :  { %422 = vrot.lane.b32.xlu2 %v404_v46, %s3708_s19 }
 0x1c8   :  { %v385_v39 = vpop.permute.xlu0 %384 }
 0x1c9   :  { %v401_v54 = vmul.f32 %v3437_v48, %v385_v39 }
 0x1cb   :  { %v405_v50 = vpack.c.bf16 %v401_v54, %v400_v49 }
 0x1cd   :  { %424 = vrot.lane.b32.xlu0 %v405_v50, %s3708_s19 }
 0x1f7   :  { %v419_v51 = vpop.permute.xlu1 %418 }
 0x1f8   :  { %2938 = vmatmul.msk.bf16.vlgmr.msra.gmra.mxu1 %vm115_vm1, %v419_v51 }
 0x217   :  { %v423_v53 = vpop.permute.xlu2 %422 }
 0x21f   :  { %v421_v52 = vpop.permute.xlu1 %420 }
 0x220   :  { %2939 = vmatmul.msk.bf16.gmra.mxu1 %vm115_vm1, %v421_v52 }
 0x230   :  { %2940 = vmatmul.msk.bf16.gmra.mxu1 %vm115_vm1, %v423_v53 }
 0x23f   :  { %v425_v14 = vpop.permute.xlu0 %424 }
 0x240   :  { %2941 = vmatmul.msk.bf16.gmra.mxu1 %vm115_vm1, %v425_v14 }
 0x275   :  { %v459_v34 = vpop.f32.mrf.mxu1 }
 0x276   :  { %v3890_v56 = vadd.f32 %v3374_v55, %v459_v34 }
 0x278   :  { %v3896_v59 = vadd.f32 %v3753_v2, %v3890_v56 }
 0x27d   :  { %v461_v57 = vpop.f32.mrf.mxu1 }
 0x27e   :  { %v3892_v58 = vadd.f32 %v3374_v55, %v461_v57 }
 0x280   :  { %v3900_v60 = vadd.f32 %v3755_v3, %v3892_v58 }
 0x282   :  { %v3272_v61 = vpack.i.bf16 %v3900_v60, %v3896_v59  ;;  %v503_v30 = vrot.slane %v3900_v60, 6 }
 0x284   :  { %3273 = vrot.lane.b32.xlu1 %v3272_v61, %s3707_s11 }
 0x29d   :  { %v464_v63 = vpop.f32.mrf.mxu1 }
 0x29e   :  { %v3905_v0 = vadd.f32 %v3374_v55, %v464_v63 }
 0x2a0   :  { %v3911_v8 = vadd.f32 %v3778_v12, %v3905_v0  ;;  %v3195_v12 = vld [vmem:[%s4838_s2 + $0x30] sm:$0xff] }
 0x2a1   :  { %611 = vmatpush.bf16.msra.mxu2 %v3195_v12  ;;  %v3375_v12 = vld [vmem:[%s4837_s1 + $0x2] ss:$0 sm:$0xff] }
 0x2a2   :  { %v505_v40 = vrot.slane %v3911_v8, 6 }
 0x2a4   :  { %v506_v43 = vsel %vm501_vm9, %v503_v30, %v505_v40 }
 0x2a5   :  { %v466_v4 = vpop.f32.mrf.mxu1 }
 0x2a6   :  { %v3907_v5 = vadd.f32 %v3374_v55, %v466_v4 }
 0x2a8   :  { %v3915_v2 = vadd.f32 %v3780_v13, %v3907_v5  ;;  %v3194_v13 = vld [vmem:[%s4838_s2 + $0x28] sm:$0xff] }
 0x2a9   :  { %612 = vmatpush.bf16.msra.mxu2 %v3194_v13 }
 0x2aa   :  { %v3277_v3 = vpack.i.bf16 %v3915_v2, %v3911_v8  ;;  %v507_v41 = vrot.slane %v3915_v2, 6 }
 0x2ac   :  { %3278 = vrot.lane.b32.xlu2 %v3277_v3, %s3707_s11  ;;  %v508_v44 = vsel %vm501_vm9, %v505_v40, %v507_v41 }
 0x2ad   :  { %v469_v11 = vpop.f32.mrf.mxu1  ;;  %613 = vmatpush.bf16.msra.mxu2 %v3193_v29 }
 0x2ae   :  { %v3929_v17 = vadd.f32 %v3374_v55, %v469_v11 }
 0x2b0   :  { %v3935_v20 = vadd.f32 %v3763_v6, %v3929_v17 }
 0x2b2   :  { %v509_v47 = vrot.slane %v3935_v20, 6 }
 0x2b4   :  { %v510_v50 = vsel %vm501_vm9, %v507_v41, %v509_v47 }
 0x2b5   :  { %v471_v18 = vpop.f32.mrf.mxu1 }
 0x2b6   :  { %v3931_v19 = vadd.f32 %v3374_v55, %v471_v18 }
 0x2b8   :  { %v3939_v21 = vadd.f32 %v3765_v7, %v3931_v19 }
 0x2ba   :  { %v3282_v22 = vpack.i.bf16 %v3939_v21, %v3935_v20  ;;  %v511_v48 = vrot.slane %v3939_v21, 6 }
 0x2bc   :  { %3283 = vrot.lane.b32.xlu0 %v3282_v22, %s3707_s11  ;;  %v512_v51 = vsel %vm501_vm9, %v509_v47, %v511_v48 }
 0x2bd   :  { %v474_v24 = vpop.f32.mrf.mxu1 }
 0x2be   :  { %v3944_v25 = vadd.f32 %v3374_v55, %v474_v24 }
 0x2c0   :  { %v3950_v28 = vadd.f32 %v3786_v15, %v3944_v25  ;;  %v502_v15 = vrot.slane %v3896_v59, 6 }
 0x2c2   :  { %v504_v36 = vsel %vm501_vm9, %v502_v15, %v503_v30  ;;  %v513_v34 = vrot.slane %v3950_v28, 6 }
 0x2c4   :  { %v514_v63 = vsel %vm501_vm9, %v511_v48, %v513_v34 }
 0x2c5   :  { %v476_v26 = vpop.f32.mrf.mxu1 }
 0x2c6   :  { %v3946_v27 = vadd.f32 %v3374_v55, %v476_v26 }
 0x2c8   :  { %v3954_v6 = vadd.f32 %v3788_v16, %v3946_v27 }
 0x2ca   :  { %v3287_v7 = vpack.i.bf16 %v3954_v6, %v3950_v28  ;;  %v492_v31 = vrot.slane %v3954_v6, 6 }
 0x2cc   :  { %3288 = vrot.lane.b32.xlu1 %v3287_v7, %s3707_s11  ;;  %v524_v37 = vsel %vm501_vm9, %v492_v31, %v502_v15  ;;  %v515_v4 = vsel %vm501_vm9, %v513_v34, %v492_v31 }
 0x2f6   :  { %v3274_v32 = vpop.permute.xlu1 %3273 }
 0x2f7   :  { %v3276_v16 = vunpack.i.h.bf16 %v3274_v32  ;;  %v3275_v35 = vunpack.i.l.bf16 %v3274_v32 }
 0x2f9   :  { %v549_v62 = vsel %vm115_vm1, %v524_v37, %v3275_v35  ;;  %v550_v38 = vsel %vm115_vm1, %v504_v36, %v3276_v16 }
 0x2fa   :  { %v557_v1 = vpack.c.bf16 %v550_v38, %v549_v62 }
 0x2fc   :  { %2966 = vmatmul.msk.bf16.vlgmr.msra.gmra.mxu2 %vm160_vm2, %v557_v1 }
 0x306   :  { %v3279_v10 = vpop.permute.xlu2 %3278 }
 0x307   :  { %v3281_v42 = vunpack.i.h.bf16 %v3279_v10  ;;  %v3280_v23 = vunpack.i.l.bf16 %v3279_v10 }
 0x309   :  { %v551_v45 = vsel %vm115_vm1, %v506_v43, %v3280_v23  ;;  %v552_v46 = vsel %vm115_vm1, %v508_v44, %v3281_v42 }
 0x30a   :  { %v558_v33 = vpack.c.bf16 %v552_v46, %v551_v45 }
 0x30c   :  { %2967 = vmatmul.msk.bf16.gmra.mxu2 %vm160_vm2, %v558_v33 }
 0x32e   :  { %v3284_v39 = vpop.permute.xlu0 %3283 }
 0x32f   :  { %v3286_v49 = vunpack.i.h.bf16 %v3284_v39  ;;  %v3285_v54 = vunpack.i.l.bf16 %v3284_v39 }
 0x331   :  { %v553_v52 = vsel %vm115_vm1, %v510_v50, %v3285_v54  ;;  %v554_v53 = vsel %vm115_vm1, %v512_v51, %v3286_v49 }
 0x332   :  { %v559_v14 = vpack.c.bf16 %v554_v53, %v553_v52 }
 0x334   :  { %2968 = vmatmul.msk.bf16.gmra.mxu2 %vm160_vm2, %v559_v14 }
 0x33e   :  { %v3289_v55 = vpop.permute.xlu1 %3288 }
 0x33f   :  { %v3291_v57 = vunpack.i.h.bf16 %v3289_v55  ;;  %v3290_v61 = vunpack.i.l.bf16 %v3289_v55 }
 0x341   :  { %v555_v3 = vsel %vm115_vm1, %v514_v63, %v3290_v61  ;;  %v556_v9 = vsel %vm115_vm1, %v515_v4, %v3291_v57 }
 0x342   :  { %v560_v11 = vpack.c.bf16 %v556_v9, %v555_v3 }
 0x344   :  { %2969 = vmatmul.msk.bf16.gmra.mxu2 %vm160_vm2, %v560_v11 }
 0x37f   :  { %v615_v13 = vpop.f32.mrf.mxu2 }
 0x380   :  { %v3993_v18 = vadd.f32 %v3375_v12, %v615_v13 }
 0x382   :  { %v2970_v22 = vmul.f32 -1.442695, %v3993_v18 }
 0x384   :  { %3438 = vpow2.f32 %v2970_v22 }
 0x387   :  { %v617_v24 = vpop.f32.mrf.mxu2 }
 0x388   :  { %v3996_v26 = vadd.f32 %v3375_v12, %v617_v24 }
 0x38a   :  { %v3439_v7 = vpop.eup %3438  ;;  %v2971_v29 = vmul.f32 -1.442695, %v3996_v26 }
 0x38b   :  { %v667_v30 = vadd.f32 1.0, %v3439_v7 }
 0x38c   :  { %3440 = vpow2.f32 %v2971_v29 }
 0x38d   :  { %3442 = vrcp.f32 %v667_v30  ;;  %v686_v1 = vand.u32 2147483648, %v667_v30  ;;  %v684_v10 = vand.u32 2147483647, %v667_v30  ;;  %vm680_vm11 = vweird.f32 %v667_v30 }
 0x38f   :  { %v620_v31 = vpop.f32.mrf.mxu2  ;;  %v687_v46 = vor.u32 1.1754944e-38, %v686_v1  ;;  %vm685_vm13 = vcmp.eq.f32.partialorder %v684_v10, 8.507059e+37 }
 0x390   :  { %v3999_v15 = vadd.f32 %v3375_v12, %v620_v31 }
 0x392   :  { %v3441_v32 = vpop.eup %3440  ;;  %v2972_v16 = vmul.f32 -1.442695, %v3999_v15 }
 0x393   :  { %v3443_v35 = vpop.eup %3442  ;;  %v668_v36 = vadd.f32 1.0, %v3441_v32 }
 0x394   :  { %3444 = vpow2.f32 %v2972_v16  ;;  %v676_v37 = vmul.f32 %v3443_v35, %v667_v30  ;;  %vm681_vm10 = vweird.f32 %v3443_v35 }
 0x395   :  { %3446 = vrcp.f32 %v668_v36  ;;  %vm682_vm12 = vmor %vm680_vm11, %vm681_vm10  ;;  %v701_v49 = vand.u32 2147483648, %v668_v36  ;;  %v699_v50 = vand.u32 2147483647, %v668_v36  ;;  %vm695_vm15 = vweird.f32 %v668_v36 }
 0x396   :  { %v677_v62 = vsub.f32 1.0, %v676_v37  ;;  %v3376_v37 = vld [vmem:[%s4837_s1 + $0x3] ss:$0 sm:$0xff] }
 0x397   :  { %v622_v38 = vpop.f32.mrf.mxu2  ;;  %v702_v34 = vor.u32 1.1754944e-38, %v701_v49  ;;  %vm700_vm4 = vcmp.eq.f32.partialorder %v699_v50, 8.507059e+37 }
 0x398   :  { %v4002_v40 = vadd.f32 %v3375_v12, %v622_v38  ;;  %v678_v41 = vmul.f32 %v3443_v35, %v677_v62 }
 0x39a   :  { %v3445_v42 = vpop.eup %3444  ;;  %v2973_v23 = vmul.f32 -1.442695, %v4002_v40  ;;  %v679_v43 = vadd.f32 %v3443_v35, %v678_v41 }
 0x39b   :  { %v3447_v44 = vpop.eup %3446  ;;  %v669_v45 = vadd.f32 1.0, %v3445_v42 }
 0x39c   :  { %3448 = vpow2.f32 %v2973_v23  ;;  %v683_v33 = vsel %vm682_vm12, %v3443_v35, %v679_v43  ;;  %v691_v47 = vmul.f32 %v3447_v44, %v668_v36  ;;  %vm696_vm14 = vweird.f32 %v3447_v44 }
 0x39d   :  { %3450 = vrcp.f32 %v669_v45  ;;  %v688_v48 = vsel %vm685_vm13, %v687_v46, %v683_v33  ;;  %vm697_vm3 = vmor %vm695_vm15, %vm696_vm14  ;;  %v716_v4 = vand.u32 2147483648, %v669_v45  ;;  %v714_v9 = vand.u32 2147483647, %v669_v45 }
 0x39e   :  { %803 = vrot.lane.b32.xlu2 %v688_v48, %s3707_s11  ;;  %v692_v39 = vsub.f32 1.0, %v691_v47  ;;  %vm710_vm6 = vweird.f32 %v669_v45 }
 0x39f   :  { %v717_v13 = vor.u32 1.1754944e-38, %v716_v4  ;;  %vm715_vm8 = vcmp.eq.f32.partialorder %v714_v9, 8.507059e+37 }
 0x3a0   :  { %v693_v54 = vmul.f32 %v3447_v44, %v692_v39 }
 0x3a2   :  { %v3449_v51 = vpop.eup %3448  ;;  %v694_v52 = vadd.f32 %v3447_v44, %v693_v54 }
 0x3a3   :  { %v3451_v53 = vpop.eup %3450  ;;  %v670_v14 = vadd.f32 1.0, %v3449_v51 }
 0x3a4   :  { %v698_v55 = vsel %vm697_vm3, %v3447_v44, %v694_v52  ;;  %v706_v57 = vmul.f32 %v3451_v53, %v669_v45  ;;  %vm711_vm5 = vweird.f32 %v3451_v53 }
 0x3a5   :  { %3452 = vrcp.f32 %v670_v14  ;;  %v703_v61 = vsel %vm700_vm4, %v702_v34, %v698_v55  ;;  %vm712_vm7 = vmor %vm710_vm6, %vm711_vm5  ;;  %v731_v30 = vand.u32 2147483648, %v670_v14  ;;  %v729_v32 = vand.u32 2147483647, %v670_v14 }
 0x3a6   :  { %805 = vrot.lane.b32.xlu0 %v703_v61, %s3707_s11  ;;  %v707_v63 = vsub.f32 1.0, %v706_v57  ;;  %vm725_vm11 = vweird.f32 %v670_v14 }
 0x3a7   :  { %v732_v35 = vor.u32 1.1754944e-38, %v731_v30  ;;  %vm730_vm13 = vcmp.eq.f32.partialorder %v729_v32, 8.507059e+37 }
 0x3a8   :  { %v708_v3 = vmul.f32 %v3451_v53, %v707_v63 }
 0x3aa   :  { %v709_v11 = vadd.f32 %v3451_v53, %v708_v3 }
 0x3ab   :  { %v3453_v12 = vpop.eup %3452 }
 0x3ac   :  { %v713_v22 = vsel %vm712_vm7, %v3451_v53, %v709_v11  ;;  %v721_v24 = vmul.f32 %v3453_v12, %v670_v14  ;;  %vm726_vm10 = vweird.f32 %v3453_v12 }
 0x3ad   :  { %v718_v7 = vsel %vm715_vm8, %v717_v13, %v713_v22  ;;  %vm727_vm12 = vmor %vm725_vm11, %vm726_vm10 }
 0x3ae   :  { %807 = vrot.lane.b32.xlu1 %v718_v7, %s3707_s11  ;;  %v722_v29 = vsub.f32 1.0, %v721_v24 }
 0x3b0   :  { %v723_v31 = vmul.f32 %v3453_v12, %v722_v29 }
 0x3b2   :  { %v724_v16 = vadd.f32 %v3453_v12, %v723_v31 }
 0x3b4   :  { %v728_v36 = vsel %vm727_vm12, %v3453_v12, %v724_v16 }
 0x3b5   :  { %v733_v62 = vsel %vm730_vm13, %v732_v35, %v728_v36 }
 0x3b6   :  { %809 = vrot.lane.b32.xlu2 %v733_v62, %s3707_s11 }
 0x3b7   :  { %v625_v38 = vpop.f32.mrf.mxu2 }
 0x3b8   :  { %v4012_v1 = vadd.f32 %v3376_v37, %v625_v38 }
 0x3ba   :  { %v2974_v41 = vmul.f32 -1.442695, %v4012_v1 }
 0x3bc   :  { %3454 = vpow2.f32 %v2974_v41 }
 0x3bf   :  { %v627_v10 = vpop.f32.mrf.mxu2 }
 0x3c0   :  { %v4015_v42 = vadd.f32 %v3376_v37, %v627_v10 }
 0x3c2   :  { %v3455_v23 = vpop.eup %3454  ;;  %v2975_v43 = vmul.f32 -1.442695, %v4015_v42 }
 0x3c3   :  { %v671_v44 = vadd.f32 1.0, %v3455_v23 }
 0x3c4   :  { %3456 = vpow2.f32 %v2975_v43 }
 0x3c5   :  { %3458 = vrcp.f32 %v671_v44  ;;  %v746_v51 = vand.u32 2147483648, %v671_v44  ;;  %v744_v14 = vand.u32 2147483647, %v671_v44  ;;  %vm740_vm15 = vweird.f32 %v671_v44 }
 0x3c7   :  { %v630_v45 = vpop.f32.mrf.mxu2  ;;  %v747_v4 = vor.u32 1.1754944e-38, %v746_v51  ;;  %vm745_vm4 = vcmp.eq.f32.partialorder %v744_v14, 8.507059e+37 }
 0x3c8   :  { %v4018_v46 = vadd.f32 %v3376_v37, %v630_v45 }
 0x3ca   :  { %v3457_v33 = vpop.eup %3456  ;;  %v2976_v47 = vmul.f32 -1.442695, %v4018_v46 }
 0x3cb   :  { %v3459_v48 = vpop.eup %3458  ;;  %v672_v39 = vadd.f32 1.0, %v3457_v33 }
 0x3cc   :  { %3460 = vpow2.f32 %v2976_v47  ;;  %v736_v49 = vmul.f32 %v3459_v48, %v671_v44  ;;  %vm741_vm14 = vweird.f32 %v3459_v48 }
 0x3cd   :  { %3462 = vrcp.f32 %v672_v39  ;;  %vm742_vm3 = vmor %vm740_vm15, %vm741_vm14  ;;  %v761_v13 = vand.u32 2147483648, %v672_v39  ;;  %v759_v24 = vand.u32 2147483647, %v672_v39  ;;  %vm755_vm6 = vweird.f32 %v672_v39 }
 0x3ce   :  { %v737_v54 = vsub.f32 1.0, %v736_v49 }
 0x3cf   :  { %v632_v50 = vpop.f32.mrf.mxu2  ;;  %v762_v32 = vor.u32 1.1754944e-38, %v761_v13  ;;  %vm760_vm8 = vcmp.eq.f32.partialorder %v759_v24, 8.507059e+37  ;;  %v3197_v24 = vld [vmem:[#allocation2 + $0x10] sm:$0xff] }
 0x3d0   :  { %v4021_v52 = vadd.f32 %v3376_v37, %v632_v50  ;;  %v738_v53 = vmul.f32 %v3459_v48, %v737_v54 }
 0x3d2   :  { %v3461_v34 = vpop.eup %3460  ;;  %v2977_v55 = vmul.f32 -1.442695, %v4021_v52  ;;  %v739_v57 = vadd.f32 %v3459_v48, %v738_v53 }
 0x3d3   :  { %v3463_v61 = vpop.eup %3462  ;;  %v673_v63 = vadd.f32 1.0, %v3461_v34 }
 0x3d4   :  { %3464 = vpow2.f32 %v2977_v55  ;;  %v743_v3 = vsel %vm742_vm3, %v3459_v48, %v739_v57  ;;  %v751_v9 = vmul.f32 %v3463_v61, %v672_v39  ;;  %vm756_vm5 = vweird.f32 %v3463_v61 }
 0x3d5   :  { %3466 = vrcp.f32 %v673_v63  ;;  %v748_v11 = vsel %vm745_vm4, %v747_v4, %v743_v3  ;;  %vm757_vm7 = vmor %vm755_vm6, %vm756_vm5  ;;  %v776_v62 = vand.u32 2147483648, %v673_v63  ;;  %v774_v41 = vand.u32 2147483647, %v673_v63 }
 0x3d6   :  { %811 = vrot.lane.b32.xlu0 %v748_v11, %s3707_s11  ;;  %v752_v12 = vsub.f32 1.0, %v751_v9  ;;  %vm770_vm11 = vweird.f32 %v673_v63  ;;  %vm936_vm5 = vcmask 1043456  }
 0x3d7   :  { %v777_v43 = vor.u32 1.1754944e-38, %v776_v62  ;;  %vm775_vm13 = vcmp.eq.f32.partialorder %v774_v41, 8.507059e+37 }
 0x3d8   :  { %v753_v22 = vmul.f32 %v3463_v61, %v752_v12 }
 0x3da   :  { %v3465_v7 = vpop.eup %3464  ;;  %v754_v29 = vadd.f32 %v3463_v61, %v753_v22  ;;  %v3198_v22 = vld [vmem:[#allocation2 + $0x18] sm:$0xff] }
 0x3db   :  { %v3467_v30 = vpop.eup %3466  ;;  %v674_v31 = vadd.f32 1.0, %v3465_v7  ;;  %891 = vmatpush.bf16.msra.mxu3 %v3198_v22 }
 0x3dc   :  { %v758_v16 = vsel %vm757_vm7, %v3463_v61, %v754_v29  ;;  %v766_v35 = vmul.f32 %v3467_v30, %v673_v63  ;;  %vm771_vm10 = vweird.f32 %v3467_v30 }
 0x3dd   :  { %3468 = vrcp.f32 %v674_v31  ;;  %v763_v36 = vsel %vm760_vm8, %v762_v32, %v758_v16  ;;  %vm772_vm12 = vmor %vm770_vm11, %vm771_vm10  ;;  %v791_v48 = vand.u32 2147483648, %v674_v31  ;;  %v789_v49 = vand.u32 2147483647, %v674_v31 }
 0x3de   :  { %813 = vrot.lane.b32.xlu1 %v763_v36, %s3707_s11  ;;  %v767_v37 = vsub.f32 1.0, %v766_v35  ;;  %vm785_vm15 = vweird.f32 %v674_v31  ;;  %3470 = vtanh.f32 %v3993_v18 }
 0x3df   :  { %v792_v50 = vor.u32 1.1754944e-38, %v791_v48  ;;  %vm790_vm4 = vcmp.eq.f32.partialorder %v789_v49, 8.507059e+37  ;;  %3472 = vtanh.f32 %v3996_v26  ;;  %892 = vmatpush.bf16.msra.mxu3 %v3197_v24 }
 0x3e0   :  { %v768_v38 = vmul.f32 %v3467_v30, %v767_v37  ;;  %3474 = vtanh.f32 %v3999_v15 }
 0x3e1   :  { %3476 = vtanh.f32 %v4002_v40 }
 0x3e2   :  { %v769_v10 = vadd.f32 %v3467_v30, %v768_v38  ;;  %3478 = vtanh.f32 %v4012_v1 }
 0x3e3   :  { %v3469_v23 = vpop.eup %3468  ;;  %3480 = vtanh.f32 %v4015_v42 }
 0x3e4   :  { %v773_v44 = vsel %vm772_vm12, %v3467_v30, %v769_v10  ;;  %v781_v45 = vmul.f32 %v3469_v23, %v674_v31  ;;  %vm786_vm14 = vweird.f32 %v3469_v23  ;;  %v3471_v34 = vpop.eup %3470  ;;  %3482 = vtanh.f32 %v4018_v46 }
 0x3e5   :  { %v778_v33 = vsel %vm775_vm13, %v777_v43, %v773_v44  ;;  %vm787_vm3 = vmor %vm785_vm15, %vm786_vm14  ;;  %v3473_v55 = vpop.eup %3472  ;;  %3484 = vtanh.f32 %v4021_v52  ;;  %v3202_v52 = vld [vmem:[%s4838_s2 + $0x58] sm:$0xff]  ;;  %v3377_v43 = vld [vmem:[%s4840_s4 + $0x1] ss:$0 sm:$0xff] }
 0x3e6   :  { %815 = vrot.lane.b32.xlu0 %v778_v33, %s3707_s11  ;;  %v782_v47 = vsub.f32 1.0, %v781_v45  ;;  %v3475_v9 = vpop.eup %3474  ;;  %1045 = vmatpush.bf16.msrb.mxu1 %v3202_v52 }
 0x3e7   :  { %v3477_v11 = vpop.eup %3476 }
 0x3e8   :  { %v783_v39 = vmul.f32 %v3469_v23, %v782_v47  ;;  %v3479_v40 = vpop.eup %3478 }
 0x3e9   :  { %v3481_v7 = vpop.eup %3480 }
 0x3ea   :  { %v784_v54 = vadd.f32 %v3469_v23, %v783_v39  ;;  %v3483_v35 = vpop.eup %3482 }
 0x3eb   :  { %v3485_v36 = vpop.eup %3484 }
 0x3ec   :  { %v788_v51 = vsel %vm787_vm3, %v3469_v23, %v784_v54 }
 0x3ed   :  { %v793_v53 = vsel %vm790_vm4, %v792_v50, %v788_v51 }
 0x3ee   :  { %817 = vrot.lane.b32.xlu1 %v793_v53, %s3707_s11 }
 0x3f8   :  { %v804_v14 = vpop.permute.xlu2 %803 }
 0x3f9   :  { %v827_v61 = vmul.f32 %v3471_v34, %v804_v14  ;;  %v3201_v14 = vld [vmem:[%s4838_s2 + $0x50] sm:$0xff]  ;;  %v3200_v34 = vld [vmem:[%s4838_s2 + $0x48] sm:$0xff] }
 0x3fa   :  { %1046 = vmatpush.bf16.msrb.mxu1 %v3201_v14 }
 0x3fe   :  { %1047 = vmatpush.bf16.msrb.mxu1 %v3200_v34 }
 0x410   :  { %v810_v3 = vpop.permute.xlu2 %809 }
 0x411   :  { %v830_v18 = vmul.f32 %v3477_v11, %v810_v3 }
 0x418   :  { %v806_v57 = vpop.permute.xlu0 %805 }
 0x419   :  { %v828_v63 = vmul.f32 %v3473_v55, %v806_v57 }
 0x41b   :  { %v835_v4 = vpack.c.bf16 %v828_v63, %v827_v61 }
 0x41d   :  { %853 = vrot.lane.b32.xlu2 %v835_v4, %s3708_s19 }
 0x420   :  { %v808_v12 = vpop.permute.xlu1 %807 }
 0x421   :  { %v829_v13 = vmul.f32 %v3475_v9, %v808_v12 }
 0x423   :  { %v836_v26 = vpack.c.bf16 %v830_v18, %v829_v13 }
 0x425   :  { %855 = vrot.lane.b32.xlu2 %v836_v26, %s3708_s19 }
 0x448   :  { %v812_v15 = vpop.permute.xlu0 %811 }
 0x449   :  { %v831_v30 = vmul.f32 %v3479_v40, %v812_v15 }
 0x450   :  { %v814_v29 = vpop.permute.xlu1 %813 }
 0x451   :  { %v832_v31 = vmul.f32 %v3481_v7, %v814_v29 }
 0x453   :  { %v837_v32 = vpack.c.bf16 %v832_v31, %v831_v30 }
 0x455   :  { %857 = vrot.lane.b32.xlu0 %v837_v32, %s3708_s19 }
 0x458   :  { %v816_v16 = vpop.permute.xlu0 %815 }
 0x459   :  { %v833_v37 = vmul.f32 %v3483_v35, %v816_v16 }
 0x460   :  { %v818_v1 = vpop.permute.xlu1 %817 }
 0x461   :  { %v834_v42 = vmul.f32 %v3485_v36, %v818_v1 }
 0x463   :  { %v838_v62 = vpack.c.bf16 %v834_v42, %v833_v37 }
 0x465   :  { %859 = vrot.lane.b32.xlu1 %v838_v62, %s3708_s19 }
 0x477   :  { %v854_v38 = vpop.permute.xlu2 %853 }
 0x478   :  { %2987 = vmatmul.msk.bf16.vlgmr.msra.gmra.mxu3 %vm115_vm1, %v854_v38 }
 0x47f   :  { %v856_v41 = vpop.permute.xlu2 %855 }
 0x488   :  { %2988 = vmatmul.msk.bf16.gmra.mxu3 %vm115_vm1, %v856_v41 }
 0x4c7   :  { %v858_v10 = vpop.permute.xlu0 %857 }
 0x4c8   :  { %2989 = vmatmul.msk.bf16.gmra.mxu3 %vm115_vm1, %v858_v10 }
 0x4d7   :  { %v860_v46 = vpop.permute.xlu1 %859 }
 0x4d8   :  { %2990 = vmatmul.msk.bf16.gmra.mxu3 %vm115_vm1, %v860_v46 }
 0x4fb   :  { %v894_v23 = vpop.f32.mrf.mxu3 }
 0x4fc   :  { %v4050_v44 = vadd.f32 %v3377_v43, %v894_v23 }
 0x4fe   :  { %v4056_v47 = vadd.f32 %v4050_v44, %v3896_v59 }
 0x500   :  { %v937_v24 = vrot.slane %v4056_v47, 4 }
 0x503   :  { %v896_v45 = vpop.f32.mrf.mxu3 }
 0x504   :  { %v4052_v33 = vadd.f32 %v3377_v43, %v896_v45 }
 0x506   :  { %v4060_v48 = vadd.f32 %v4052_v33, %v3900_v60 }
 0x508   :  { %v3292_v39 = vpack.i.bf16 %v4060_v48, %v4056_v47  ;;  %v938_v26 = vrot.slane %v4060_v48, 4 }
 0x50a   :  { %3293 = vrot.lane.b32.xlu2 %v3292_v39, %s3707_s11  ;;  %v939_v29 = vsel %vm936_vm5, %v937_v24, %v938_v26 }
 0x50b   :  { %v899_v49 = vpop.f32.mrf.mxu3 }
 0x50c   :  { %v4065_v54 = vadd.f32 %v3377_v43, %v899_v49 }
 0x50e   :  { %v4071_v53 = vadd.f32 %v4065_v54, %v3911_v8  ;;  %v3199_v8 = vld [vmem:[%s4838_s2 + $0x40] sm:$0xff] }
 0x50f   :  { %1048 = vmatpush.bf16.msrb.mxu1 %v3199_v8 }
 0x510   :  { %v940_v32 = vrot.slane %v4071_v53, 4 }
 0x512   :  { %v941_v37 = vsel %vm936_vm5, %v938_v26, %v940_v32  ;;  %v3378_v26 = vld [vmem:[%s4837_s1 + $0x4] ss:$0 sm:$0xff] }
 0x513   :  { %v901_v50 = vpop.f32.mrf.mxu3 }
 0x514   :  { %v4067_v51 = vadd.f32 %v3377_v43, %v901_v50 }
 0x516   :  { %v4075_v59 = vadd.f32 %v4067_v51, %v3915_v2 }
 0x518   :  { %v3297_v60 = vpack.i.bf16 %v4075_v59, %v4071_v53  ;;  %v942_v16 = vrot.slane %v4075_v59, 4 }
 0x51a   :  { %3298 = vrot.lane.b32.xlu0 %v3297_v60, %s3707_s11  ;;  %v943_v42 = vsel %vm936_vm5, %v940_v32, %v942_v16 }
 0x54b   :  { %v904_v2 = vpop.f32.mrf.mxu3 }
 0x54c   :  { %v4089_v55 = vadd.f32 %v3377_v43, %v904_v2 }
 0x54e   :  { %v4095_v63 = vadd.f32 %v4089_v55, %v3935_v20 }
 0x550   :  { %v944_v10 = vrot.slane %v4095_v63, 4 }
 0x552   :  { %v945_v45 = vsel %vm936_vm5, %v942_v16, %v944_v10 }
 0x553   :  { %v906_v57 = vpop.f32.mrf.mxu3 }
 0x554   :  { %v4091_v61 = vadd.f32 %v3377_v43, %v906_v57 }
 0x556   :  { %v4099_v4 = vadd.f32 %v4091_v61, %v3939_v21 }
 0x558   :  { %v3302_v3 = vpack.i.bf16 %v4099_v4, %v4095_v63  ;;  %v946_v46 = vrot.slane %v4099_v4, 4 }
 0x55a   :  { %3303 = vrot.lane.b32.xlu1 %v3302_v3, %s3707_s11  ;;  %v947_v39 = vsel %vm936_vm5, %v944_v10, %v946_v46 }
 0x55b   :  { %v909_v9 = vpop.f32.mrf.mxu3 }
 0x55c   :  { %v4104_v11 = vadd.f32 %v3377_v43, %v909_v9 }
 0x55e   :  { %v4111_v20 = vadd.f32 %v4104_v11, %v3950_v28 }
 0x560   :  { %v948_v34 = vrot.slane %v4111_v20, 4 }
 0x562   :  { %v949_v57 = vsel %vm936_vm5, %v946_v46, %v948_v34 }
 0x563   :  { %v911_v12 = vpop.f32.mrf.mxu3 }
 0x564   :  { %v4106_v18 = vadd.f32 %v3377_v43, %v911_v12  ;;  %v3294_v13 = vpop.permute.xlu2 %3293 }
 0x565   :  { %v3296_v22 = vunpack.i.h.bf16 %v3294_v13  ;;  %v3295_v7 = vunpack.i.l.bf16 %v3294_v13 }
 0x566   :  { %v4115_v21 = vadd.f32 %v4106_v18, %v3954_v6 }
 0x567   :  { %v985_v28 = vsel %vm115_vm1, %v939_v29, %v3296_v22 }
 0x568   :  { %v927_v15 = vrot.slane %v4115_v21, 4  ;;  %v3307_v40 = vpack.i.bf16 %v4115_v21, %v4111_v20 }
 0x56a   :  { %v959_v30 = vsel %vm936_vm5, %v927_v15, %v937_v24  ;;  %3308 = vrot.lane.b32.xlu2 %v3307_v40, %s3707_s11  ;;  %v950_v3 = vsel %vm936_vm5, %v948_v34, %v927_v15 }
 0x56b   :  { %v984_v6 = vsel %vm115_vm1, %v959_v30, %v3295_v7 }
 0x56c   :  { %v992_v31 = vpack.c.bf16 %v985_v28, %v984_v6 }
 0x56e   :  { %3015 = vmatmul.msk.bf16.vlgmr.msrb.gmra.mxu1 %vm160_vm2, %v992_v31 }
 0x58c   :  { %v3299_v35 = vpop.permute.xlu0 %3298 }
 0x58d   :  { %v3301_v36 = vunpack.i.h.bf16 %v3299_v35  ;;  %v3300_v1 = vunpack.i.l.bf16 %v3299_v35 }
 0x58f   :  { %v986_v62 = vsel %vm115_vm1, %v941_v37, %v3300_v1  ;;  %v987_v38 = vsel %vm115_vm1, %v943_v42, %v3301_v36 }
 0x590   :  { %v993_v41 = vpack.c.bf16 %v987_v38, %v986_v62 }
 0x592   :  { %3016 = vmatmul.msk.bf16.gmra.mxu1 %vm160_vm2, %v993_v41 }
 0x5c4   :  { %v3309_v14 = vpop.permute.xlu2 %3308 }
 0x5c5   :  { %v3311_v8 = vunpack.i.h.bf16 %v3309_v14  ;;  %v3310_v2 = vunpack.i.l.bf16 %v3309_v14 }
 0x5c7   :  { %v990_v9 = vsel %vm115_vm1, %v949_v57, %v3310_v2  ;;  %v991_v12 = vsel %vm115_vm1, %v950_v3, %v3311_v8 }
 0x5c8   :  { %v995_v13 = vpack.c.bf16 %v991_v12, %v990_v9 }
 0x5cc   :  { %v3304_v52 = vpop.permute.xlu1 %3303 }
 0x5cd   :  { %v3306_v23 = vunpack.i.h.bf16 %v3304_v52  ;;  %v3305_v43 = vunpack.i.l.bf16 %v3304_v52 }
 0x5cf   :  { %v988_v49 = vsel %vm115_vm1, %v945_v45, %v3305_v43  ;;  %v989_v50 = vsel %vm115_vm1, %v947_v39, %v3306_v23 }
 0x5d0   :  { %v994_v60 = vpack.c.bf16 %v989_v50, %v988_v49 }
 0x5d2   :  { %3017 = vmatmul.msk.bf16.gmra.mxu1 %vm160_vm2, %v994_v60 }
 0x5e2   :  { %3018 = vmatmul.msk.bf16.gmra.mxu1 %vm160_vm2, %v995_v13 }
 0x5eb   :  { %v1050_v22 = vpop.f32.mrf.mxu1 }
 0x5ec   :  { %v4150_v24 = vadd.f32 %v3378_v26, %v1050_v22 }
 0x5ee   :  { %v3019_v40 = vmul.f32 -1.442695, %v4150_v24 }
 0x5f0   :  { %3486 = vpow2.f32 %v3019_v40 }
 0x5f3   :  { %v1052_v7 = vpop.f32.mrf.mxu1 }
 0x5f4   :  { %v4153_v29 = vadd.f32 %v3378_v26, %v1052_v7 }
 0x5f6   :  { %v3487_v15 = vpop.eup %3486  ;;  %v3020_v30 = vmul.f32 -1.442695, %v4153_v29 }
 0x5f7   :  { %v1102_v28 = vadd.f32 1.0, %v3487_v15 }
 0x5f8   :  { %3488 = vpow2.f32 %v3020_v30 }
 0x5f9   :  { %3490 = vrcp.f32 %v1102_v28  ;;  %v1121_v36 = vand.u32 2147483648, %v1102_v28  ;;  %v1119_v37 = vand.u32 2147483647, %v1102_v28  ;;  %vm1115_vm7 = vweird.f32 %v1102_v28 }
 0x5fb   :  { %v1122_v38 = vor.u32 1.1754944e-38, %v1121_v36  ;;  %vm1120_vm10 = vcmp.eq.f32.partialorder %v1119_v37, 8.507059e+37 }
 0x5fe   :  { %v3489_v6 = vpop.eup %3488 }
 0x5ff   :  { %v3491_v31 = vpop.eup %3490  ;;  %v1103_v32 = vadd.f32 1.0, %v3489_v6 }
 0x600   :  { %v1111_v16 = vmul.f32 %v3491_v31, %v1102_v28  ;;  %vm1116_vm6 = vweird.f32 %v3491_v31 }
 0x601   :  { %3492 = vrcp.f32 %v1103_v32  ;;  %vm1117_vm8 = vmor %vm1115_vm7, %vm1116_vm6  ;;  %v1136_v23 = vand.u32 2147483648, %v1103_v32  ;;  %v1134_v45 = vand.u32 2147483647, %v1103_v32  ;;  %vm1130_vm12 = vweird.f32 %v1103_v32 }
 0x602   :  { %v1112_v35 = vsub.f32 1.0, %v1111_v16 }
 0x603   :  { %v1137_v50 = vor.u32 1.1754944e-38, %v1136_v23  ;;  %vm1135_vm14 = vcmp.eq.f32.partialorder %v1134_v45, 8.507059e+37 }
 0x604   :  { %v1113_v1 = vmul.f32 %v3491_v31, %v1112_v35 }
 0x606   :  { %v1114_v42 = vadd.f32 %v3491_v31, %v1113_v1 }
 0x607   :  { %v3493_v62 = vpop.eup %3492 }
 0x608   :  { %v1118_v41 = vsel %vm1117_vm8, %v3491_v31, %v1114_v42  ;;  %v1126_v10 = vmul.f32 %v3493_v62, %v1103_v32  ;;  %vm1131_vm11 = vweird.f32 %v3493_v62 }
 0x609   :  { %v1123_v46 = vsel %vm1120_vm10, %v1122_v38, %v1118_v41  ;;  %vm1132_vm13 = vmor %vm1130_vm12, %vm1131_vm11 }
 0x60a   :  { %1238 = vrot.lane.b32.xlu0 %v1123_v46, %s3707_s11  ;;  %v1127_v52 = vsub.f32 1.0, %v1126_v10 }
 0x60c   :  { %v1128_v43 = vmul.f32 %v3493_v62, %v1127_v52  ;;  %v3379_v52 = vld [vmem:[%s4837_s1 + $0x5] ss:$0 sm:$0xff] }
 0x60e   :  { %v1129_v39 = vadd.f32 %v3493_v62, %v1128_v43 }
 0x60f   :  { %v1055_v49 = vpop.f32.mrf.mxu1 }
 0x610   :  { %v4157_v60 = vadd.f32 %v3378_v26, %v1055_v49  ;;  %v1133_v14 = vsel %vm1132_vm13, %v3493_v62, %v1129_v39 }
 0x611   :  { %v1138_v34 = vsel %vm1135_vm14, %v1137_v50, %v1133_v14 }
 0x612   :  { %v3021_v8 = vmul.f32 -1.442695, %v4157_v60  ;;  %1240 = vrot.lane.b32.xlu1 %v1138_v34, %s3707_s11 }
 0x614   :  { %3494 = vpow2.f32 %v3021_v8 }
 0x617   :  { %v1057_v2 = vpop.f32.mrf.mxu1 }
 0x618   :  { %v4161_v57 = vadd.f32 %v3378_v26, %v1057_v2 }
 0x61a   :  { %v3495_v3 = vpop.eup %3494  ;;  %v3022_v9 = vmul.f32 -1.442695, %v4161_v57 }
 0x61b   :  { %v1104_v12 = vadd.f32 1.0, %v3495_v3 }
 0x61c   :  { %3496 = vpow2.f32 %v3022_v9 }
 0x61d   :  { %3498 = vrcp.f32 %v1104_v12  ;;  %v1151_v30 = vand.u32 2147483648, %v1104_v12  ;;  %v1149_v6 = vand.u32 2147483647, %v1104_v12  ;;  %vm1145_vm3 = vweird.f32 %v1104_v12 }
 0x61f   :  { %v1152_v32 = vor.u32 1.1754944e-38, %v1151_v30  ;;  %vm1150_vm6 = vcmp.eq.f32.partialorder %v1149_v6, 8.507059e+37 }
 0x622   :  { %v3497_v13 = vpop.eup %3496 }
 0x623   :  { %v3499_v22 = vpop.eup %3498  ;;  %v1105_v40 = vadd.f32 1.0, %v3497_v13 }
 0x624   :  { %v1141_v7 = vmul.f32 %v3499_v22, %v1104_v12  ;;  %vm1146_vm15 = vweird.f32 %v3499_v22 }
 0x625   :  { %3500 = vrcp.f32 %v1105_v40  ;;  %vm1147_vm4 = vmor %vm1145_vm3, %vm1146_vm15  ;;  %v1166_v37 = vand.u32 2147483648, %v1105_v40  ;;  %v1164_v62 = vand.u32 2147483647, %v1105_v40  ;;  %vm1160_vm8 = vweird.f32 %v1105_v40 }
 0x626   :  { %v1142_v15 = vsub.f32 1.0, %v1141_v7 }
 0x627   :  { %v1167_v41 = vor.u32 1.1754944e-38, %v1166_v37  ;;  %vm1165_vm11 = vcmp.eq.f32.partialorder %v1164_v62, 8.507059e+37 }
 0x628   :  { %v1143_v28 = vmul.f32 %v3499_v22, %v1142_v15 }
 0x62a   :  { %v1144_v31 = vadd.f32 %v3499_v22, %v1143_v28 }
 0x62b   :  { %v3501_v26 = vpop.eup %3500 }
 0x62c   :  { %v1148_v16 = vsel %vm1147_vm4, %v3499_v22, %v1144_v31  ;;  %v1156_v35 = vmul.f32 %v3501_v26, %v1105_v40  ;;  %vm1161_vm7 = vweird.f32 %v3501_v26 }
 0x62d   :  { %v1153_v36 = vsel %vm1150_vm6, %v1152_v32, %v1148_v16  ;;  %vm1162_vm10 = vmor %vm1160_vm8, %vm1161_vm7 }
 0x62e   :  { %1242 = vrot.lane.b32.xlu2 %v1153_v36, %s3707_s11  ;;  %v1157_v1 = vsub.f32 1.0, %v1156_v35 }
 0x630   :  { %v1158_v42 = vmul.f32 %v3501_v26, %v1157_v1 }
 0x632   :  { %v1159_v38 = vadd.f32 %v3501_v26, %v1158_v42 }
 0x634   :  { %v1163_v10 = vsel %vm1162_vm10, %v3501_v26, %v1159_v38 }
 0x635   :  { %v1168_v46 = vsel %vm1165_vm11, %v1167_v41, %v1163_v10 }
 0x636   :  { %1244 = vrot.lane.b32.xlu0 %v1168_v46, %s3707_s11 }
 0x64f   :  { %v1060_v23 = vpop.f32.mrf.mxu1 }
 0x650   :  { %v4169_v43 = vadd.f32 %v3379_v52, %v1060_v23 }
 0x652   :  { %v3023_v45 = vmul.f32 -1.442695, %v4169_v43 }
 0x654   :  { %3502 = vpow2.f32 %v3023_v45 }
 0x657   :  { %v1062_v39 = vpop.f32.mrf.mxu1 }
 0x658   :  { %v4172_v49 = vadd.f32 %v3379_v52, %v1062_v39 }
 0x65a   :  { %v3503_v50 = vpop.eup %3502  ;;  %v3024_v14 = vmul.f32 -1.442695, %v4172_v49 }
 0x65b   :  { %v1106_v34 = vadd.f32 1.0, %v3503_v50 }
 0x65c   :  { %3504 = vpow2.f32 %v3024_v14 }
 0x65d   :  { %3506 = vrcp.f32 %v1106_v34  ;;  %v1181_v15 = vand.u32 2147483648, %v1106_v34  ;;  %v1179_v6 = vand.u32 2147483647, %v1106_v34  ;;  %vm1175_vm13 = vweird.f32 %v1106_v34 }
 0x65f   :  { %v1065_v8 = vpop.f32.mrf.mxu1  ;;  %v1182_v36 = vor.u32 1.1754944e-38, %v1181_v15  ;;  %vm1180_vm15 = vcmp.eq.f32.partialorder %v1179_v6, 8.507059e+37 }
 0x660   :  { %v4175_v2 = vadd.f32 %v3379_v52, %v1065_v8 }
 0x662   :  { %v3505_v3 = vpop.eup %3504  ;;  %v3025_v9 = vmul.f32 -1.442695, %v4175_v2 }
 0x663   :  { %v3507_v12 = vpop.eup %3506  ;;  %v1107_v13 = vadd.f32 1.0, %v3505_v3 }
 0x664   :  { %3508 = vpow2.f32 %v3025_v9  ;;  %v1171_v22 = vmul.f32 %v3507_v12, %v1106_v34  ;;  %vm1176_vm12 = vweird.f32 %v3507_v12 }
 0x665   :  { %3510 = vrcp.f32 %v1107_v13  ;;  %vm1177_vm14 = vmor %vm1175_vm13, %vm1176_vm12  ;;  %v1196_v38 = vand.u32 2147483648, %v1107_v13  ;;  %v1194_v10 = vand.u32 2147483647, %v1107_v13  ;;  %vm1190_vm4 = vweird.f32 %v1107_v13 }
 0x666   :  { %v1172_v40 = vsub.f32 1.0, %v1171_v22 }
 0x667   :  { %v1067_v7 = vpop.f32.mrf.mxu1  ;;  %v1197_v39 = vor.u32 1.1754944e-38, %v1196_v38  ;;  %vm1195_vm7 = vcmp.eq.f32.partialorder %v1194_v10, 8.507059e+37  ;;  %v3204_v10 = vld [vmem:[#allocation2 + $0x28] sm:$0xff] }
 0x668   :  { %v4178_v30 = vadd.f32 %v3379_v52, %v1067_v7  ;;  %v1173_v28 = vmul.f32 %v3507_v12, %v1172_v40  ;;  %1326 = vmatpush.bf16.msrb.mxu3 %v3204_v10 }
 0x66a   :  { %v3509_v31 = vpop.eup %3508  ;;  %v3026_v26 = vmul.f32 -1.442695, %v4178_v30  ;;  %v1174_v32 = vadd.f32 %v3507_v12, %v1173_v28 }
 0x66b   :  { %v3511_v16 = vpop.eup %3510  ;;  %v1108_v35 = vadd.f32 1.0, %v3509_v31 }
 0x66c   :  { %3512 = vpow2.f32 %v3026_v26  ;;  %v1178_v1 = vsel %vm1177_vm14, %v3507_v12, %v1174_v32  ;;  %v1186_v37 = vmul.f32 %v3511_v16, %v1107_v13  ;;  %vm1191_vm3 = vweird.f32 %v3511_v16 }
 0x66d   :  { %3514 = vrcp.f32 %v1108_v35  ;;  %v1183_v42 = vsel %vm1180_vm15, %v1182_v36, %v1178_v1  ;;  %vm1192_vm6 = vmor %vm1190_vm4, %vm1191_vm3  ;;  %v1211_v3 = vand.u32 2147483648, %v1108_v35  ;;  %v1209_v12 = vand.u32 2147483647, %v1108_v35 }
 0x66e   :  { %1246 = vrot.lane.b32.xlu1 %v1183_v42, %s3707_s11  ;;  %v1187_v62 = vsub.f32 1.0, %v1186_v37  ;;  %vm1205_vm10 = vweird.f32 %v1108_v35 }
 0x66f   :  { %v1212_v13 = vor.u32 1.1754944e-38, %v1211_v3  ;;  %vm1210_vm12 = vcmp.eq.f32.partialorder %v1209_v12, 8.507059e+37 }
 0x670   :  { %v1188_v41 = vmul.f32 %v3511_v16, %v1187_v62 }
 0x672   :  { %v3513_v46 = vpop.eup %3512  ;;  %v1189_v52 = vadd.f32 %v3511_v16, %v1188_v41 }
 0x673   :  { %v3515_v23 = vpop.eup %3514  ;;  %v1109_v45 = vadd.f32 1.0, %v3513_v46 }
 0x674   :  { %v1193_v50 = vsel %vm1192_vm6, %v3511_v16, %v1189_v52  ;;  %v1201_v14 = vmul.f32 %v3515_v23, %v1108_v35  ;;  %vm1206_vm8 = vweird.f32 %v3515_v23 }
 0x675   :  { %3516 = vrcp.f32 %v1109_v45  ;;  %v1198_v34 = vsel %vm1195_vm7, %v1197_v39, %v1193_v50  ;;  %vm1207_vm11 = vmor %vm1205_vm10, %vm1206_vm8  ;;  %v1226_v31 = vand.u32 2147483648, %v1109_v45  ;;  %v1224_v32 = vand.u32 2147483647, %v1109_v45 }
 0x676   :  { %1248 = vrot.lane.b32.xlu2 %v1198_v34, %s3707_s11  ;;  %v1202_v8 = vsub.f32 1.0, %v1201_v14  ;;  %3518 = vtanh.f32 %v4150_v24  ;;  %vm1220_vm14 = vweird.f32 %v1109_v45  ;;  %v3203_v34 = vld [vmem:[#allocation2 + $0x20] sm:$0xff] }
 0x677   :  { %3520 = vtanh.f32 %v4153_v29  ;;  %v1227_v1 = vor.u32 1.1754944e-38, %v1226_v31  ;;  %vm1225_vm3 = vcmp.eq.f32.partialorder %v1224_v32, 8.507059e+37  ;;  %1327 = vmatpush.bf16.msrb.mxu3 %v3203_v34  ;;  %v3380_v32 = vld [vmem:[%s4840_s4 + $0x2] ss:$0 sm:$0xff] }
 0x678   :  { %v1203_v9 = vmul.f32 %v3515_v23, %v1202_v8  ;;  %3522 = vtanh.f32 %v4157_v60 }
 0x679   :  { %3524 = vtanh.f32 %v4161_v57 }
 0x67a   :  { %v1204_v22 = vadd.f32 %v3515_v23, %v1203_v9  ;;  %3526 = vtanh.f32 %v4169_v43 }
 0x67b   :  { %v3517_v40 = vpop.eup %3516  ;;  %3528 = vtanh.f32 %v4172_v49 }
 0x67c   :  { %v1208_v7 = vsel %vm1207_vm11, %v3515_v23, %v1204_v22  ;;  %v1216_v15 = vmul.f32 %v3517_v40, %v1109_v45  ;;  %vm1221_vm13 = vweird.f32 %v3517_v40  ;;  %v1239_v16 = vpop.permute.xlu0 %1238  ;;  %v3519_v36 = vpop.eup %3518  ;;  %3530 = vtanh.f32 %v4175_v2 }
 0x67d   :  { %v1213_v28 = vsel %vm1210_vm12, %v1212_v13, %v1208_v7  ;;  %vm1222_vm15 = vmor %vm1220_vm14, %vm1221_vm13  ;;  %v3521_v37 = vpop.eup %3520  ;;  %v1262_v24 = vmul.f32 %v3519_v36, %v1239_v16  ;;  %3532 = vtanh.f32 %v4178_v30 }
 0x67e   :  { %1250 = vrot.lane.b32.xlu1 %v1213_v28, %s3707_s11  ;;  %v1217_v6 = vsub.f32 1.0, %v1216_v15  ;;  %v3523_v52 = vpop.eup %3522 }
 0x67f   :  { %v3525_v23 = vpop.eup %3524 }
 0x680   :  { %v1218_v26 = vmul.f32 %v3517_v40, %v1217_v6  ;;  %v3527_v3 = vpop.eup %3526 }
 0x681   :  { %v3529_v60 = vpop.eup %3528 }
 0x682   :  { %v1219_v35 = vadd.f32 %v3517_v40, %v1218_v26  ;;  %v3531_v13 = vpop.eup %3530 }
 0x683   :  { %v3533_v7 = vpop.eup %3532 }
 0x684   :  { %v1241_v42 = vpop.permute.xlu1 %1240  ;;  %v1223_v62 = vsel %vm1222_vm15, %v3517_v40, %v1219_v35 }
 0x685   :  { %v1263_v38 = vmul.f32 %v3521_v37, %v1241_v42  ;;  %v1228_v29 = vsel %vm1225_vm3, %v1227_v1, %v1223_v62  ;;  %v3208_v62 = vld [vmem:[%s4838_s2 + $0x78] sm:$0xff] }
 0x686   :  { %1252 = vrot.lane.b32.xlu2 %v1228_v29, %s3707_s11  ;;  %1479 = vmatpush.bf16.msrb.mxu0 %v3208_v62 }
 0x687   :  { %v1270_v41 = vpack.c.bf16 %v1263_v38, %v1262_v24 }
 0x688   :  { %v1243_v46 = vpop.permute.xlu2 %1242 }
 0x689   :  { %1288 = vrot.lane.b32.xlu0 %v1270_v41, %s3708_s19  ;;  %v1264_v39 = vmul.f32 %v3523_v52, %v1243_v46  ;;  %v3207_v46 = vld [vmem:[%s4838_s2 + $0x70] sm:$0xff]  ;;  %v3206_v52 = vld [vmem:[%s4838_s2 + $0x68] sm:$0xff] }
 0x68a   :  { %1480 = vmatpush.bf16.msrb.mxu0 %v3207_v46 }
 0x68e   :  { %1481 = vmatpush.bf16.msrb.mxu0 %v3206_v52 }
 0x6a8   :  { %v1245_v45 = vpop.permute.xlu0 %1244 }
 0x6a9   :  { %v1265_v50 = vmul.f32 %v3525_v23, %v1245_v45 }
 0x6ab   :  { %v1271_v14 = vpack.c.bf16 %v1265_v50, %v1264_v39 }
 0x6ad   :  { %1290 = vrot.lane.b32.xlu0 %v1271_v14, %s3708_s19 }
 0x6d0   :  { %v1249_v8 = vpop.permute.xlu2 %1248 }
 0x6d1   :  { %v1267_v57 = vmul.f32 %v3529_v60, %v1249_v8 }
 0x6e0   :  { %v1247_v9 = vpop.permute.xlu1 %1246  ;;  %v1253_v40 = vpop.permute.xlu2 %1252 }
 0x6e1   :  { %v1266_v12 = vmul.f32 %v3527_v3, %v1247_v9  ;;  %v1269_v43 = vmul.f32 %v3533_v7, %v1253_v40 }
 0x6e3   :  { %v1272_v22 = vpack.c.bf16 %v1267_v57, %v1266_v12 }
 0x6e5   :  { %1292 = vrot.lane.b32.xlu1 %v1272_v22, %s3708_s19 }
 0x6f0   :  { %v1251_v15 = vpop.permute.xlu1 %1250 }
 0x6f1   :  { %v1268_v28 = vmul.f32 %v3531_v13, %v1251_v15 }
 0x6f3   :  { %v1273_v49 = vpack.c.bf16 %v1269_v43, %v1268_v28 }
 0x6f5   :  { %1294 = vrot.lane.b32.xlu2 %v1273_v49, %s3708_s19 }
 0x6fb   :  { %v1289_v6 = vpop.permute.xlu0 %1288 }
 0x6fc   :  { %3036 = vmatmul.msk.bf16.vlgmr.msrb.gmra.mxu3 %vm115_vm1, %v1289_v6 }
 0x71f   :  { %v1291_v31 = vpop.permute.xlu0 %1290 }
 0x720   :  { %3037 = vmatmul.msk.bf16.gmra.mxu3 %vm115_vm1, %v1291_v31 }
 0x74f   :  { %v1295_v2 = vpop.permute.xlu2 %1294 }
 0x757   :  { %v1293_v26 = vpop.permute.xlu1 %1292 }
 0x758   :  { %3038 = vmatmul.msk.bf16.gmra.mxu3 %vm115_vm1, %v1293_v26 }
 0x768   :  { %3039 = vmatmul.msk.bf16.gmra.mxu3 %vm115_vm1, %v1295_v2 }
 0x77f   :  { %v1329_v30 = vpop.f32.mrf.mxu3 }
 0x780   :  { %v4204_v16 = vadd.f32 %v3380_v32, %v1329_v30 }
 0x782   :  { %v4210_v1 = vadd.f32 %v4204_v16, %v4056_v47 }
 0x784   :  { %v1371_v40 = vrot.slane %v4210_v1, 7 }
 0x787   :  { %v1331_v35 = vpop.f32.mrf.mxu3 }
 0x788   :  { %v4206_v36 = vadd.f32 %v3380_v32, %v1331_v35 }
 0x78a   :  { %v4214_v37 = vadd.f32 %v4206_v36, %v4060_v48 }
 0x78c   :  { %v3312_v42 = vpack.i.bf16 %v4214_v37, %v4210_v1  ;;  %v1372_v12 = vrot.slane %v4214_v37, 7 }
 0x78e   :  { %3313 = vrot.lane.b32.xlu0 %v3312_v42, %s3707_s11 }
 0x7a3   :  { %v1334_v24 = vpop.f32.mrf.mxu3 }
 0x7a4   :  { %v4222_v38 = vadd.f32 %v3380_v32, %v1334_v24 }
 0x7a6   :  { %v4228_v48 = vadd.f32 %v4222_v38, %v4071_v53 }
 0x7a8   :  { %v1374_v6 = vrot.slane %v4228_v48, 7 }
 0x7ab   :  { %v1336_v29 = vpop.f32.mrf.mxu3 }
 0x7ac   :  { %v4224_v47 = vadd.f32 %v3380_v32, %v1336_v29 }
 0x7ae   :  { %v4232_v41 = vadd.f32 %v4224_v47, %v4075_v59  ;;  %v3205_v59 = vld [vmem:[%s4838_s2 + $0x60] sm:$0xff] }
 0x7af   :  { %1482 = vmatpush.bf16.msrb.mxu0 %v3205_v59 }
 0x7b0   :  { %v3317_v10 = vpack.i.bf16 %v4232_v41, %v4228_v48  ;;  %v1376_v31 = vrot.slane %v4232_v41, 7 }
 0x7b2   :  { %3318 = vrot.lane.b32.xlu1 %v3317_v10, %s3707_s11  ;;  %v1377_v35 = vsel %vm67_vm0, %v1374_v6, %v1376_v31 }
 0x7db   :  { %v1339_v53 = vpop.f32.mrf.mxu3 }
 0x7dc   :  { %v4243_v23 = vadd.f32 %v3380_v32, %v1339_v53 }
 0x7de   :  { %v4252_v50 = vadd.f32 %v4243_v23, %v4095_v63 }
 0x7e0   :  { %v1378_v29 = vrot.slane %v4252_v50, 7 }
 0x7e2   :  { %v1379_v59 = vsel %vm67_vm0, %v1376_v31, %v1378_v29 }
 0x7e3   :  { %v1341_v45 = vpop.f32.mrf.mxu3 }
 0x7e4   :  { %v4248_v39 = vadd.f32 %v3380_v32, %v1341_v45 }
 0x7e6   :  { %v4256_v14 = vadd.f32 %v4248_v39, %v4099_v4 }
 0x7e8   :  { %v3322_v34 = vpack.i.bf16 %v4256_v14, %v4252_v50  ;;  %v1380_v10 = vrot.slane %v4256_v14, 7 }
 0x7ea   :  { %3323 = vrot.lane.b32.xlu2 %v3322_v34, %s3707_s11  ;;  %v1381_v45 = vsel %vm67_vm0, %v1378_v29, %v1380_v10 }
 0x7eb   :  { %v1344_v8 = vpop.f32.mrf.mxu3 }
 0x7ec   :  { %v4261_v3 = vadd.f32 %v3380_v32, %v1344_v8 }
 0x7ee   :  { %v4267_v57 = vadd.f32 %v4261_v3, %v4111_v20  ;;  %v1373_v20 = vsel %vm67_vm0, %v1371_v40, %v1372_v12 }
 0x7f3   :  { %v1346_v60 = vpop.f32.mrf.mxu3 }
 0x7f4   :  { %v4263_v9 = vadd.f32 %v3380_v32, %v1346_v60  ;;  %v1375_v32 = vsel %vm67_vm0, %v1372_v12, %v1374_v6 }
 0x7f6   :  { %v4271_v63 = vadd.f32 %v4263_v9, %v4115_v21 }
 0x7f8   :  { %v3327_v4 = vpack.i.bf16 %v4271_v63, %v4267_v57  ;;  %v1362_v22 = vrot.slane %v4271_v63, 7 }
 0x7fa   :  { %3328 = vrot.lane.b32.xlu0 %v3327_v4, %s3707_s11  ;;  %v1393_v43 = vsel %vm67_vm0, %v1362_v22, %v1371_v40  ;;  %v1382_v4 = vrot.slane %v4267_v57, 7 }
 0x800   :  { %v3314_v13 = vpop.permute.xlu0 %3313 }
 0x801   :  { %v3316_v7 = vunpack.i.h.bf16 %v3314_v13  ;;  %v3315_v15 = vunpack.i.l.bf16 %v3314_v13 }
 0x803   :  { %v1419_v21 = vsel %vm115_vm1, %v1373_v20, %v3316_v7  ;;  %v1418_v28 = vsel %vm115_vm1, %v1393_v43, %v3315_v15  ;;  %v1383_v7 = vsel %vm67_vm0, %v1380_v10, %v1382_v4  ;;  %v1384_v15 = vsel %vm67_vm0, %v1382_v4, %v1362_v22 }
 0x804   :  { %v1426_v49 = vpack.c.bf16 %v1419_v21, %v1418_v28  ;;  %v3381_v28 = vld [vmem:[%s4837_s1 + $0x6] ss:$0 sm:$0xff] }
 0x806   :  { %3064 = vmatmul.msk.bf16.vlgmr.msrb.gmra.mxu0 %vm160_vm2, %v1426_v49 }
 0x824   :  { %v3319_v26 = vpop.permute.xlu1 %3318 }
 0x825   :  { %v3321_v2 = vunpack.i.h.bf16 %v3319_v26  ;;  %v3320_v30 = vunpack.i.l.bf16 %v3319_v26 }
 0x827   :  { %v1420_v42 = vsel %vm115_vm1, %v1375_v32, %v3320_v30  ;;  %v1421_v62 = vsel %vm115_vm1, %v1377_v35, %v3321_v2 }
 0x828   :  { %v1427_v24 = vpack.c.bf16 %v1421_v62, %v1420_v42 }
 0x82a   :  { %3065 = vmatmul.msk.bf16.gmra.mxu0 %vm160_vm2, %v1427_v24 }
 0x844   :  { %v3324_v46 = vpop.permute.xlu2 %3323 }
 0x845   :  { %v3326_v52 = vunpack.i.h.bf16 %v3324_v46  ;;  %v3325_v53 = vunpack.i.l.bf16 %v3324_v46 }
 0x847   :  { %v1422_v34 = vsel %vm115_vm1, %v1379_v59, %v3325_v53  ;;  %v1423_v8 = vsel %vm115_vm1, %v1381_v45, %v3326_v52 }
 0x848   :  { %v1428_v60 = vpack.c.bf16 %v1423_v8, %v1422_v34 }
 0x84a   :  { %3066 = vmatmul.msk.bf16.gmra.mxu0 %vm160_vm2, %v1428_v60 }
 0x86c   :  { %v3329_v12 = vpop.permute.xlu0 %3328 }
 0x86d   :  { %v3331_v40 = vunpack.i.h.bf16 %v3329_v12  ;;  %v3330_v13 = vunpack.i.l.bf16 %v3329_v12 }
 0x86f   :  { %v1424_v20 = vsel %vm115_vm1, %v1383_v7, %v3330_v13  ;;  %v1425_v43 = vsel %vm115_vm1, %v1384_v15, %v3331_v40 }
 0x870   :  { %v1429_v21 = vpack.c.bf16 %v1425_v43, %v1424_v20 }
 0x872   :  { %3067 = vmatmul.msk.bf16.gmra.mxu0 %vm160_vm2, %v1429_v21 }
 0x883   :  { %v1484_v49 = vpop.f32.mrf.mxu0 }
 0x884   :  { %v4307_v6 = vadd.f32 %v3381_v28, %v1484_v49 }
 0x886   :  { %v3068_v31 = vmul.f32 -1.442695, %v4307_v6 }
 0x888   :  { %3534 = vpow2.f32 %v3068_v31 }
 0x88b   :  { %v1486_v26 = vpop.f32.mrf.mxu0 }
 0x88c   :  { %v4310_v2 = vadd.f32 %v3381_v28, %v1486_v26 }
 0x88e   :  { %v3535_v22 = vpop.eup %3534  ;;  %v3069_v30 = vmul.f32 -1.442695, %v4310_v2 }
 0x88f   :  { %v1536_v32 = vadd.f32 1.0, %v3535_v22 }
 0x890   :  { %3536 = vpow2.f32 %v3069_v30 }
 0x891   :  { %3538 = vrcp.f32 %v1536_v32  ;;  %v1555_v10 = vand.u32 2147483648, %v1536_v32  ;;  %v1553_v52 = vand.u32 2147483647, %v1536_v32  ;;  %vm1549_vm4 = vweird.f32 %v1536_v32 }
 0x893   :  { %v1556_v45 = vor.u32 1.1754944e-38, %v1555_v10  ;;  %vm1554_vm7 = vcmp.eq.f32.partialorder %v1553_v52, 8.507059e+37 }
 0x896   :  { %v3537_v35 = vpop.eup %3536 }
 0x897   :  { %v3539_v42 = vpop.eup %3538  ;;  %v1537_v62 = vadd.f32 1.0, %v3537_v35 }
 0x898   :  { %v1545_v24 = vmul.f32 %v3539_v42, %v1536_v32  ;;  %vm1550_vm0 = vweird.f32 %v3539_v42 }
 0x899   :  { %3540 = vrcp.f32 %v1537_v62  ;;  %vm1551_vm6 = vmor %vm1549_vm4, %vm1550_vm0  ;;  %v1570_v12 = vand.u32 2147483648, %v1537_v62  ;;  %v1568_v13 = vand.u32 2147483647, %v1537_v62  ;;  %vm1564_vm10 = vweird.f32 %v1537_v62 }
 0x89a   :  { %v1546_v29 = vsub.f32 1.0, %v1545_v24 }
 0x89b   :  { %v1571_v20 = vor.u32 1.1754944e-38, %v1570_v12  ;;  %vm1569_vm12 = vcmp.eq.f32.partialorder %v1568_v13, 8.507059e+37 }
 0x89c   :  { %v1547_v46 = vmul.f32 %v3539_v42, %v1546_v29 }
 0x89e   :  { %v1548_v53 = vadd.f32 %v3539_v42, %v1547_v46 }
 0x89f   :  { %v3541_v59 = vpop.eup %3540 }
 0x8a0   :  { %v1552_v34 = vsel %vm1551_vm6, %v3539_v42, %v1548_v53  ;;  %v1560_v8 = vmul.f32 %v3541_v59, %v1537_v62  ;;  %vm1565_vm8 = vweird.f32 %v3541_v59 }
 0x8a1   :  { %v1557_v60 = vsel %vm1554_vm7, %v1556_v45, %v1552_v34  ;;  %vm1566_vm11 = vmor %vm1564_vm10, %vm1565_vm8 }
 0x8a2   :  { %1672 = vrot.lane.b32.xlu1 %v1557_v60, %s3707_s11  ;;  %v1561_v4 = vsub.f32 1.0, %v1560_v8  ;;  %v4324_v8 = vld [vmem:[%s4837_s1 + $0x7] ss:$0 sm:$0xff] }
 0x8a4   :  { %v1562_v40 = vmul.f32 %v3541_v59, %v1561_v4 }
 0x8a6   :  { %v1563_v7 = vadd.f32 %v3541_v59, %v1562_v40 }
 0x8a7   :  { %v1489_v15 = vpop.f32.mrf.mxu0 }
 0x8a8   :  { %v4314_v43 = vadd.f32 %v3381_v28, %v1489_v15  ;;  %v1567_v21 = vsel %vm1566_vm11, %v3541_v59, %v1563_v7 }
 0x8a9   :  { %v1572_v49 = vsel %vm1569_vm12, %v1571_v20, %v1567_v21 }
 0x8aa   :  { %v3070_v31 = vmul.f32 -1.442695, %v4314_v43  ;;  %1674 = vrot.lane.b32.xlu2 %v1572_v49, %s3707_s11 }
 0x8ac   :  { %3542 = vpow2.f32 %v3070_v31 }
 0x8af   :  { %v1491_v26 = vpop.f32.mrf.mxu0 }
 0x8b0   :  { %v4318_v22 = vadd.f32 %v3381_v28, %v1491_v26 }
 0x8b2   :  { %v3543_v30 = vpop.eup %3542  ;;  %v3071_v32 = vmul.f32 -1.442695, %v4318_v22 }
 0x8b3   :  { %v1538_v35 = vadd.f32 1.0, %v3543_v30 }
 0x8b4   :  { %3544 = vpow2.f32 %v3071_v32 }
 0x8b5   :  { %3546 = vrcp.f32 %v1538_v35  ;;  %v1585_v46 = vand.u32 2147483648, %v1538_v35  ;;  %v1583_v53 = vand.u32 2147483647, %v1538_v35  ;;  %vm1579_vm14 = vweird.f32 %v1538_v35 }
 0x8b7   :  { %v1586_v45 = vor.u32 1.1754944e-38, %v1585_v46  ;;  %vm1584_vm3 = vcmp.eq.f32.partialorder %v1583_v53, 8.507059e+37 }
 0x8ba   :  { %v3545_v42 = vpop.eup %3544 }
 0x8bb   :  { %v3547_v62 = vpop.eup %3546  ;;  %v1539_v24 = vadd.f32 1.0, %v3545_v42 }
 0x8bc   :  { %v1575_v29 = vmul.f32 %v3547_v62, %v1538_v35  ;;  %vm1580_vm13 = vweird.f32 %v3547_v62 }
 0x8bd   :  { %3548 = vrcp.f32 %v1539_v24  ;;  %vm1581_vm15 = vmor %vm1579_vm14, %vm1580_vm13  ;;  %v1600_v13 = vand.u32 2147483648, %v1539_v24  ;;  %v1598_v20 = vand.u32 2147483647, %v1539_v24  ;;  %vm1594_vm4 = vweird.f32 %v1539_v24 }
 0x8be   :  { %v1576_v10 = vsub.f32 1.0, %v1575_v29 }
 0x8bf   :  { %v1601_v31 = vor.u32 1.1754944e-38, %v1600_v13  ;;  %vm1599_vm7 = vcmp.eq.f32.partialorder %v1598_v20, 8.507059e+37 }
 0x8c0   :  { %v1577_v52 = vmul.f32 %v3547_v62, %v1576_v10 }
 0x8c2   :  { %v1578_v59 = vadd.f32 %v3547_v62, %v1577_v52 }
 0x8c3   :  { %v3549_v28 = vpop.eup %3548 }
 0x8c4   :  { %v1582_v34 = vsel %vm1581_vm15, %v3547_v62, %v1578_v59  ;;  %v1590_v60 = vmul.f32 %v3549_v28, %v1539_v24  ;;  %vm1595_vm0 = vweird.f32 %v3549_v28 }
 0x8c5   :  { %v1587_v4 = vsel %vm1584_vm3, %v1586_v45, %v1582_v34  ;;  %vm1596_vm6 = vmor %vm1594_vm4, %vm1595_vm0 }
 0x8c6   :  { %1676 = vrot.lane.b32.xlu0 %v1587_v4, %s3707_s11  ;;  %v1591_v12 = vsub.f32 1.0, %v1590_v60 }
 0x8c7   :  { %v1494_v40 = vpop.f32.mrf.mxu0 }
 0x8c8   :  { %v4328_v7 = vadd.f32 %v4324_v8, %v1494_v40  ;;  %v1592_v15 = vmul.f32 %v3549_v28, %v1591_v12 }
 0x8ca   :  { %v3072_v21 = vmul.f32 -1.442695, %v4328_v7  ;;  %v1593_v49 = vadd.f32 %v3549_v28, %v1592_v15 }
 0x8cc   :  { %3550 = vpow2.f32 %v3072_v21  ;;  %v1597_v26 = vsel %vm1596_vm6, %v3549_v28, %v1593_v49 }
 0x8cd   :  { %v1602_v30 = vsel %vm1599_vm7, %v1601_v31, %v1597_v26 }
 0x8ce   :  { %1678 = vrot.lane.b32.xlu1 %v1602_v30, %s3707_s11 }
 0x8cf   :  { %v1496_v32 = vpop.f32.mrf.mxu0 }
 0x8d0   :  { %v4333_v35 = vadd.f32 %v4324_v8, %v1496_v32 }
 0x8d2   :  { %v3551_v42 = vpop.eup %3550  ;;  %v3073_v62 = vmul.f32 -1.442695, %v4333_v35 }
 0x8d3   :  { %v1540_v29 = vadd.f32 1.0, %v3551_v42 }
 0x8d4   :  { %3552 = vpow2.f32 %v3073_v62 }
 0x8d5   :  { %3554 = vrcp.f32 %v1540_v29  ;;  %v1615_v59 = vand.u32 2147483648, %v1540_v29  ;;  %v1613_v45 = vand.u32 2147483647, %v1540_v29  ;;  %vm1609_vm10 = vweird.f32 %v1540_v29 }
 0x8d7   :  { %v1616_v4 = vor.u32 1.1754944e-38, %v1615_v59  ;;  %vm1614_vm12 = vcmp.eq.f32.partialorder %v1613_v45, 8.507059e+37 }
 0x8da   :  { %v3553_v10 = vpop.eup %3552 }
 0x8db   :  { %v3555_v24 = vpop.eup %3554  ;;  %v1541_v46 = vadd.f32 1.0, %v3553_v10 }
 0x8dc   :  { %v1605_v52 = vmul.f32 %v3555_v24, %v1540_v29  ;;  %vm1610_vm8 = vweird.f32 %v3555_v24 }
 0x8dd   :  { %3556 = vrcp.f32 %v1541_v46  ;;  %vm1611_vm11 = vmor %vm1609_vm10, %vm1610_vm8  ;;  %v1630_v20 = vand.u32 2147483648, %v1541_v46  ;;  %v1628_v49 = vand.u32 2147483647, %v1541_v46  ;;  %vm1624_vm14 = vweird.f32 %v1541_v46 }
 0x8de   :  { %v1606_v53 = vsub.f32 1.0, %v1605_v52 }
 0x8df   :  { %v1631_v26 = vor.u32 1.1754944e-38, %v1630_v20  ;;  %vm1629_vm3 = vcmp.eq.f32.partialorder %v1628_v49, 8.507059e+37 }
 0x8e0   :  { %v1607_v28 = vmul.f32 %v3555_v24, %v1606_v53 }
 0x8e2   :  { %v1608_v34 = vadd.f32 %v3555_v24, %v1607_v28 }
 0x8e3   :  { %v3557_v60 = vpop.eup %3556 }
 0x8e4   :  { %v1612_v12 = vsel %vm1611_vm11, %v3555_v24, %v1608_v34  ;;  %v1620_v40 = vmul.f32 %v3557_v60, %v1541_v46  ;;  %vm1625_vm13 = vweird.f32 %v3557_v60 }
 0x8e5   :  { %v1617_v13 = vsel %vm1614_vm12, %v1616_v4, %v1612_v12  ;;  %vm1626_vm15 = vmor %vm1624_vm14, %vm1625_vm13 }
 0x8e6   :  { %1680 = vrot.lane.b32.xlu2 %v1617_v13, %s3707_s11  ;;  %v1621_v15 = vsub.f32 1.0, %v1620_v40 }
 0x8e8   :  { %v1622_v21 = vmul.f32 %v3557_v60, %v1621_v15 }
 0x8ea   :  { %v1623_v31 = vadd.f32 %v3557_v60, %v1622_v21 }
 0x8ec   :  { %v1627_v30 = vsel %vm1626_vm15, %v3557_v60, %v1623_v31 }
 0x8ed   :  { %v1632_v32 = vsel %vm1629_vm3, %v1631_v26, %v1627_v30 }
 0x8ee   :  { %1682 = vrot.lane.b32.xlu0 %v1632_v32, %s3707_s11 }
 0x8ef   :  { %v1499_v42 = vpop.f32.mrf.mxu0 }
 0x8f0   :  { %v4339_v62 = vadd.f32 %v4324_v8, %v1499_v42 }
 0x8f2   :  { %v3074_v29 = vmul.f32 -1.442695, %v4339_v62 }
 0x8f4   :  { %3558 = vpow2.f32 %v3074_v29 }
 0x8f7   :  { %v1501_v10 = vpop.f32.mrf.mxu0 }
 0x8f8   :  { %v4343_v24 = vadd.f32 %v4324_v8, %v1501_v10 }
 0x8fa   :  { %v3559_v52 = vpop.eup %3558  ;;  %v3075_v46 = vmul.f32 -1.442695, %v4343_v24 }
 0x8fb   :  { %v1542_v53 = vadd.f32 1.0, %v3559_v52 }
 0x8fc   :  { %3560 = vpow2.f32 %v3075_v46 }
 0x8fd   :  { %3562 = vrcp.f32 %v1542_v53  ;;  %v1645_v4 = vand.u32 2147483648, %v1542_v53  ;;  %v1643_v40 = vand.u32 2147483647, %v1542_v53  ;;  %vm1639_vm4 = vweird.f32 %v1542_v53 }
 0x8ff   :  { %v1646_v15 = vor.u32 1.1754944e-38, %v1645_v4  ;;  %vm1644_vm7 = vcmp.eq.f32.partialorder %v1643_v40, 8.507059e+37 }
 0x902   :  { %v3561_v59 = vpop.eup %3560 }
 0x903   :  { %v3563_v28 = vpop.eup %3562  ;;  %v1543_v45 = vadd.f32 1.0, %v3561_v59 }
 0x904   :  { %v1635_v34 = vmul.f32 %v3563_v28, %v1542_v53  ;;  %vm1640_vm0 = vweird.f32 %v3563_v28  ;;  %v1675_v42 = vpop.permute.xlu2 %1674 }
 0x905   :  { %3564 = vrcp.f32 %v1543_v45  ;;  %vm1641_vm6 = vmor %vm1639_vm4, %vm1640_vm0  ;;  %v1660_v26 = vand.u32 2147483648, %v1543_v45  ;;  %v1658_v32 = vand.u32 2147483647, %v1543_v45  ;;  %vm1654_vm10 = vweird.f32 %v1543_v45 }
 0x906   :  { %v1636_v60 = vsub.f32 1.0, %v1635_v34  ;;  %3566 = vtanh.f32 %v4307_v6 }
 0x907   :  { %3568 = vtanh.f32 %v4310_v2  ;;  %v1661_v52 = vor.u32 1.1754944e-38, %v1660_v26  ;;  %vm1659_vm12 = vcmp.eq.f32.partialorder %v1658_v32, 8.507059e+37 }
 0x908   :  { %v1637_v12 = vmul.f32 %v3563_v28, %v1636_v60  ;;  %3570 = vtanh.f32 %v4314_v43 }
 0x909   :  { %3572 = vtanh.f32 %v4318_v22 }
 0x90a   :  { %v1638_v13 = vadd.f32 %v3563_v28, %v1637_v12  ;;  %3574 = vtanh.f32 %v4328_v7 }
 0x90b   :  { %v3565_v8 = vpop.eup %3564  ;;  %3576 = vtanh.f32 %v4333_v35 }
 0x90c   :  { %v1642_v20 = vsel %vm1641_vm6, %v3563_v28, %v1638_v13  ;;  %v1650_v21 = vmul.f32 %v3565_v8, %v1543_v45  ;;  %vm1655_vm8 = vweird.f32 %v3565_v8  ;;  %v3567_v10 = vpop.eup %3566  ;;  %3578 = vtanh.f32 %v4339_v62 }
 0x90d   :  { %v1647_v49 = vsel %vm1644_vm7, %v1646_v15, %v1642_v20  ;;  %vm1656_vm11 = vmor %vm1654_vm10, %vm1655_vm8  ;;  %v3569_v46 = vpop.eup %3568  ;;  %v3210_v15 = vld [vmem:[#allocation2 + $0x38] sm:$0xff]  ;;  %v3209_v20 = vld [vmem:[#allocation2 + $0x30] sm:$0xff]  ;;  %3580 = vtanh.f32 %v4343_v24 }
 0x90e   :  { %1684 = vrot.lane.b32.xlu2 %v1647_v49, %s3707_s11  ;;  %v1651_v31 = vsub.f32 1.0, %v1650_v21  ;;  %v1697_v6 = vmul.f32 %v3569_v46, %v1675_v42  ;;  %v3571_v60 = vpop.eup %3570  ;;  %1760 = vmatpush.bf16.msrb.mxu2 %v3210_v15 }
 0x90f   :  { %v3573_v4 = vpop.eup %3572 }
 0x910   :  { %v1652_v30 = vmul.f32 %v3565_v8, %v1651_v31  ;;  %v3575_v21 = vpop.eup %3574 }
 0x911   :  { %v3577_v22 = vpop.eup %3576 }
 0x912   :  { %v1653_v29 = vadd.f32 %v3565_v8, %v1652_v30  ;;  %1761 = vmatpush.bf16.msrb.mxu2 %v3209_v20  ;;  %v3579_v42 = vpop.eup %3578 }
 0x914   :  { %v1673_v53 = vpop.permute.xlu1 %1672  ;;  %v1657_v59 = vsel %vm1656_vm11, %v3565_v8, %v1653_v29  ;;  %v3581_v29 = vpop.eup %3580 }
 0x915   :  { %v1696_v28 = vmul.f32 %v3567_v10, %v1673_v53  ;;  %v1662_v2 = vsel %vm1659_vm12, %v1661_v52, %v1657_v59 }
 0x916   :  { %1686 = vrot.lane.b32.xlu0 %v1662_v2, %s3707_s11 }
 0x917   :  { %v1704_v34 = vpack.c.bf16 %v1697_v6, %v1696_v28  ;;  %v3383_v6 = vld [vmem:[%s4840_s4 + $0x3] ss:$0 sm:$0xff] }
 0x919   :  { %1722 = vrot.lane.b32.xlu1 %v1704_v34, %s3708_s19 }
 0x938   :  { %v1677_v45 = vpop.permute.xlu0 %1676 }
 0x939   :  { %v1698_v40 = vmul.f32 %v3571_v60, %v1677_v45 }
 0x940   :  { %v1679_v12 = vpop.permute.xlu1 %1678  ;;  %v1681_v43 = vpop.permute.xlu2 %1680 }
 0x941   :  { %v1699_v13 = vmul.f32 %v3573_v4, %v1679_v12  ;;  %v1700_v31 = vmul.f32 %v3575_v21, %v1681_v43  ;;  %v3214_v12 = vld [vmem:[%s4838_s2 + $0x98] sm:$0xff] }
 0x942   :  { %1913 = vmatpush.bf16.msra.mxu1 %v3214_v12 }
 0x943   :  { %v1705_v8 = vpack.c.bf16 %v1699_v13, %v1698_v40 }
 0x945   :  { %1724 = vrot.lane.b32.xlu1 %v1705_v8, %s3708_s19 }
 0x960   :  { %v1683_v49 = vpop.permute.xlu0 %1682 }
 0x961   :  { %v1701_v26 = vmul.f32 %v3577_v22, %v1683_v49 }
 0x963   :  { %v1706_v30 = vpack.c.bf16 %v1701_v26, %v1700_v31 }
 0x965   :  { %1726 = vrot.lane.b32.xlu2 %v1706_v30, %s3708_s19  ;;  %v3212_v30 = vld [vmem:[%s4838_s2 + $0x88] sm:$0xff] }
 0x968   :  { %v1685_v32 = vpop.permute.xlu2 %1684 }
 0x969   :  { %v1702_v7 = vmul.f32 %v3579_v42, %v1685_v32  ;;  %v3211_v32 = vld [vmem:[%s4838_s2 + $0x80] sm:$0xff] }
 0x988   :  { %v1687_v10 = vpop.permute.xlu0 %1686 }
 0x989   :  { %v1703_v52 = vmul.f32 %v3581_v29, %v1687_v10 }
 0x98b   :  { %v1707_v35 = vpack.c.bf16 %v1703_v52, %v1702_v7  ;;  %v1723_v46 = vpop.permute.xlu1 %1722 }
 0x98c   :  { %3085 = vmatmul.msk.bf16.vlgmr.msrb.gmra.mxu2 %vm115_vm1, %v1723_v46 }
 0x98d   :  { %1728 = vrot.lane.b32.xlu0 %v1707_v35, %s3708_s19 }
 0x9b7   :  { %v1725_v53 = vpop.permute.xlu1 %1724 }
 0x9b8   :  { %3086 = vmatmul.msk.bf16.gmra.mxu2 %vm115_vm1, %v1725_v53 }
 0x9bf   :  { %v1727_v59 = vpop.permute.xlu2 %1726 }
 0x9c8   :  { %3087 = vmatmul.msk.bf16.gmra.mxu2 %vm115_vm1, %v1727_v59 }
 0x9ff   :  { %v1729_v62 = vpop.permute.xlu0 %1728 }
 0xa00   :  { %3088 = vmatmul.msk.bf16.gmra.mxu2 %vm115_vm1, %v1729_v62 }
 0xa0f   :  { %v1763_v24 = vpop.f32.mrf.mxu2 }
 0xa10   :  { %v4367_v28 = vadd.f32 %v3383_v6, %v1763_v24 }
 0xa12   :  { %v4373_v45 = vadd.f32 %v4367_v28, %v4210_v1  ;;  %v3213_v1 = vld [vmem:[%s4838_s2 + $0x90] sm:$0xff] }
 0xa13   :  { %1914 = vmatpush.bf16.msra.mxu1 %v3213_v1 }
 0xa14   :  { %v1805_v35 = vrot.slane %v4373_v45, 6 }
 0xa17   :  { %v1765_v2 = vpop.f32.mrf.mxu2  ;;  %1915 = vmatpush.bf16.msra.mxu1 %v3212_v30 }
 0xa18   :  { %v4369_v34 = vadd.f32 %v3383_v6, %v1765_v2 }
 0xa1a   :  { %v4377_v60 = vadd.f32 %v4369_v34, %v4214_v37 }
 0xa1b   :  { %1916 = vmatpush.bf16.msra.mxu1 %v3211_v32 }
 0xa1c   :  { %v3332_v4 = vpack.i.bf16 %v4377_v60, %v4373_v45  ;;  %v1806_v10 = vrot.slane %v4377_v60, 6 }
 0xa1e   :  { %3333 = vrot.lane.b32.xlu1 %v3332_v4, %s3707_s11 }
 0xa3b   :  { %v1768_v40 = vpop.f32.mrf.mxu2 }
 0xa3c   :  { %v4388_v13 = vadd.f32 %v3383_v6, %v1768_v40 }
 0xa3e   :  { %v4394_v15 = vadd.f32 %v4388_v13, %v4228_v48 }
 0xa40   :  { %v1808_v12 = vrot.slane %v4394_v15, 6 }
 0xa43   :  { %v1770_v37 = vpop.f32.mrf.mxu2 }
 0xa44   :  { %v4390_v8 = vadd.f32 %v3383_v6, %v1770_v37 }
 0xa46   :  { %v4398_v20 = vadd.f32 %v4390_v8, %v4232_v41 }
 0xa48   :  { %v3337_v43 = vpack.i.bf16 %v4398_v20, %v4394_v15  ;;  %v1810_v40 = vrot.slane %v4398_v20, 6 }
 0xa4a   :  { %3338 = vrot.lane.b32.xlu2 %v3337_v43, %s3707_s11 }
 0xa4b   :  { %v1773_v21 = vpop.f32.mrf.mxu2 }
 0xa4c   :  { %v4403_v22 = vadd.f32 %v3383_v6, %v1773_v21  ;;  %v1809_v21 = vsel %vm501_vm9, %v1806_v10, %v1808_v12 }
 0xa4e   :  { %v4409_v26 = vadd.f32 %v4403_v22, %v4252_v50 }
 0xa53   :  { %v1775_v49 = vpop.f32.mrf.mxu2 }
 0xa54   :  { %v4405_v31 = vadd.f32 %v3383_v6, %v1775_v49  ;;  %v1811_v49 = vsel %vm501_vm9, %v1808_v12, %v1810_v40 }
 0xa56   :  { %4844 = vst [vmem:[#allocation5_spill] sm:$0xff] %v4405_v31  ;;  %v4413_v48 = vadd.f32 %v4405_v31, %v4256_v14 }
 0xa58   :  { %v3342_v41 = vpack.i.bf16 %v4413_v48, %v4409_v26 }
 0xa5a   :  { %3343 = vrot.lane.b32.xlu0 %v3342_v41, %s3707_s11 }
 0xa83   :  { %v1778_v50 = vpop.f32.mrf.mxu2 }
 0xa84   :  { %v4424_v42 = vadd.f32 %v3383_v6, %v1778_v50  ;;  %v1812_v50 = vrot.slane %v4409_v26, 6 }
 0xa86   :  { %v4431_v7 = vadd.f32 %v4424_v42, %v4267_v57 }
 0xa8b   :  { %v1780_v14 = vpop.f32.mrf.mxu2 }
 0xa8c   :  { %v4426_v29 = vadd.f32 %v3383_v6, %v1780_v14  ;;  %v1807_v6 = vsel %vm501_vm9, %v1805_v35, %v1806_v10  ;;  %v1814_v14 = vrot.slane %v4413_v48, 6 }
 0xa8e   :  { %v4435_v52 = vadd.f32 %v4426_v29, %v4271_v63  ;;  %v1815_v10 = vsel %vm501_vm9, %v1812_v50, %v1814_v14 }
 0xa90   :  { %v1796_v46 = vrot.slane %v4435_v52, 6  ;;  %v3334_v53 = vpop.permute.xlu1 %3333  ;;  %v3347_v59 = vpack.i.bf16 %v4435_v52, %v4431_v7 }
 0xa91   :  { %v3336_v62 = vunpack.i.h.bf16 %v3334_v53  ;;  %v3335_v24 = vunpack.i.l.bf16 %v3334_v53 }
 0xa92   :  { %v1827_v2 = vsel %vm501_vm9, %v1796_v46, %v1805_v35  ;;  %3348 = vrot.lane.b32.xlu1 %v3347_v59, %s3707_s11 }
 0xa93   :  { %v1853_v57 = vsel %vm115_vm1, %v1807_v6, %v3336_v62  ;;  %v1852_v63 = vsel %vm115_vm1, %v1827_v2, %v3335_v24  ;;  %v1813_v62 = vsel %vm501_vm9, %v1810_v40, %v1812_v50 }
 0xa94   :  { %v1860_v4 = vpack.c.bf16 %v1853_v57, %v1852_v63  ;;  %v1816_v57 = vrot.slane %v4431_v7, 6 }
 0xa96   :  { %3113 = vmatmul.msk.bf16.vlgmr.msra.gmra.mxu1 %vm160_vm2, %v1860_v4 }
 0xaa4   :  { %v3339_v1 = vpop.permute.xlu2 %3338 }
 0xaa5   :  { %v3341_v37 = vunpack.i.h.bf16 %v3339_v1  ;;  %v3340_v43 = vunpack.i.l.bf16 %v3339_v1  ;;  %v1817_v1 = vsel %vm501_vm9, %v1814_v14, %v1816_v57 }
 0xaa7   :  { %v1854_v41 = vsel %vm115_vm1, %v1809_v21, %v3340_v43  ;;  %v1855_v30 = vsel %vm115_vm1, %v1811_v49, %v3341_v37  ;;  %v1818_v37 = vsel %vm501_vm9, %v1816_v57, %v1796_v46  ;;  %v3384_v49 = vld [vmem:[%s4837_s1 + $0x8] ss:$0 sm:$0xff] }
 0xaa8   :  { %v1861_v32 = vpack.c.bf16 %v1855_v30, %v1854_v41 }
 0xaaa   :  { %3114 = vmatmul.msk.bf16.gmra.mxu1 %vm160_vm2, %v1861_v32 }
 0xacc   :  { %v3344_v35 = vpop.permute.xlu0 %3343 }
 0xacd   :  { %v3346_v53 = vunpack.i.h.bf16 %v3344_v35  ;;  %v3345_v59 = vunpack.i.l.bf16 %v3344_v35 }
 0xacf   :  { %v1856_v24 = vsel %vm115_vm1, %v1813_v62, %v3345_v59  ;;  %v1857_v6 = vsel %vm115_vm1, %v1815_v10, %v3346_v53 }
 0xad0   :  { %v1862_v2 = vpack.c.bf16 %v1857_v6, %v1856_v24 }
 0xad2   :  { %3115 = vmatmul.msk.bf16.gmra.mxu1 %vm160_vm2, %v1862_v2 }
 0xb04   :  { %v3349_v63 = vpop.permute.xlu1 %3348 }
 0xb05   :  { %v3351_v4 = vunpack.i.h.bf16 %v3349_v63  ;;  %v3350_v12 = vunpack.i.l.bf16 %v3349_v63 }
 0xb07   :  { %v1858_v40 = vsel %vm115_vm1, %v1817_v1, %v3350_v12  ;;  %v1859_v43 = vsel %vm115_vm1, %v1818_v37, %v3351_v4 }
 0xb08   :  { %v1863_v21 = vpack.c.bf16 %v1859_v43, %v1858_v40 }
 0xb0a   :  { %3116 = vmatmul.msk.bf16.gmra.mxu1 %vm160_vm2, %v1863_v21 }
 0xb13   :  { %v1918_v41 = vpop.f32.mrf.mxu1 }
 0xb14   :  { %v4470_v30 = vadd.f32 %v3384_v49, %v1918_v41 }
 0xb16   :  { %v3117_v32 = vmul.f32 -1.442695, %v4470_v30 }
 0xb18   :  { %3582 = vpow2.f32 %v3117_v32 }
 0xb1b   :  { %v1920_v50 = vpop.f32.mrf.mxu1 }
 0xb1c   :  { %v4473_v14 = vadd.f32 %v3384_v49, %v1920_v50 }
 0xb1e   :  { %v3583_v46 = vpop.eup %3582  ;;  %v3118_v35 = vmul.f32 -1.442695, %v4473_v14 }
 0xb1f   :  { %v1970_v53 = vadd.f32 1.0, %v3583_v46 }
 0xb20   :  { %3584 = vpow2.f32 %v3118_v35 }
 0xb21   :  { %3586 = vrcp.f32 %v1970_v53  ;;  %v1989_v4 = vand.u32 2147483648, %v1970_v53  ;;  %v1987_v1 = vand.u32 2147483647, %v1970_v53  ;;  %vm1983_vm13 = vweird.f32 %v1970_v53 }
 0xb23   :  { %v1990_v21 = vor.u32 1.1754944e-38, %v1989_v4  ;;  %vm1988_vm15 = vcmp.eq.f32.partialorder %v1987_v1, 8.507059e+37 }
 0xb26   :  { %v3585_v59 = vpop.eup %3584 }
 0xb27   :  { %v3587_v62 = vpop.eup %3586  ;;  %v1971_v10 = vadd.f32 1.0, %v3585_v59  ;;  %v1923_v24 = vpop.f32.mrf.mxu1 }
 0xb28   :  { %v4476_v6 = vadd.f32 %v3384_v49, %v1923_v24  ;;  %v1979_v2 = vmul.f32 %v3587_v62, %v1970_v53  ;;  %vm1984_vm9 = vweird.f32 %v3587_v62 }
 0xb29   :  { %3588 = vrcp.f32 %v1971_v10  ;;  %vm1985_vm14 = vmor %vm1983_vm13, %vm1984_vm9  ;;  %vm1998_vm0 = vweird.f32 %v1971_v10 }
 0xb2a   :  { %v3119_v57 = vmul.f32 -1.442695, %v4476_v6  ;;  %v1980_v63 = vsub.f32 1.0, %v1979_v2 }
 0xb2c   :  { %3590 = vpow2.f32 %v3119_v57  ;;  %v1981_v12 = vmul.f32 %v3587_v62, %v1980_v63  ;;  %v2004_v57 = vand.u32 2147483648, %v1971_v10  ;;  %v2002_v63 = vand.u32 2147483647, %v1971_v10 }
 0xb2e   :  { %v1982_v37 = vadd.f32 %v3587_v62, %v1981_v12  ;;  %vm2003_vm6 = vcmp.eq.f32.partialorder %v2002_v63, 8.507059e+37 }
 0xb2f   :  { %v3589_v40 = vpop.eup %3588  ;;  %v1925_v43 = vpop.f32.mrf.mxu1 }
 0xb30   :  { %v4479_v41 = vadd.f32 %v3384_v49, %v1925_v43  ;;  %v1986_v32 = vsel %vm1985_vm14, %v3587_v62, %v1982_v37  ;;  %v1994_v50 = vmul.f32 %v3589_v40, %v1971_v10  ;;  %vm1999_vm3 = vweird.f32 %v3589_v40 }
 0xb31   :  { %v1991_v46 = vsel %vm1988_vm15, %v1990_v21, %v1986_v32  ;;  %vm2000_vm4 = vmor %vm1998_vm0, %vm1999_vm3  ;;  %v2005_v49 = vor.u32 1.1754944e-38, %v2004_v57 }
 0xb32   :  { %v3591_v35 = vpop.eup %3590  ;;  %v3120_v59 = vmul.f32 -1.442695, %v4479_v41  ;;  %2106 = vrot.lane.b32.xlu2 %v1991_v46, %s3707_s11  ;;  %v1995_v24 = vsub.f32 1.0, %v1994_v50 }
 0xb33   :  { %v1972_v2 = vadd.f32 1.0, %v3591_v35 }
 0xb34   :  { %3592 = vpow2.f32 %v3120_v59  ;;  %v1996_v53 = vmul.f32 %v3589_v40, %v1995_v24 }
 0xb35   :  { %3594 = vrcp.f32 %v1972_v2  ;;  %v2019_v50 = vand.u32 2147483648, %v1972_v2  ;;  %v2017_v35 = vand.u32 2147483647, %v1972_v2  ;;  %vm2013_vm8 = vweird.f32 %v1972_v2 }
 0xb36   :  { %v1997_v4 = vadd.f32 %v3589_v40, %v1996_v53 }
 0xb37   :  { %v2020_v24 = vor.u32 1.1754944e-38, %v2019_v50  ;;  %vm2018_vm11 = vcmp.eq.f32.partialorder %v2017_v35, 8.507059e+37 }
 0xb38   :  { %v2001_v62 = vsel %vm2000_vm4, %v3589_v40, %v1997_v4 }
 0xb39   :  { %v2006_v12 = vsel %vm2003_vm6, %v2005_v49, %v2001_v62 }
 0xb3a   :  { %v3593_v1 = vpop.eup %3592  ;;  %2108 = vrot.lane.b32.xlu0 %v2006_v12, %s3707_s11 }
 0xb3b   :  { %v3595_v37 = vpop.eup %3594  ;;  %v1973_v43 = vadd.f32 1.0, %v3593_v1 }
 0xb3c   :  { %v2009_v21 = vmul.f32 %v3595_v37, %v1972_v2  ;;  %vm2014_vm7 = vweird.f32 %v3595_v37  ;;  %v3385_v2 = vld [vmem:[%s4837_s1 + $0x9] ss:$0 sm:$0xff] }
 0xb3d   :  { %3596 = vrcp.f32 %v1973_v43  ;;  %vm2015_vm10 = vmor %vm2013_vm8, %vm2014_vm7  ;;  %v2034_v4 = vand.u32 2147483648, %v1973_v43  ;;  %v2032_v62 = vand.u32 2147483647, %v1973_v43  ;;  %vm2028_vm9 = vweird.f32 %v1973_v43 }
 0xb3e   :  { %v2010_v32 = vsub.f32 1.0, %v2009_v21 }
 0xb3f   :  { %v2035_v1 = vor.u32 1.1754944e-38, %v2034_v4  ;;  %vm2033_vm14 = vcmp.eq.f32.partialorder %v2032_v62, 8.507059e+37 }
 0xb40   :  { %v2011_v46 = vmul.f32 %v3595_v37, %v2010_v32 }
 0xb42   :  { %v2012_v59 = vadd.f32 %v3595_v37, %v2011_v46 }
 0xb43   :  { %v3597_v10 = vpop.eup %3596 }
 0xb44   :  { %v2016_v40 = vsel %vm2015_vm10, %v3595_v37, %v2012_v59  ;;  %v2024_v57 = vmul.f32 %v3597_v10, %v1973_v43  ;;  %vm2029_vm12 = vweird.f32 %v3597_v10 }
 0xb45   :  { %v2021_v53 = vsel %vm2018_vm11, %v2020_v24, %v2016_v40  ;;  %vm2030_vm13 = vmor %vm2028_vm9, %vm2029_vm12 }
 0xb46   :  { %2110 = vrot.lane.b32.xlu1 %v2021_v53, %s3707_s11  ;;  %v2025_v63 = vsub.f32 1.0, %v2024_v57 }
 0xb48   :  { %v2026_v49 = vmul.f32 %v3597_v10, %v2025_v63 }
 0xb4a   :  { %v2027_v12 = vadd.f32 %v3597_v10, %v2026_v49 }
 0xb4c   :  { %v2031_v21 = vsel %vm2030_vm13, %v3597_v10, %v2027_v12 }
 0xb4d   :  { %v2036_v37 = vsel %vm2033_vm14, %v2035_v1, %v2031_v21 }
 0xb4e   :  { %2112 = vrot.lane.b32.xlu2 %v2036_v37, %s3707_s11 }
 0xb4f   :  { %v1928_v32 = vpop.f32.mrf.mxu1 }
 0xb50   :  { %v4489_v50 = vadd.f32 %v3385_v2, %v1928_v32 }
 0xb52   :  { %v3121_v46 = vmul.f32 -1.442695, %v4489_v50 }
 0xb54   :  { %3598 = vpow2.f32 %v3121_v46 }
 0xb57   :  { %v1930_v35 = vpop.f32.mrf.mxu1 }
 0xb58   :  { %v4492_v59 = vadd.f32 %v3385_v2, %v1930_v35 }
 0xb5a   :  { %v3599_v43 = vpop.eup %3598  ;;  %v3122_v10 = vmul.f32 -1.442695, %v4492_v59 }
 0xb5b   :  { %v1974_v24 = vadd.f32 1.0, %v3599_v43 }
 0xb5c   :  { %3600 = vpow2.f32 %v3122_v10 }
 0xb5d   :  { %3602 = vrcp.f32 %v1974_v24  ;;  %v2049_v49 = vand.u32 2147483648, %v1974_v24  ;;  %v2047_v12 = vand.u32 2147483647, %v1974_v24  ;;  %vm2043_vm3 = vweird.f32 %v1974_v24 }
 0xb5f   :  { %v2050_v37 = vor.u32 1.1754944e-38, %v2049_v49  ;;  %vm2048_vm4 = vcmp.eq.f32.partialorder %v2047_v12, 8.507059e+37 }
 0xb62   :  { %v3601_v40 = vpop.eup %3600 }
 0xb63   :  { %v3603_v57 = vpop.eup %3602  ;;  %v1975_v53 = vadd.f32 1.0, %v3601_v40 }
 0xb64   :  { %v2039_v63 = vmul.f32 %v3603_v57, %v1974_v24  ;;  %vm2044_vm15 = vweird.f32 %v3603_v57 }
 0xb65   :  { %3604 = vrcp.f32 %v1975_v53  ;;  %vm2045_vm0 = vmor %vm2043_vm3, %vm2044_vm15  ;;  %v2064_v10 = vand.u32 2147483648, %v1975_v53  ;;  %vm2058_vm7 = vweird.f32 %v1975_v53 }
 0xb66   :  { %v2040_v4 = vsub.f32 1.0, %v2039_v63  ;;  %v2062_v63 = vand.u32 2147483647, %v1975_v53 }
 0xb68   :  { %v2041_v62 = vmul.f32 %v3603_v57, %v2040_v4  ;;  %v2065_v4 = vor.u32 1.1754944e-38, %v2064_v10  ;;  %vm2063_vm10 = vcmp.eq.f32.partialorder %v2062_v63, 8.507059e+37 }
 0xb6a   :  { %v2042_v1 = vadd.f32 %v3603_v57, %v2041_v62 }
 0xb6b   :  { %v3605_v21 = vpop.eup %3604 }
 0xb6c   :  { %v2046_v32 = vsel %vm2045_vm0, %v3603_v57, %v2042_v1  ;;  %v2054_v46 = vmul.f32 %v3605_v21, %v1975_v53  ;;  %vm2059_vm6 = vweird.f32 %v3605_v21 }
 0xb6d   :  { %v2051_v35 = vsel %vm2048_vm4, %v2050_v37, %v2046_v32  ;;  %vm2060_vm8 = vmor %vm2058_vm7, %vm2059_vm6 }
 0xb6e   :  { %2114 = vrot.lane.b32.xlu0 %v2051_v35, %s3707_s11  ;;  %v2055_v43 = vsub.f32 1.0, %v2054_v46 }
 0xb70   :  { %v2056_v40 = vmul.f32 %v3605_v21, %v2055_v43 }
 0xb72   :  { %v2057_v31 = vadd.f32 %v3605_v21, %v2056_v40 }
 0xb74   :  { %v2061_v62 = vsel %vm2060_vm8, %v3605_v21, %v2057_v31 }
 0xb75   :  { %v2066_v24 = vsel %vm2063_vm10, %v2065_v4, %v2061_v62 }
 0xb76   :  { %2116 = vrot.lane.b32.xlu1 %v2066_v24, %s3707_s11 }
 0xb87   :  { %v1933_v57 = vpop.f32.mrf.mxu1 }
 0xb88   :  { %v4497_v49 = vadd.f32 %v3385_v2, %v1933_v57 }
 0xb8a   :  { %v3123_v12 = vmul.f32 -1.442695, %v4497_v49 }
 0xb8c   :  { %3606 = vpow2.f32 %v3123_v12 }
 0xb8f   :  { %v1935_v1 = vpop.f32.mrf.mxu1 }
 0xb90   :  { %v4500_v37 = vadd.f32 %v3385_v2, %v1935_v1 }
 0xb92   :  { %v3607_v32 = vpop.eup %3606  ;;  %v3124_v46 = vmul.f32 -1.442695, %v4500_v37 }
 0xb93   :  { %v1976_v53 = vadd.f32 1.0, %v3607_v32 }
 0xb94   :  { %3608 = vpow2.f32 %v3124_v46 }
 0xb95   :  { %3610 = vrcp.f32 %v1976_v53  ;;  %v2079_v40 = vand.u32 2147483648, %v1976_v53  ;;  %v2077_v4 = vand.u32 2147483647, %v1976_v53  ;;  %vm2073_vm12 = vweird.f32 %v1976_v53 }
 0xb97   :  { %v2080_v24 = vor.u32 1.1754944e-38, %v2079_v40  ;;  %vm2078_vm13 = vcmp.eq.f32.partialorder %v2077_v4, 8.507059e+37 }
 0xb9a   :  { %v3609_v31 = vpop.eup %3608 }
 0xb9b   :  { %v3611_v21 = vpop.eup %3610  ;;  %v1977_v35 = vadd.f32 1.0, %v3609_v31 }
 0xb9c   :  { %v2069_v43 = vmul.f32 %v3611_v21, %v1976_v53  ;;  %vm2074_vm11 = vweird.f32 %v3611_v21 }
 0xb9d   :  { %3612 = vrcp.f32 %v1977_v35  ;;  %vm2075_vm9 = vmor %vm2073_vm12, %vm2074_vm11  ;;  %v2094_v46 = vand.u32 2147483648, %v1977_v35  ;;  %vm2088_vm15 = vweird.f32 %v1977_v35 }
 0xb9e   :  { %v2070_v10 = vsub.f32 1.0, %v2069_v43  ;;  %3614 = vtanh.f32 %v4470_v30  ;;  %v2092_v43 = vand.u32 2147483647, %v1977_v35 }
 0xb9f   :  { %3616 = vtanh.f32 %v4473_v14 }
 0xba0   :  { %v2071_v63 = vmul.f32 %v3611_v21, %v2070_v10  ;;  %v2107_v10 = vpop.permute.xlu2 %2106  ;;  %vm2093_vm0 = vcmp.eq.f32.partialorder %v2092_v43, 8.507059e+37  ;;  %3618 = vtanh.f32 %v4476_v6  ;;  %v3216_v43 = vld [vmem:[#allocation2 + $0x48] sm:$0xff] }
 0xba1   :  { %3620 = vtanh.f32 %v4479_v41  ;;  %2194 = vmatpush.bf16.msra.mxu3 %v3216_v43 }
 0xba2   :  { %v2072_v62 = vadd.f32 %v3611_v21, %v2071_v63  ;;  %3622 = vtanh.f32 %v4489_v50 }
 0xba3   :  { %v3613_v2 = vpop.eup %3612  ;;  %3624 = vtanh.f32 %v4492_v59 }
 0xba4   :  { %v2076_v57 = vsel %vm2075_vm9, %v3611_v21, %v2072_v62  ;;  %v2084_v12 = vmul.f32 %v3613_v2, %v1977_v35  ;;  %vm2089_vm14 = vweird.f32 %v3613_v2  ;;  %v3615_v63 = vpop.eup %3614  ;;  %v2095_v21 = vor.u32 1.1754944e-38, %v2094_v46 }
 0xba5   :  { %v2081_v1 = vsel %vm2078_vm13, %v2080_v24, %v2076_v57  ;;  %vm2090_vm3 = vmor %vm2088_vm15, %vm2089_vm14  ;;  %v3617_v40 = vpop.eup %3616  ;;  %v2130_v30 = vmul.f32 %v3615_v63, %v2107_v10  ;;  %v3215_v10 = vld [vmem:[#allocation2 + $0x40] sm:$0xff]  ;;  %3626 = vtanh.f32 %v4497_v49 }
 0xba6   :  { %2118 = vrot.lane.b32.xlu0 %v2081_v1, %s3707_s11  ;;  %v2085_v32 = vsub.f32 1.0, %v2084_v12  ;;  %v3619_v12 = vpop.eup %3618  ;;  %2195 = vmatpush.bf16.msra.mxu3 %v3215_v10  ;;  %3628 = vtanh.f32 %v4500_v37  ;;  %v3386_v49 = vld [vmem:[%s4840_s4 + $0x4] ss:$0 sm:$0xff] }
 0xba7   :  { %v3621_v1 = vpop.eup %3620 }
 0xba8   :  { %v2086_v31 = vmul.f32 %v3613_v2, %v2085_v32  ;;  %v2113_v35 = vpop.permute.xlu2 %2112 }
 0xba9   :  { %v2133_v46 = vmul.f32 %v3621_v1, %v2113_v35 }
 0xbaa   :  { %v2087_v53 = vadd.f32 %v3613_v2, %v2086_v31 }
 0xbac   :  { %v2109_v4 = vpop.permute.xlu0 %2108  ;;  %v2091_v62 = vsel %vm2090_vm3, %v3613_v2, %v2087_v53  ;;  %v3623_v53 = vpop.eup %3622 }
 0xbad   :  { %v2131_v24 = vmul.f32 %v3617_v40, %v2109_v4  ;;  %v2096_v14 = vsel %vm2093_vm0, %v2095_v21, %v2091_v62  ;;  %v3625_v41 = vpop.eup %3624 }
 0xbae   :  { %2120 = vrot.lane.b32.xlu1 %v2096_v14, %s3707_s11  ;;  %v3627_v59 = vpop.eup %3626 }
 0xbaf   :  { %v2138_v57 = vpack.c.bf16 %v2131_v24, %v2130_v30  ;;  %v3629_v24 = vpop.eup %3628 }
 0xbb1   :  { %2156 = vrot.lane.b32.xlu2 %v2138_v57, %s3708_s19 }
 0xbb8   :  { %v2111_v32 = vpop.permute.xlu1 %2110 }
 0xbb9   :  { %v2132_v31 = vmul.f32 %v3619_v12, %v2111_v32 }
 0xbbb   :  { %v2139_v2 = vpack.c.bf16 %v2133_v46, %v2132_v31 }
 0xbbd   :  { %2158 = vrot.lane.b32.xlu2 %v2139_v2, %s3708_s19 }
 0xbe0   :  { %v2115_v6 = vpop.permute.xlu0 %2114 }
 0xbe1   :  { %v2134_v21 = vmul.f32 %v3623_v53, %v2115_v6 }
 0xbe8   :  { %v2117_v63 = vpop.permute.xlu1 %2116 }
 0xbe9   :  { %v2135_v40 = vmul.f32 %v3625_v41, %v2117_v63 }
 0xbeb   :  { %v2140_v4 = vpack.c.bf16 %v2135_v40, %v2134_v21 }
 0xbed   :  { %2160 = vrot.lane.b32.xlu0 %v2140_v4, %s3708_s19 }
 0xc0b   :  { %v2157_v62 = vpop.permute.xlu2 %2156 }
 0xc0c   :  { %3134 = vmatmul.msk.bf16.vlgmr.msra.gmra.mxu3 %vm115_vm1, %v2157_v62 }
 0xc17   :  { %v2159_v30 = vpop.permute.xlu2 %2158 }
 0xc18   :  { %v2119_v50 = vpop.permute.xlu0 %2118 }
 0xc19   :  { %v2136_v57 = vmul.f32 %v3627_v59, %v2119_v50 }
 0xc1c   :  { %3135 = vmatmul.msk.bf16.gmra.mxu3 %vm115_vm1, %v2159_v30 }
 0xc20   :  { %v2121_v14 = vpop.permute.xlu1 %2120 }
 0xc21   :  { %v2137_v35 = vmul.f32 %v3629_v24, %v2121_v14 }
 0xc23   :  { %v2141_v12 = vpack.c.bf16 %v2137_v35, %v2136_v57  ;;  %v3220_v57 = vld [vmem:[%s4838_s2 + $0xb8] sm:$0xff] }
 0xc24   :  { %2347 = vmatpush.bf16.msra.mxu0 %v3220_v57 }
 0xc25   :  { %2162 = vrot.lane.b32.xlu1 %v2141_v12, %s3708_s19 }
 0xc5f   :  { %v2161_v1 = vpop.permute.xlu0 %2160 }
 0xc60   :  { %3136 = vmatmul.msk.bf16.gmra.mxu3 %vm115_vm1, %v2161_v1 }
 0xc8f   :  { %v2197_v32 = vpop.f32.mrf.mxu3 }
 0xc90   :  { %v4523_v37 = vadd.f32 %v3386_v49, %v2197_v32 }
 0xc92   :  { %v2217_v2 = vadd.f32 %v4523_v37, %v4373_v45 }
 0xc94   :  { %v2239_v6 = vrot.slane %v2217_v2, 4 }
 0xc97   :  { %v2163_v46 = vpop.permute.xlu1 %2162  ;;  %v2199_v31 = vpop.f32.mrf.mxu3 }
 0xc98   :  { %v4527_v43 = vadd.f32 %v3386_v49, %v2199_v31  ;;  %3137 = vmatmul.msk.bf16.gmra.mxu3 %vm115_vm1, %v2163_v46 }
 0xc9a   :  { %v2218_v10 = vadd.f32 %v4527_v43, %v4377_v60 }
 0xc9c   :  { %v2240_v53 = vrot.slane %v2218_v10, 4  ;;  %v3352_v41 = vpack.i.bf16 %v2218_v10, %v2217_v2 }
 0xc9e   :  { %3353 = vrot.lane.b32.xlu2 %v3352_v41, %s3707_s11  ;;  %v2241_v63 = vsel %vm936_vm5, %v2239_v6, %v2240_v53 }
 0xc9f   :  { %v2202_v21 = vpop.f32.mrf.mxu3 }
 0xca0   :  { %v4534_v40 = vadd.f32 %v3386_v49, %v2202_v21  ;;  %v3218_v21 = vld [vmem:[%s4838_s2 + $0xa8] sm:$0xff] }
 0xca2   :  { %v2219_v45 = vadd.f32 %v4534_v40, %v4394_v15  ;;  %v3219_v15 = vld [vmem:[%s4838_s2 + $0xb0] sm:$0xff] }
 0xca3   :  { %2348 = vmatpush.bf16.msra.mxu0 %v3219_v15 }
 0xca4   :  { %v2242_v4 = vrot.slane %v2219_v45, 4 }
 0xca6   :  { %v2243_v62 = vsel %vm936_vm5, %v2240_v53, %v2242_v4 }
 0xca7   :  { %v2204_v30 = vpop.f32.mrf.mxu3  ;;  %2349 = vmatpush.bf16.msra.mxu0 %v3218_v21 }
 0xca8   :  { %v4539_v50 = vadd.f32 %v3386_v49, %v2204_v30 }
 0xcaa   :  { %v2220_v60 = vadd.f32 %v4539_v50, %v4398_v20 }
 0xcac   :  { %v2244_v59 = vrot.slane %v2220_v60, 4  ;;  %v3357_v24 = vpack.i.bf16 %v2220_v60, %v2219_v45 }
 0xcae   :  { %3358 = vrot.lane.b32.xlu0 %v3357_v24, %s3707_s11  ;;  %v2245_v14 = vsel %vm936_vm5, %v2242_v4, %v2244_v59 }
 0xce3   :  { %v2207_v35 = vpop.f32.mrf.mxu3 }
 0xce4   :  { %v4551_v12 = vadd.f32 %v3386_v49, %v2207_v35 }
 0xce6   :  { %v2221_v20 = vadd.f32 %v4551_v12, %v4409_v26  ;;  %v3217_v26 = vld [vmem:[%s4838_s2 + $0xa0] sm:$0xff] }
 0xce7   :  { %2350 = vmatpush.bf16.msra.mxu0 %v3217_v26 }
 0xce8   :  { %v2246_v1 = vrot.slane %v2221_v20, 4 }
 0xcea   :  { %v2247_v32 = vsel %vm936_vm5, %v2244_v59, %v2246_v1 }
 0xceb   :  { %v2209_v46 = vpop.f32.mrf.mxu3 }
 0xcec   :  { %v4556_v31 = vadd.f32 %v3386_v49, %v2209_v46 }
 0xcee   :  { %v2222_v2 = vadd.f32 %v4556_v31, %v4413_v48 }
 0xcf0   :  { %v2248_v10 = vrot.slane %v2222_v2, 4  ;;  %v3362_v53 = vpack.i.bf16 %v2222_v2, %v2221_v20 }
 0xcf2   :  { %3363 = vrot.lane.b32.xlu1 %v3362_v53, %s3707_s11  ;;  %v2249_v41 = vsel %vm936_vm5, %v2246_v1, %v2248_v10 }
 0xcf8   :  { %v3354_v1 = vpop.permute.xlu2 %3353 }
 0xcf9   :  { %v3356_v21 = vunpack.i.h.bf16 %v3354_v1 }
 0xd1b   :  { %v2212_v45 = vpop.f32.mrf.mxu3 }
 0xd1c   :  { %v4568_v4 = vadd.f32 %v3386_v49, %v2212_v45  ;;  %v3355_v45 = vunpack.i.l.bf16 %v3354_v1 }
 0xd1e   :  { %4845 = vst [vmem:[#allocation6_spill] sm:$0xff] %v4568_v4  ;;  %v2223_v48 = vadd.f32 %v4568_v4, %v4431_v7 }
 0xd20   :  { %v2250_v30 = vrot.slane %v2223_v48, 4  ;;  %v3359_v60 = vpop.permute.xlu0 %3358 }
 0xd21   :  { %v3361_v59 = vunpack.i.h.bf16 %v3359_v60  ;;  %v3360_v24 = vunpack.i.l.bf16 %v3359_v60 }
 0xd22   :  { %v2251_v57 = vsel %vm936_vm5, %v2248_v10, %v2250_v30 }
 0xd23   :  { %v2214_v15 = vpop.f32.mrf.mxu3  ;;  %v2288_v35 = vsel %vm115_vm1, %v2243_v62, %v3360_v24  ;;  %v2289_v20 = vsel %vm115_vm1, %v2245_v14, %v3361_v59  ;;  %v2287_v62 = vsel %vm115_vm1, %v2241_v63, %v3356_v21 }
 0xd24   :  { %v4575_v46 = vadd.f32 %v3386_v49, %v2214_v15  ;;  %v2295_v2 = vpack.c.bf16 %v2289_v20, %v2288_v35 }
 0xd26   :  { %v2224_v53 = vadd.f32 %v4575_v46, %v4435_v52 }
 0xd28   :  { %v2230_v7 = vrot.slane %v2224_v53, 4  ;;  %v3367_v26 = vpack.i.bf16 %v2224_v53, %v2223_v48 }
 0xd2a   :  { %v2261_v60 = vsel %vm936_vm5, %v2230_v7, %v2239_v6  ;;  %3368 = vrot.lane.b32.xlu2 %v3367_v26, %s3707_s11  ;;  %v2252_v10 = vsel %vm936_vm5, %v2250_v30, %v2230_v7 }
 0xd2b   :  { %v2286_v14 = vsel %vm115_vm1, %v2261_v60, %v3355_v45 }
 0xd2c   :  { %v2294_v49 = vpack.c.bf16 %v2287_v62, %v2286_v14 }
 0xd2e   :  { %3162 = vmatmul.msk.bf16.vlgmr.msra.gmra.mxu0 %vm160_vm2, %v2294_v49 }
 0xd3e   :  { %3163 = vmatmul.msk.bf16.gmra.mxu0 %vm160_vm2, %v2295_v2  ;;  %v3387_v2 = vld [vmem:[%s4837_s1 + $0xa] ss:$0 sm:$0xff] }
 0xd64   :  { %v3364_v52 = vpop.permute.xlu1 %3363 }
 0xd65   :  { %v3366_v59 = vunpack.i.h.bf16 %v3364_v52  ;;  %v3365_v24 = vunpack.i.l.bf16 %v3364_v52 }
 0xd67   :  { %v2290_v48 = vsel %vm115_vm1, %v2247_v32, %v3365_v24  ;;  %v2291_v6 = vsel %vm115_vm1, %v2249_v41, %v3366_v59 }
 0xd68   :  { %v2296_v15 = vpack.c.bf16 %v2291_v6, %v2290_v48 }
 0xd6a   :  { %3164 = vmatmul.msk.bf16.gmra.mxu0 %vm160_vm2, %v2296_v15 }
 0xd84   :  { %v3369_v30 = vpop.permute.xlu2 %3368 }
 0xd85   :  { %v3371_v35 = vunpack.i.h.bf16 %v3369_v30  ;;  %v3370_v63 = vunpack.i.l.bf16 %v3369_v30 }
 0xd87   :  { %v2292_v20 = vsel %vm115_vm1, %v2251_v57, %v3370_v63  ;;  %v2293_v1 = vsel %vm115_vm1, %v2252_v10, %v3371_v35 }
 0xd88   :  { %v2297_v53 = vpack.c.bf16 %v2293_v1, %v2292_v20 }
 0xd8a   :  { %3165 = vmatmul.msk.bf16.gmra.mxu0 %vm160_vm2, %v2297_v53 }
 0xdab   :  { %v2352_v32 = vpop.f32.mrf.mxu0 }
 0xdac   :  { %v4595_v21 = vadd.f32 %v3387_v2, %v2352_v32 }
 0xdae   :  { %v3166_v41 = vmul.f32 -1.442695, %v4595_v21 }
 0xdb0   :  { %3630 = vpow2.f32 %v3166_v41 }
 0xdb3   :  { %v2354_v7 = vpop.f32.mrf.mxu0 }
 0xdb4   :  { %v4598_v26 = vadd.f32 %v3387_v2, %v2354_v7 }
 0xdb6   :  { %v3631_v45 = vpop.eup %3630  ;;  %v3167_v57 = vmul.f32 -1.442695, %v4598_v26 }
 0xdb7   :  { %v2404_v60 = vadd.f32 1.0, %v3631_v45 }
 0xdb8   :  { %3632 = vpow2.f32 %v3167_v57 }
 0xdb9   :  { %3634 = vrcp.f32 %v2404_v60  ;;  %v2423_v15 = vand.u32 2147483648, %v2404_v60  ;;  %v2421_v63 = vand.u32 2147483647, %v2404_v60  ;;  %vm2417_vm5 = vweird.f32 %v2404_v60 }
 0xdbb   :  { %v2357_v10 = vpop.f32.mrf.mxu0  ;;  %v2424_v7 = vor.u32 1.1754944e-38, %v2423_v15  ;;  %vm2422_vm6 = vcmp.eq.f32.partialorder %v2421_v63, 8.507059e+37 }
 0xdbc   :  { %v4601_v62 = vadd.f32 %v3387_v2, %v2357_v10 }
 0xdbe   :  { %v3633_v14 = vpop.eup %3632  ;;  %v3168_v49 = vmul.f32 -1.442695, %v4601_v62 }
 0xdbf   :  { %v3635_v52 = vpop.eup %3634  ;;  %v2405_v59 = vadd.f32 1.0, %v3633_v14 }
 0xdc0   :  { %3636 = vpow2.f32 %v3168_v49  ;;  %v2413_v24 = vmul.f32 %v3635_v52, %v2404_v60  ;;  %vm2418_vm2 = vweird.f32 %v3635_v52 }
 0xdc1   :  { %3638 = vrcp.f32 %v2405_v59  ;;  %vm2419_vm4 = vmor %vm2417_vm5, %vm2418_vm2  ;;  %v2438_v14 = vand.u32 2147483648, %v2405_v59  ;;  %vm2432_vm8 = vweird.f32 %v2405_v59 }
 0xdc2   :  { %v2414_v48 = vsub.f32 1.0, %v2413_v24  ;;  %v2436_v24 = vand.u32 2147483647, %v2405_v59 }
 0xdc3   :  { %v2359_v6 = vpop.f32.mrf.mxu0  ;;  %v2439_v15 = vor.u32 1.1754944e-38, %v2438_v14 }
 0xdc4   :  { %v4604_v30 = vadd.f32 %v3387_v2, %v2359_v6  ;;  %v2415_v35 = vmul.f32 %v3635_v52, %v2414_v48  ;;  %vm2437_vm11 = vcmp.eq.f32.partialorder %v2436_v24, 8.507059e+37 }
 0xdc6   :  { %v3637_v20 = vpop.eup %3636  ;;  %v3169_v1 = vmul.f32 -1.442695, %v4604_v30  ;;  %v2416_v53 = vadd.f32 %v3635_v52, %v2415_v35 }
 0xdc7   :  { %v3639_v32 = vpop.eup %3638  ;;  %v2406_v41 = vadd.f32 1.0, %v3637_v20 }
 0xdc8   :  { %3640 = vpow2.f32 %v3169_v1  ;;  %v2420_v45 = vsel %vm2419_vm4, %v3635_v52, %v2416_v53  ;;  %v2428_v57 = vmul.f32 %v3639_v32, %v2405_v59  ;;  %vm2433_vm7 = vweird.f32 %v3639_v32 }
 0xdc9   :  { %3642 = vrcp.f32 %v2406_v41  ;;  %v2425_v10 = vsel %vm2422_vm6, %v2424_v7, %v2420_v45  ;;  %vm2434_vm10 = vmor %vm2432_vm8, %vm2433_vm7  ;;  %v2453_v53 = vand.u32 2147483648, %v2406_v41  ;;  %v2451_v45 = vand.u32 2147483647, %v2406_v41 }
 0xdca   :  { %2540 = vrot.lane.b32.xlu0 %v2425_v10, %s3707_s11  ;;  %v2429_v2 = vsub.f32 1.0, %v2428_v57  ;;  %vm2447_vm9 = vweird.f32 %v2406_v41 }
 0xdcb   :  { %v2454_v59 = vor.u32 1.1754944e-38, %v2453_v53  ;;  %vm2452_vm14 = vcmp.eq.f32.partialorder %v2451_v45, 8.507059e+37 }
 0xdcc   :  { %v2430_v49 = vmul.f32 %v3639_v32, %v2429_v2 }
 0xdce   :  { %v3641_v48 = vpop.eup %3640  ;;  %v2431_v6 = vadd.f32 %v3639_v32, %v2430_v49 }
 0xdcf   :  { %v3643_v60 = vpop.eup %3642  ;;  %v2407_v35 = vadd.f32 1.0, %v3641_v48 }
 0xdd0   :  { %v2435_v20 = vsel %vm2434_vm10, %v3639_v32, %v2431_v6  ;;  %v2443_v52 = vmul.f32 %v3643_v60, %v2406_v41  ;;  %vm2448_vm12 = vweird.f32 %v3643_v60 }
 0xdd1   :  { %3644 = vrcp.f32 %v2407_v35  ;;  %v2440_v63 = vsel %vm2437_vm11, %v2439_v15, %v2435_v20  ;;  %vm2449_vm13 = vmor %vm2447_vm9, %vm2448_vm12  ;;  %v2468_v24 = vand.u32 2147483648, %v2407_v35  ;;  %v2466_v6 = vand.u32 2147483647, %v2407_v35 }
 0xdd2   :  { %2542 = vrot.lane.b32.xlu1 %v2440_v63, %s3707_s11  ;;  %v2444_v1 = vsub.f32 1.0, %v2443_v52  ;;  %vm2462_vm3 = vweird.f32 %v2407_v35 }
 0xdd3   :  { %v2469_v20 = vor.u32 1.1754944e-38, %v2468_v24  ;;  %vm2467_vm2 = vcmp.eq.f32.partialorder %v2466_v6, 8.507059e+37 }
 0xdd4   :  { %v2445_v7 = vmul.f32 %v3643_v60, %v2444_v1 }
 0xdd6   :  { %v2446_v57 = vadd.f32 %v3643_v60, %v2445_v7 }
 0xdd7   :  { %v3645_v10 = vpop.eup %3644 }
 0xdd8   :  { %v2450_v2 = vsel %vm2449_vm13, %v3643_v60, %v2446_v57  ;;  %v2458_v14 = vmul.f32 %v3645_v10, %v2407_v35  ;;  %vm2463_vm15 = vweird.f32 %v3645_v10  ;;  %v3388_v60 = vld [vmem:[%s4837_s1 + $0xb] ss:$0 sm:$0xff]  ;;  %s3709_s1 = smov 97  }
 0xdd9   :  { %v2455_v32 = vsel %vm2452_vm14, %v2454_v59, %v2450_v2  ;;  %vm2464_vm0 = vmor %vm2462_vm3, %vm2463_vm15 }
 0xdda   :  { %2544 = vrot.lane.b32.xlu2 %v2455_v32, %s3707_s11  ;;  %v2459_v49 = vsub.f32 1.0, %v2458_v14 }
 0xddc   :  { %v2460_v48 = vmul.f32 %v3645_v10, %v2459_v49 }
 0xdde   :  { %v2461_v15 = vadd.f32 %v3645_v10, %v2460_v48 }
 0xde0   :  { %v2465_v52 = vsel %vm2464_vm0, %v3645_v10, %v2461_v15 }
 0xde1   :  { %v2470_v41 = vsel %vm2467_vm2, %v2469_v20, %v2465_v52 }
 0xde2   :  { %2546 = vrot.lane.b32.xlu0 %v2470_v41, %s3707_s11 }
 0xde7   :  { %v2362_v63 = vpop.f32.mrf.mxu0 }
 0xde8   :  { %v4614_v1 = vadd.f32 %v3388_v60, %v2362_v63 }
 0xdea   :  { %v3170_v53 = vmul.f32 -1.442695, %v4614_v1 }
 0xdec   :  { %3646 = vpow2.f32 %v3170_v53 }
 0xdef   :  { %v2364_v7 = vpop.f32.mrf.mxu0 }
 0xdf0   :  { %v4617_v45 = vadd.f32 %v3388_v60, %v2364_v7 }
 0xdf2   :  { %v3647_v35 = vpop.eup %3646  ;;  %v3171_v57 = vmul.f32 -1.442695, %v4617_v45 }
 0xdf3   :  { %v2408_v10 = vadd.f32 1.0, %v3647_v35 }
 0xdf4   :  { %3648 = vpow2.f32 %v3171_v57 }
 0xdf5   :  { %3650 = vrcp.f32 %v2408_v10  ;;  %v2483_v24 = vand.u32 2147483648, %v2408_v10  ;;  %v2481_v6 = vand.u32 2147483647, %v2408_v10  ;;  %vm2477_vm4 = vweird.f32 %v2408_v10 }
 0xdf7   :  { %v2484_v52 = vor.u32 1.1754944e-38, %v2483_v24  ;;  %vm2482_vm7 = vcmp.eq.f32.partialorder %v2481_v6, 8.507059e+37 }
 0xdfa   :  { %v3649_v59 = vpop.eup %3648 }
 0xdfb   :  { %v3651_v2 = vpop.eup %3650  ;;  %v2409_v14 = vadd.f32 1.0, %v3649_v59 }
 0xdfc   :  { %v2473_v32 = vmul.f32 %v3651_v2, %v2408_v10  ;;  %vm2478_vm5 = vweird.f32 %v3651_v2 }
 0xdfd   :  { %3652 = vrcp.f32 %v2409_v14  ;;  %vm2479_vm6 = vmor %vm2477_vm4, %vm2478_vm5  ;;  %v2498_v57 = vand.u32 2147483648, %v2409_v14  ;;  %vm2492_vm10 = vweird.f32 %v2409_v14  ;;  %vm2843_vm4 = vcmask 7168  }
 0xdfe   :  { %v2474_v49 = vsub.f32 1.0, %v2473_v32 }
 0xdff   :  { %v2499_v24 = vor.u32 1.1754944e-38, %v2498_v57 }
 0xe00   :  { %v2475_v48 = vmul.f32 %v3651_v2, %v2474_v49  ;;  %v2496_v49 = vand.u32 2147483647, %v2409_v14 }
 0xe02   :  { %v2476_v15 = vadd.f32 %v3651_v2, %v2475_v48  ;;  %vm2497_vm12 = vcmp.eq.f32.partialorder %v2496_v49, 8.507059e+37 }
 0xe03   :  { %v3653_v20 = vpop.eup %3652 }
 0xe04   :  { %v2480_v41 = vsel %vm2479_vm6, %v3651_v2, %v2476_v15  ;;  %v2488_v63 = vmul.f32 %v3653_v20, %v2409_v14  ;;  %vm2493_vm8 = vweird.f32 %v3653_v20  ;;  %vm2852_vm6 = vcmask 15360  }
 0xe05   :  { %v2485_v53 = vsel %vm2482_vm7, %v2484_v52, %v2480_v41  ;;  %vm2494_vm11 = vmor %vm2492_vm10, %vm2493_vm8  ;;  %vm2870_vm7 = vcmask 31744   ;;  %vm2879_vm8 = vcmask 39936   ;;  %vm2888_vm10 = vcmask 48128  }
 0xe06   :  { %2548 = vrot.lane.b32.xlu1 %v2485_v53, %s3707_s11  ;;  %v2489_v7 = vsub.f32 1.0, %v2488_v63 }
 0xe07   :  { %v2367_v35 = vpop.f32.mrf.mxu0 }
 0xe08   :  { %v4621_v59 = vadd.f32 %v3388_v60, %v2367_v35  ;;  %v2490_v32 = vmul.f32 %v3653_v20, %v2489_v7 }
 0xe0a   :  { %v3172_v48 = vmul.f32 -1.442695, %v4621_v59  ;;  %v2491_v10 = vadd.f32 %v3653_v20, %v2490_v32 }
 0xe0c   :  { %3654 = vpow2.f32 %v3172_v48  ;;  %v2495_v2 = vsel %vm2494_vm11, %v3653_v20, %v2491_v10 }
 0xe0d   :  { %v2500_v6 = vsel %vm2497_vm12, %v2499_v24, %v2495_v2 }
 0xe0e   :  { %2550 = vrot.lane.b32.xlu2 %v2500_v6, %s3707_s11 }
 0xe0f   :  { %v2369_v15 = vpop.f32.mrf.mxu0 }
 0xe10   :  { %v4625_v52 = vadd.f32 %v3388_v60, %v2369_v15 }
 0xe12   :  { %v3655_v41 = vpop.eup %3654  ;;  %v3173_v63 = vmul.f32 -1.442695, %v4625_v52 }
 0xe13   :  { %v2410_v53 = vadd.f32 1.0, %v3655_v41 }
 0xe14   :  { %3656 = vpow2.f32 %v3173_v63 }
 0xe15   :  { %3658 = vrcp.f32 %v2410_v53  ;;  %v2513_v20 = vand.u32 2147483648, %v2410_v53  ;;  %v2511_v48 = vand.u32 2147483647, %v2410_v53  ;;  %vm2507_vm13 = vweird.f32 %v2410_v53 }
 0xe17   :  { %v2514_v24 = vor.u32 1.1754944e-38, %v2513_v20  ;;  %vm2512_vm15 = vcmp.eq.f32.partialorder %v2511_v48, 8.507059e+37 }
 0xe1a   :  { %v3657_v7 = vpop.eup %3656 }
 0xe1b   :  { %v3659_v35 = vpop.eup %3658  ;;  %v2411_v14 = vadd.f32 1.0, %v3657_v7 }
 0xe1c   :  { %v2503_v32 = vmul.f32 %v3659_v35, %v2410_v53  ;;  %vm2508_vm9 = vweird.f32 %v3659_v35 }
 0xe1d   :  { %3660 = vrcp.f32 %v2411_v14  ;;  %vm2509_vm14 = vmor %vm2507_vm13, %vm2508_vm9  ;;  %v2528_v63 = vand.u32 2147483648, %v2411_v14  ;;  %vm2522_vm0 = vweird.f32 %v2411_v14 }
 0xe1e   :  { %v2504_v57 = vsub.f32 1.0, %v2503_v32  ;;  %v2526_v32 = vand.u32 2147483647, %v2411_v14  ;;  %3662 = vtanh.f32 %v4595_v21 }
 0xe1f   :  { %3664 = vtanh.f32 %v4598_v26 }
 0xe20   :  { %v2505_v49 = vmul.f32 %v3659_v35, %v2504_v57  ;;  %v2529_v57 = vor.u32 1.1754944e-38, %v2528_v63  ;;  %vm2527_vm5 = vcmp.eq.f32.partialorder %v2526_v32, 8.507059e+37  ;;  %3666 = vtanh.f32 %v4601_v62  ;;  %v3222_v63 = vld [vmem:[#allocation2 + $0x58] sm:$0xff] }
 0xe21   :  { %3668 = vtanh.f32 %v4604_v30  ;;  %2628 = vmatpush.bf16.msra.mxu2 %v3222_v63 }
 0xe22   :  { %v2506_v10 = vadd.f32 %v3659_v35, %v2505_v49  ;;  %3670 = vtanh.f32 %v4614_v1 }
 0xe23   :  { %v3661_v60 = vpop.eup %3660  ;;  %3672 = vtanh.f32 %v4617_v45 }
 0xe24   :  { %v2510_v2 = vsel %vm2509_vm14, %v3659_v35, %v2506_v10  ;;  %v2518_v6 = vmul.f32 %v3661_v60, %v2411_v14  ;;  %vm2523_vm3 = vweird.f32 %v3661_v60  ;;  %v3663_v20 = vpop.eup %3662  ;;  %3674 = vtanh.f32 %v4621_v59 }
 0xe25   :  { %v2515_v15 = vsel %vm2512_vm15, %v2514_v24, %v2510_v2  ;;  %vm2524_vm2 = vmor %vm2522_vm0, %vm2523_vm3  ;;  %v3665_v48 = vpop.eup %3664  ;;  %3676 = vtanh.f32 %v4625_v52 }
 0xe26   :  { %2552 = vrot.lane.b32.xlu1 %v2515_v15, %s3707_s11  ;;  %v2519_v41 = vsub.f32 1.0, %v2518_v6  ;;  %v3667_v14 = vpop.eup %3666 }
 0xe28   :  { %v2520_v7 = vmul.f32 %v3661_v60, %v2519_v41 }
 0xe2a   :  { %v2521_v4 = vadd.f32 %v3661_v60, %v2520_v7 }
 0xe2c   :  { %v2525_v49 = vsel %vm2524_vm2, %v3661_v60, %v2521_v4  ;;  %v3669_v60 = vpop.eup %3668 }
 0xe2d   :  { %v2530_v53 = vsel %vm2527_vm5, %v2529_v57, %v2525_v49  ;;  %v3671_v30 = vpop.eup %3670 }
 0xe2e   :  { %2554 = vrot.lane.b32.xlu2 %v2530_v53, %s3707_s11  ;;  %v3673_v7 = vpop.eup %3672  ;;  %s3710_s11 = smov 98  }
 0xe34   :  { %v2545_v4 = vpop.permute.xlu2 %2544 }
 0xe35   :  { %v2566_v21 = vmul.f32 %v3667_v14, %v2545_v4 }
 0xe3c   :  { %v2541_v35 = vpop.permute.xlu0 %2540 }
 0xe3d   :  { %v2564_v24 = vmul.f32 %v3663_v20, %v2541_v35 }
 0xe44   :  { %v2543_v10 = vpop.permute.xlu1 %2542 }
 0xe45   :  { %v2565_v2 = vmul.f32 %v3665_v48, %v2543_v10 }
 0xe47   :  { %v2572_v6 = vpack.c.bf16 %v2565_v2, %v2564_v24 }
 0xe49   :  { %2590 = vrot.lane.b32.xlu0 %v2572_v6, %s3708_s19 }
 0xe54   :  { %v2547_v15 = vpop.permute.xlu0 %2546 }
 0xe55   :  { %v2567_v41 = vmul.f32 %v3669_v60, %v2547_v15 }
 0xe57   :  { %v2573_v26 = vpack.c.bf16 %v2567_v41, %v2566_v21 }
 0xe59   :  { %2592 = vrot.lane.b32.xlu0 %v2573_v26, %s3708_s19 }
 0xe61   :  { %2659 = vrot.lane.b32.xlu0 %v3890_v56, %s3708_s19 }
 0xe68   :  { %v2551_v62 = vpop.permute.xlu2 %2550 }
 0xe69   :  { %2665 = vrot.lane.b32.xlu0 %v3907_v5, %s3708_s19  ;;  %v2569_v57 = vmul.f32 %v3673_v7, %v2551_v62  ;;  %v3221_v5 = vld [vmem:[#allocation2 + $0x50] sm:$0xff]  ;;  %v3389_v62 = vld [vmem:[%s4840_s4 + $0x5] ss:$0 sm:$0xff] }
 0xe6a   :  { %2629 = vmatpush.bf16.msra.mxu2 %v3221_v5 }
 0xe71   :  { %2671 = vrot.lane.b32.xlu0 %v3944_v25, %s3708_s19  ;;  %v3675_v25 = vpop.eup %3674 }
 0xe78   :  { %v2549_v32 = vpop.permute.xlu1 %2548 }
 0xe79   :  { %v2568_v49 = vmul.f32 %v3671_v30, %v2549_v32  ;;  %2693 = vrot.lane.b32.xlu0 %v4052_v33, %s3709_s1  ;;  %v3677_v33 = vpop.eup %3676 }
 0xe7b   :  { %v2574_v56 = vpack.c.bf16 %v2569_v57, %v2568_v49 }
 0xe7d   :  { %2594 = vrot.lane.b32.xlu1 %v2574_v56, %s3708_s19 }
 0xe81   :  { %2699 = vrot.lane.b32.xlu0 %v4089_v55, %s3709_s1 }
 0xe85   :  { %2661 = vrot.lane.b32.xlu1 %v3892_v58, %s3708_s19 }
 0xe88   :  { %v2555_v58 = vpop.permute.xlu2 %2554 }
 0xe89   :  { %2705 = vrot.lane.b32.xlu0 %v4106_v18, %s3709_s1  ;;  %v2571_v18 = vmul.f32 %v3677_v33, %v2555_v58 }
 0xe8d   :  { %2667 = vrot.lane.b32.xlu1 %v3929_v17, %s3708_s19 }
 0xe91   :  { %2727 = vrot.lane.b32.xlu0 %v4222_v38, %s3710_s11 }
 0xe95   :  { %2673 = vrot.lane.b32.xlu1 %v3946_v27, %s3708_s19 }
 0xe98   :  { %v2553_v55 = vpop.permute.xlu1 %2552 }
 0xe99   :  { %v2570_v1 = vmul.f32 %v3675_v25, %v2553_v55  ;;  %2733 = vrot.lane.b32.xlu0 %v4248_v39, %s3710_s11 }
 0xe9b   :  { %v2575_v17 = vpack.c.bf16 %v2571_v18, %v2570_v1 }
 0xe9d   :  { %2695 = vrot.lane.b32.xlu1 %v4065_v54, %s3709_s1  ;;  %2596 = vrot.lane.b32.xlu2 %v2575_v17, %s3708_s19 }
 0xea1   :  { %2755 = vrot.lane.b32.xlu0 %v4367_v28, %s3711_s13  ;;  %v4847_v28 = vld [vmem:[#allocation6_spill] sm:$0xff] }
 0xea5   :  { %2701 = vrot.lane.b32.xlu1 %v4091_v61, %s3709_s1  ;;  %2663 = vrot.lane.b32.xlu2 %v3905_v0, %s3708_s19  ;;  %v4846_v61 = vld [vmem:[#allocation5_spill] sm:$0xff] }
 0xea9   :  { %2761 = vrot.lane.b32.xlu0 %v4390_v8, %s3711_s13 }
 0xead   :  { %2723 = vrot.lane.b32.xlu1 %v4204_v16, %s3710_s11  ;;  %2669 = vrot.lane.b32.xlu2 %v3931_v19, %s3708_s19 }
 0xeb1   :  { %2767 = vrot.lane.b32.xlu0 %v4424_v42, %s3711_s13 }
 0xeb5   :  { %2729 = vrot.lane.b32.xlu1 %v4224_v47, %s3710_s11  ;;  %2691 = vrot.lane.b32.xlu2 %v4050_v44, %s3709_s1 }
 0xeb9   :  { %2789 = vrot.lane.b32.xlu0 %v4527_v43, %s3712_s14 }
 0xebb   :  { %v2591_v0 = vpop.permute.xlu0 %2590 }
 0xebc   :  { %3183 = vmatmul.msk.bf16.vlgmr.msra.gmra.mxu2 %vm115_vm1, %v2591_v0 }
 0xebd   :  { %2735 = vrot.lane.b32.xlu1 %v4261_v3, %s3710_s11  ;;  %2697 = vrot.lane.b32.xlu2 %v4067_v51, %s3709_s1 }
 0xec1   :  { %2795 = vrot.lane.b32.xlu0 %v4551_v12, %s3712_s14 }
 0xec5   :  { %2757 = vrot.lane.b32.xlu1 %v4369_v34, %s3711_s13  ;;  %2703 = vrot.lane.b32.xlu2 %v4104_v11, %s3709_s1 }
 0xec9   :  { %2801 = vrot.lane.b32.xlu0 %v4575_v46, %s3712_s14 }
 0xecb   :  { %v2593_v19 = vpop.permute.xlu0 %2592 }
 0xecc   :  { %3184 = vmatmul.msk.bf16.gmra.mxu2 %vm115_vm1, %v2593_v19 }
 0xecd   :  { %2763 = vrot.lane.b32.xlu1 %v4403_v22, %s3711_s13  ;;  %2725 = vrot.lane.b32.xlu2 %v4206_v36, %s3710_s11 }
 0xed3   :  { %v2660_v27 = vpop.permute.xlu0 %2659 }
 0xed5   :  { %2769 = vrot.lane.b32.xlu1 %v4426_v29, %s3711_s13  ;;  %2731 = vrot.lane.b32.xlu2 %v4243_v23, %s3710_s11 }
 0xedb   :  { %v2666_v44 = vpop.permute.xlu0 %2665 }
 0xedd   :  { %2791 = vrot.lane.b32.xlu1 %v4534_v40, %s3712_s14  ;;  %2737 = vrot.lane.b32.xlu2 %v4263_v9, %s3710_s11 }
 0xee3   :  { %v2672_v54 = vpop.permute.xlu0 %2671 }
 0xee5   :  { %2797 = vrot.lane.b32.xlu1 %v4556_v31, %s3712_s14  ;;  %2759 = vrot.lane.b32.xlu2 %v4388_v13, %s3711_s13 }
 0xeeb   :  { %v4716_v51 = vpop.permute.xlu0 %2693 }
 0xeed   :  { %2765 = vrot.lane.b32.xlu2 %v4846_v61, %s3711_s13 }
 0xeef   :  { %v2595_v11 = vpop.permute.xlu1 %2594 }
 0xef0   :  { %3185 = vmatmul.msk.bf16.gmra.mxu2 %vm115_vm1, %v2595_v11 }
 0xef3   :  { %v2700_v16 = vpop.permute.xlu0 %2699 }
 0xef5   :  { %2787 = vrot.lane.b32.xlu2 %v4523_v37, %s3712_s14 }
 0xef7   :  { %v2597_v36 = vpop.permute.xlu2 %2596  ;;  %v4723_v38 = vpop.permute.xlu1 %2661 }
 0xefb   :  { %v2706_v47 = vpop.permute.xlu0 %2705 }
 0xefd   :  { %2793 = vrot.lane.b32.xlu2 %v4539_v50, %s3712_s14 }
 0xeff   :  { %v2664_v23 = vpop.permute.xlu2 %2663  ;;  %v2668_v39 = vpop.permute.xlu1 %2667 }
 0xf00   :  { %v2848_v3 = vsel %vm2843_vm4, %v2668_v39, %v2700_v16  ;;  %3186 = vmatmul.msk.bf16.gmra.mxu2 %vm115_vm1, %v2597_v36  ;;  %vm2861_vm1 = vcmask 23552  }
 0xf03   :  { %v2728_v9 = vpop.permute.xlu0 %2727 }
 0xf05   :  { %2799 = vrot.lane.b32.xlu2 %v4847_v28, %s3712_s14 }
 0xf07   :  { %v2670_v34 = vpop.permute.xlu2 %2669  ;;  %v2674_v13 = vpop.permute.xlu1 %2673 }
 0xf08   :  { %v2851_v8 = vsel %vm2843_vm4, %v2674_v13, %v2706_v47 }
 0xf0b   :  { %v2734_v22 = vpop.permute.xlu0 %2733 }
 0xf0f   :  { %v2692_v42 = vpop.permute.xlu2 %2691  ;;  %v2696_v29 = vpop.permute.xlu1 %2695 }
 0xf10   :  { %v4733_v37 = vsel %vm2843_vm4, %v2660_v27, %v2692_v42  ;;  %v2846_v43 = vsel %vm2843_vm4, %v2664_v23, %v2696_v29  ;;  %v2845_v42 = vsel %vm2843_vm4, %v4723_v38, %v4716_v51 }
 0xf11   :  { %v2855_v40 = vsel %vm2852_vm6, %v2846_v43, %v2728_v9 }
 0xf13   :  { %v4737_v50 = vpop.permute.xlu0 %2755 }
 0xf17   :  { %v2698_v12 = vpop.permute.xlu2 %2697  ;;  %v2702_v31 = vpop.permute.xlu1 %2701 }
 0xf18   :  { %v2847_v46 = vsel %vm2843_vm4, %v2666_v44, %v2698_v12  ;;  %v2849_v45 = vsel %vm2843_vm4, %v2670_v34, %v2702_v31 }
 0xf19   :  { %v2858_v59 = vsel %vm2852_vm6, %v2849_v45, %v2734_v22 }
 0xf1b   :  { %v4744_v35 = vpop.permute.xlu0 %2761 }
 0xf1f   :  { %v2704_v52 = vpop.permute.xlu2 %2703  ;;  %v4742_v53 = vpop.permute.xlu1 %2723 }
 0xf20   :  { %v2850_v20 = vsel %vm2843_vm4, %v2672_v54, %v2704_v52  ;;  %v2853_v51 = vsel %vm2852_vm6, %v4733_v37, %v4742_v53 }
 0xf21   :  { %v2862_v38 = vsel %vm2861_vm1, %v2853_v51, %v4737_v50 }
 0xf23   :  { %v2768_v2 = vpop.permute.xlu0 %2767 }
 0xf27   :  { %v2726_v48 = vpop.permute.xlu2 %2725  ;;  %v2730_v10 = vpop.permute.xlu1 %2729 }
 0xf28   :  { %v4748_v24 = vsel %vm2852_vm6, %v2847_v46, %v2730_v10  ;;  %v2854_v29 = vsel %vm2852_vm6, %v2845_v42, %v2726_v48 }
 0xf29   :  { %v2865_v37 = vsel %vm2861_vm1, %v4748_v24, %v4744_v35 }
 0xf2b   :  { %v2790_v21 = vpop.permute.xlu0 %2789 }
 0xf2f   :  { %v2732_v6 = vpop.permute.xlu2 %2731  ;;  %v2736_v4 = vpop.permute.xlu1 %2735 }
 0xf30   :  { %v4751_v14 = vsel %vm2852_vm6, %v2848_v3, %v2732_v6  ;;  %v2859_v60 = vsel %vm2852_vm6, %v2850_v20, %v2736_v4 }
 0xf31   :  { %v2868_v15 = vsel %vm2861_vm1, %v2859_v60, %v2768_v2 }
 0xf33   :  { %v4759_v30 = vpop.permute.xlu0 %2795 }
 0xf37   :  { %v2738_v41 = vpop.permute.xlu2 %2737  ;;  %v2758_v26 = vpop.permute.xlu1 %2757 }
 0xf38   :  { %v2860_v63 = vsel %vm2852_vm6, %v2851_v8, %v2738_v41  ;;  %v2863_v43 = vsel %vm2861_vm1, %v2854_v29, %v2758_v26 }
 0xf39   :  { %v2872_v12 = vsel %vm2870_vm7, %v2863_v43, %v2790_v21 }
 0xf3b   :  { %v2802_v25 = vpop.permute.xlu0 %2801 }
 0xf3f   :  { %v2760_v7 = vpop.permute.xlu2 %2759  ;;  %v2764_v32 = vpop.permute.xlu1 %2763 }
 0xf40   :  { %v2864_v57 = vsel %vm2861_vm1, %v2855_v40, %v2760_v7  ;;  %v2631_v49 = vpop.f32.mrf.mxu2  ;;  %v2866_v50 = vsel %vm2861_vm1, %v4751_v14, %v2764_v32 }
 0xf41   :  { %v2632_v56 = vadd.f32 %v3389_v62, %v2631_v49  ;;  %v2875_v4 = vsel %vm2870_vm7, %v2866_v50, %v4759_v30 }
 0xf43   :  { %2819 = vrot.lane.b32.xlu1 %v2632_v56, %s3713_s16 }
 0xf47   :  { %v2766_v5 = vpop.permute.xlu2 %2765  ;;  %v2770_v58 = vpop.permute.xlu1 %2769 }
 0xf48   :  { %v2867_v33 = vsel %vm2861_vm1, %v2858_v59, %v2766_v5  ;;  %v2869_v55 = vsel %vm2861_vm1, %v2860_v63, %v2770_v58  ;;  %v2633_v18 = vpop.f32.mrf.mxu2 }
 0xf49   :  { %v2634_v1 = vadd.f32 %v3389_v62, %v2633_v18  ;;  %v2878_v17 = vsel %vm2870_vm7, %v2869_v55, %v2802_v25 }
 0xf4b   :  { %2821 = vrot.lane.b32.xlu2 %v2634_v1, %s3713_s16 }
 0xf4f   :  { %v2788_v0 = vpop.permute.xlu2 %2787  ;;  %v2792_v19 = vpop.permute.xlu1 %2791 }
 0xf50   :  { %v2636_v27 = vpop.f32.mrf.mxu2  ;;  %v2871_v46 = vsel %vm2870_vm7, %v2862_v38, %v2788_v0  ;;  %v2873_v52 = vsel %vm2870_vm7, %v2864_v57, %v2792_v19 }
 0xf51   :  { %v2637_v44 = vadd.f32 %v3389_v62, %v2636_v27 }
 0xf53   :  { %2823 = vrot.lane.b32.xlu0 %v2637_v44, %s3713_s16 }
 0xf57   :  { %v2794_v54 = vpop.permute.xlu2 %2793  ;;  %v2798_v61 = vpop.permute.xlu1 %2797 }
 0xf58   :  { %v2876_v11 = vsel %vm2870_vm7, %v2867_v33, %v2798_v61  ;;  %v2638_v16 = vpop.f32.mrf.mxu2  ;;  %v2874_v53 = vsel %vm2870_vm7, %v2865_v37, %v2794_v54 }
 0xf59   :  { %v2639_v36 = vadd.f32 %v3389_v62, %v2638_v16 }
 0xf5b   :  { %2825 = vrot.lane.b32.xlu1 %v2639_v36, %s3713_s16 }
 0xf5f   :  { %v2800_v47 = vpop.permute.xlu2 %2799 }
 0xf60   :  { %v2877_v23 = vsel %vm2870_vm7, %v2868_v15, %v2800_v47 }
 0xf73   :  { %v2641_v39 = vpop.f32.mrf.mxu2 }
 0xf74   :  { %v2642_v3 = vadd.f32 %v3389_v62, %v2641_v39 }
 0xf76   :  { %2827 = vrot.lane.b32.xlu2 %v2642_v3, %s3713_s16 }
 0xf7b   :  { %v2643_v9 = vpop.f32.mrf.mxu2 }
 0xf7c   :  { %v2644_v28 = vadd.f32 %v3389_v62, %v2643_v9 }
 0xf7e   :  { %2829 = vrot.lane.b32.xlu0 %v2644_v28, %s3713_s16 }
 0xf83   :  { %v2646_v34 = vpop.f32.mrf.mxu2 }
 0xf84   :  { %v2647_v13 = vadd.f32 %v3389_v62, %v2646_v34 }
 0xf86   :  { %2831 = vrot.lane.b32.xlu1 %v2647_v13, %s3713_s16 }
 0xf8b   :  { %v2648_v8 = vpop.f32.mrf.mxu2 }
 0xf8c   :  { %v2649_v22 = vadd.f32 %v3389_v62, %v2648_v8 }
 0xf8e   :  { %2833 = vrot.lane.b32.xlu2 %v2649_v22, %s3713_s16 }
 0xfa5   :  { %v2822_v40 = vpop.permute.xlu2 %2821 }
 0xfa6   :  { %v2881_v31 = vsel %vm2879_vm8, %v2872_v12, %v2822_v40 }
 0xfa7   :  { %2890 = vst.msk [vmem:[%s4841_s5 + $0x8] sm:$0xff] %vm2888_vm10, %v2881_v31 }
 0xfb5   :  { %v2820_v45 = vpop.permute.xlu1 %2819 }
 0xfb6   :  { %v2880_v59 = vsel %vm2879_vm8, %v2871_v46, %v2820_v45 }
 0xfb7   :  { %2889 = vst.msk [vmem:[%s4841_s5] sm:$0xff] %vm2888_vm10, %v2880_v59 }
 0xfc5   :  { %v2824_v20 = vpop.permute.xlu0 %2823 }
 0xfc6   :  { %v2882_v48 = vsel %vm2879_vm8, %v2873_v52, %v2824_v20 }
 0xfc7   :  { %2891 = vst.msk [vmem:[%s4841_s5 + $0x10] sm:$0xff] %vm2888_vm10, %v2882_v48 }
 0xfcd   :  { %v2826_v10 = vpop.permute.xlu1 %2825 }
 0xfce   :  { %v2883_v2 = vsel %vm2879_vm8, %v2874_v53, %v2826_v10 }
 0xfcf   :  { %2892 = vst.msk [vmem:[%s4841_s5 + $0x18] sm:$0xff] %vm2888_vm10, %v2883_v2 }
 0xfd0   :  { %v2828_v6 = vpop.permute.xlu2 %2827 }
 0xfd1   :  { %v2884_v60 = vsel %vm2879_vm8, %v2875_v4, %v2828_v6 }
 0xfd2   :  { %2893 = vst.msk [vmem:[%s4841_s5 + $0x20] sm:$0xff] %vm2888_vm10, %v2884_v60 }
 0xfe8   :  { %v2834_v35 = vpop.permute.xlu2 %2833 }
 0xfe9   :  { %v2887_v24 = vsel %vm2879_vm8, %v2878_v17, %v2834_v35 }
 0xfea   :  { %2896 = vst.msk [vmem:[%s4841_s5 + $0x38] sm:$0xff] %vm2888_vm10, %v2887_v24 }
 0xff0   :  { %v2830_v14 = vpop.permute.xlu0 %2829 }
 0xff1   :  { %v2885_v15 = vsel %vm2879_vm8, %v2876_v11, %v2830_v14 }
 0xff2   :  { %2894 = vst.msk [vmem:[%s4841_s5 + $0x28] sm:$0xff] %vm2888_vm10, %v2885_v15 }
 0xff8   :  { %v2832_v21 = vpop.permute.xlu1 %2831 }
 0xff9   :  { %v2886_v41 = vsel %vm2879_vm8, %v2877_v23, %v2832_v21 }
 0xffa   :  { %2895 = vst.msk [vmem:[%s4841_s5 + $0x30] sm:$0xff] %vm2888_vm10, %v2886_v41 }
 0xffb   :  { %2901 = vsyncpa [#allocation3], 1 }

</bundles_post_ra>
